<compile_context>
chip_gen: v7x
topology: tpu7x:2x2x1
jax: 0.10.0
libtpu: 0.0.40
codegen_flags: <defaults>
</compile_context>

<pallas_src>
import math
from functools import partial

import jax
import jax.numpy as jnp
from jax import lax
from jax.experimental import pallas as pl
from jax.experimental.pallas import tpu as pltpu


def _gelu_tanh(x):
    c = math.sqrt(2.0 / math.pi)
    return 0.5 * x * (1.0 + jnp.tanh(c * (x + 0.044715 * x * x * x)))


# ----------------------------------------------------------------------------
# Fused kernel
# ----------------------------------------------------------------------------
def hffb_kernel(xp_ref, w3_ref, b3_ref, w4_ref, b4_ref, wr_ref, br_ref,
                o_ref, *, H, W):
    """Fused HFFB forward for one batch element.

    xp_ref : (1, H+2, W+2, C)  zero-padded NHWC input
    w3_ref : (9, C, G)  densified grouped-conv weight, tap-major (G = C//2)
    b3_ref : (1, G)
    w4_ref : (G, C)     1x1 conv weight, pre-transposed so y = x @ W
    b4_ref : (1, C)
    wr_ref : (C, C)     residual 1x1 conv weight, pre-transposed
    br_ref : (1, C)
    o_ref  : (1, H*W, C)
    """
    xp = xp_ref[0].astype(jnp.float32)            # (H+2, W+2, C)
    C = xp.shape[-1]
    G = C // 2

    # Residual path reads the *un-activated* center crop.
    x_center = xp[1:H + 1, 1:W + 1, :].reshape(H * W, C)

    # GELU(0) == 0, so GELU(zero-padded x) == zero-padded GELU(x).
    g1 = _gelu_tanh(xp)                           # (H+2, W+2, C)

    # Grouped 3x3 conv as 9 shifted dense matmuls on the MXU.
    acc = jnp.zeros((H * W, G), jnp.float32) + b3_ref[...]
    for t in range(9):                            # static unroll over taps
        dy, dx = t // 3, t % 3
        win = g1[dy:dy + H, dx:dx + W, :].reshape(H * W, C)
        acc = acc + jnp.dot(win, w3_ref[t],
                            preferred_element_type=jnp.float32)

    y3 = _gelu_tanh(acc)                                              # (HW, G)
    y4 = jnp.dot(y3, w4_ref[...],
                 preferred_element_type=jnp.float32) + b4_ref[...]    # (HW, C)
    res = jnp.dot(x_center, wr_ref[...],
                  preferred_element_type=jnp.float32) + br_ref[...]   # (HW, C)
    o_ref[0] = (y4 + res).astype(o_ref.dtype)


# ----------------------------------------------------------------------------
# pallas_call wrapper
# ----------------------------------------------------------------------------
def hffb_forward(x, kernel_params):
    """x: (B, C, H, W) float32  ->  (B, C, H, W)."""
    B, C, H, W = x.shape
    G = C // 2
    w3d, b3, w4t, b4, wrt, br = kernel_params

    # NCHW -> NHWC, zero-pad spatially for the 3x3 conv.
    x_nhwc = jnp.transpose(x, (0, 2, 3, 1))
    xp = jnp.pad(x_nhwc, ((0, 0), (1, 1), (1, 1), (0, 0)))

    out = pl.pallas_call(
        partial(hffb_kernel, H=H, W=W),
        out_shape=jax.ShapeDtypeStruct((B, H * W, C), x.dtype),
        grid=(B,),
        in_specs=[
            pl.BlockSpec((1, H + 2, W + 2, C), lambda b: (b, 0, 0, 0)),
            pl.BlockSpec((9, C, G), lambda b: (0, 0, 0)),
            pl.BlockSpec((1, G), lambda b: (0, 0)),
            pl.BlockSpec((G, C), lambda b: (0, 0)),
            pl.BlockSpec((1, C), lambda b: (0, 0)),
            pl.BlockSpec((C, C), lambda b: (0, 0)),
            pl.BlockSpec((1, C), lambda b: (0, 0)),
        ],
        out_specs=pl.BlockSpec((1, H * W, C), lambda b: (b, 0, 0)),
        compiler_params=pltpu.CompilerParams(
            dimension_semantics=("parallel",)),
    )(xp, w3d, b3, w4t, b4, wrt, br)

    return jnp.transpose(out.reshape(B, H, W, C), (0, 3, 1, 2))


# ----------------------------------------------------------------------------
# Parameters
# ----------------------------------------------------------------------------
def densify_grouped_weight(w3):
    """(G, 2, 3, 3) grouped-conv weight -> (9, 2G, G) block-diagonal dense.

    dense[t, 2*g + ci, gout] = w3[g, ci, t//3, t%3] * (g == gout)
    """
    G = w3.shape[0]
    taps = jnp.transpose(w3, (2, 3, 0, 1)).reshape(9, G, 2)   # (tap, g, ci)
    eye = jnp.eye(G, dtype=w3.dtype)                          # (g, gout)
    dense = taps[:, :, :, None] * eye[None, :, None, :]       # (9, G, 2, G)
    return dense.reshape(9, 2 * G, G)


def make_hffb_params(key, C):
    """torch-Conv2d-style uniform init; returns (torch-layout, kernel-layout)."""
    G = C // 2
    ks = jax.random.split(key, 6)

    def u(k, shape, fan_in):
        bound = 1.0 / math.sqrt(fan_in)
        return jax.random.uniform(k, shape, jnp.float32, -bound, bound)

    w3 = u(ks[0], (G, 2, 3, 3), 2 * 3 * 3)   # grouped 3x3, C -> C/2, groups=C/2
    b3 = u(ks[1], (G,), 2 * 3 * 3)
    w4 = u(ks[2], (C, G, 1, 1), G)           # 1x1, C/2 -> C
    b4 = u(ks[3], (C,), G)
    wr = u(ks[4], (C, C, 1, 1), C)           # residual 1x1, C -> C
    br = u(ks[5], (C,), C)
    torch_params = (w3, b3, w4, b4, wr, br)

    kernel_params = (
        densify_grouped_weight(w3),
        b3.reshape(1, G),
        jnp.transpose(w4[:, :, 0, 0]),       # (G, C)
        b4.reshape(1, C),
        jnp.transpose(wr[:, :, 0, 0]),       # (C, C)
        br.reshape(1, C),
    )
    return torch_params, kernel_params


# ----------------------------------------------------------------------------
# Pure-JAX reference (mirrors the PyTorch module, tanh-GELU)
# ----------------------------------------------------------------------------
def hffb_reference(x, torch_params):
    w3, b3, w4, b4, wr, br = torch_params
    G = w3.shape[0]
    dn = ('NCHW', 'OIHW', 'NCHW')
    y = _gelu_tanh(x)
    y = lax.conv_general_dilated(
        y, w3, (1, 1), ((1, 1), (1, 1)), dimension_numbers=dn,
        feature_group_count=G, precision=lax.Precision.HIGHEST)
    y = y + b3[None, :, None, None]
    y = _gelu_tanh(y)
    y = lax.conv_general_dilated(
        y, w4, (1, 1), ((0, 0), (0, 0)), dimension_numbers=dn,
        precision=lax.Precision.HIGHEST) + b4[None, :, None, None]
    r = lax.conv_general_dilated(
        x, wr, (1, 1), ((0, 0), (0, 0)), dimension_numbers=dn,
        precision=lax.Precision.HIGHEST) + br[None, :, None, None]
    return y + r


# ----------------------------------------------------------------------------
# Driver
# ----------------------------------------------------------------------------
if __name__ == "__main__":
    hidden_dim = 32
    B, H, W = 2, 16, 16

    root = jax.random.PRNGKey(0)
    k_param, k_x = jax.random.split(root)
    torch_params, kernel_params = make_hffb_params(k_param, hidden_dim)
    x = jax.random.normal(k_x, (B, hidden_dim, H, W), jnp.float32)

    fwd = jax.jit(hffb_forward)
    out = jax.block_until_ready(fwd(x, kernel_params))

    assert out.shape == (B, hidden_dim, H, W), out.shape
    assert bool(jnp.all(jnp.isfinite(out)))

    ref = jax.block_until_ready(hffb_reference(x, torch_params))
    err = float(jnp.max(jnp.abs(out - ref)))
    assert err < 1e-3, f"mismatch vs reference: max abs err = {err}"

    print("KERNEL_OK")
</pallas_src>

<mosaic_0001>
module attributes {stable_mosaic.version = 11 : i64} {
  func.func @hffb_kernel(%arg0: i32, %arg1: memref<1x18x18x32xf32, #tpu.memory_space<vmem>>, %arg2: memref<9x32x16xf32, #tpu.memory_space<vmem>>, %arg3: memref<1x16xf32, #tpu.memory_space<vmem>>, %arg4: memref<16x32xf32, #tpu.memory_space<vmem>>, %arg5: memref<1x32xf32, #tpu.memory_space<vmem>>, %arg6: memref<32x32xf32, #tpu.memory_space<vmem>>, %arg7: memref<1x32xf32, #tpu.memory_space<vmem>>, %arg8: memref<1x256x32xf32, #tpu.memory_space<vmem>>) attributes {dimension_semantics = [#tpu.dimension_semantics<parallel>], iteration_bounds = array<i64: 2>, scalar_prefetch = 0 : i64, scratch_operands = 0 : i64, tpu.core_type = #tpu.core_type<tc>, window_params = [{transform_indices = @transform_0, window_bounds = array<i64: 1, 18, 18, 32>}, {pipeline_mode = #tpu.pipeline_mode<synchronous>, transform_indices = @transform_1, window_bounds = array<i64: 9, 32, 16>}, {pipeline_mode = #tpu.pipeline_mode<synchronous>, transform_indices = @transform_2, window_bounds = array<i64: 1, 16>}, {pipeline_mode = #tpu.pipeline_mode<synchronous>, transform_indices = @transform_3, window_bounds = array<i64: 16, 32>}, {pipeline_mode = #tpu.pipeline_mode<synchronous>, transform_indices = @transform_4, window_bounds = array<i64: 1, 32>}, {pipeline_mode = #tpu.pipeline_mode<synchronous>, transform_indices = @transform_5, window_bounds = array<i64: 32, 32>}, {pipeline_mode = #tpu.pipeline_mode<synchronous>, transform_indices = @transform_6, window_bounds = array<i64: 1, 32>}, {transform_indices = @transform_7, window_bounds = array<i64: 1, 256, 32>}]} {
    %c0 = arith.constant 0 : index
    %c0_0 = arith.constant 0 : index
    %c0_1 = arith.constant 0 : index
    %c0_2 = arith.constant 0 : index
    %0 = vector.load %arg1[%c0, %c0_0, %c0_1, %c0_2] : memref<1x18x18x32xf32, #tpu.memory_space<vmem>>, vector<1x18x18x32xf32>
    %1 = vector.shape_cast %0 : vector<1x18x18x32xf32> to vector<18x18x32xf32>
    %2 = vector.extract_strided_slice %1 {offsets = [1, 1, 0], sizes = [16, 16, 32], strides = [1, 1, 1]} : vector<18x18x32xf32> to vector<16x16x32xf32>
    %3 = vector.shape_cast %2 : vector<16x16x32xf32> to vector<256x32xf32>
    %cst = arith.constant 5.000000e-01 : f32
    %4 = vector.broadcast %cst : f32 to vector<18x18x32xf32>
    %5 = arith.mulf %4, %1 : vector<18x18x32xf32>
    %cst_3 = arith.constant 4.471500e-02 : f32
    %6 = vector.broadcast %cst_3 : f32 to vector<18x18x32xf32>
    %7 = arith.mulf %6, %1 : vector<18x18x32xf32>
    %8 = arith.mulf %7, %1 : vector<18x18x32xf32>
    %9 = arith.mulf %8, %1 : vector<18x18x32xf32>
    %10 = arith.addf %1, %9 : vector<18x18x32xf32>
    %cst_4 = arith.constant 0.797884583 : f32
    %11 = vector.broadcast %cst_4 : f32 to vector<18x18x32xf32>
    %12 = arith.mulf %11, %10 : vector<18x18x32xf32>
    %13 = math.tanh %12 : vector<18x18x32xf32>
    %cst_5 = arith.constant 1.000000e+00 : f32
    %14 = vector.broadcast %cst_5 : f32 to vector<18x18x32xf32>
    %15 = arith.addf %14, %13 : vector<18x18x32xf32>
    %16 = arith.mulf %5, %15 : vector<18x18x32xf32>
    %cst_6 = arith.constant 0.000000e+00 : f32
    %17 = vector.broadcast %cst_6 : f32 to vector<256x16xf32>
    %c0_7 = arith.constant 0 : index
    %c0_8 = arith.constant 0 : index
    %18 = vector.load %arg3[%c0_7, %c0_8] : memref<1x16xf32, #tpu.memory_space<vmem>>, vector<1x16xf32>
    %19 = vector.broadcast %18 : vector<1x16xf32> to vector<256x16xf32>
    %20 = arith.addf %17, %19 : vector<256x16xf32>
    %21 = vector.extract_strided_slice %16 {offsets = [0, 0, 0], sizes = [16, 16, 32], strides = [1, 1, 1]} : vector<18x18x32xf32> to vector<16x16x32xf32>
    %22 = vector.shape_cast %21 : vector<16x16x32xf32> to vector<256x32xf32>
    %c0_9 = arith.constant 0 : index
    %c0_10 = arith.constant 0 : index
    %c0_11 = arith.constant 0 : index
    %23 = vector.load %arg2[%c0_9, %c0_10, %c0_11] : memref<9x32x16xf32, #tpu.memory_space<vmem>>, vector<1x32x16xf32>
    %24 = vector.shape_cast %23 : vector<1x32x16xf32> to vector<32x16xf32>
    %cst_12 = arith.constant dense<0.000000e+00> : vector<256x16xf32>
    %25 = tpu.matmul %22, %24, %cst_12 {dimension_numbers = #tpu.dot_dimension_numbers<[1], [0], [0], [1], [0, 0, 1, 1], [], []>} : vector<256x32xf32>, vector<32x16xf32>, vector<256x16xf32> -> vector<256x16xf32>
    %26 = arith.addf %20, %25 : vector<256x16xf32>
    %27 = vector.extract_strided_slice %16 {offsets = [0, 1, 0], sizes = [16, 16, 32], strides = [1, 1, 1]} : vector<18x18x32xf32> to vector<16x16x32xf32>
    %28 = vector.shape_cast %27 : vector<16x16x32xf32> to vector<256x32xf32>
    %c1 = arith.constant 1 : index
    %c0_13 = arith.constant 0 : index
    %c0_14 = arith.constant 0 : index
    %29 = vector.load %arg2[%c1, %c0_13, %c0_14] : memref<9x32x16xf32, #tpu.memory_space<vmem>>, vector<1x32x16xf32>
    %30 = vector.shape_cast %29 : vector<1x32x16xf32> to vector<32x16xf32>
    %cst_15 = arith.constant dense<0.000000e+00> : vector<256x16xf32>
    %31 = tpu.matmul %28, %30, %cst_15 {dimension_numbers = #tpu.dot_dimension_numbers<[1], [0], [0], [1], [0, 0, 1, 1], [], []>} : vector<256x32xf32>, vector<32x16xf32>, vector<256x16xf32> -> vector<256x16xf32>
    %32 = arith.addf %26, %31 : vector<256x16xf32>
    %33 = vector.extract_strided_slice %16 {offsets = [0, 2, 0], sizes = [16, 16, 32], strides = [1, 1, 1]} : vector<18x18x32xf32> to vector<16x16x32xf32>
    %34 = vector.shape_cast %33 : vector<16x16x32xf32> to vector<256x32xf32>
    %c2 = arith.constant 2 : index
    %c0_16 = arith.constant 0 : index
    %c0_17 = arith.constant 0 : index
    %35 = vector.load %arg2[%c2, %c0_16, %c0_17] : memref<9x32x16xf32, #tpu.memory_space<vmem>>, vector<1x32x16xf32>
    %36 = vector.shape_cast %35 : vector<1x32x16xf32> to vector<32x16xf32>
    %cst_18 = arith.constant dense<0.000000e+00> : vector<256x16xf32>
    %37 = tpu.matmul %34, %36, %cst_18 {dimension_numbers = #tpu.dot_dimension_numbers<[1], [0], [0], [1], [0, 0, 1, 1], [], []>} : vector<256x32xf32>, vector<32x16xf32>, vector<256x16xf32> -> vector<256x16xf32>
    %38 = arith.addf %32, %37 : vector<256x16xf32>
    %39 = vector.extract_strided_slice %16 {offsets = [1, 0, 0], sizes = [16, 16, 32], strides = [1, 1, 1]} : vector<18x18x32xf32> to vector<16x16x32xf32>
    %40 = vector.shape_cast %39 : vector<16x16x32xf32> to vector<256x32xf32>
    %c3 = arith.constant 3 : index
    %c0_19 = arith.constant 0 : index
    %c0_20 = arith.constant 0 : index
    %41 = vector.load %arg2[%c3, %c0_19, %c0_20] : memref<9x32x16xf32, #tpu.memory_space<vmem>>, vector<1x32x16xf32>
    %42 = vector.shape_cast %41 : vector<1x32x16xf32> to vector<32x16xf32>
    %cst_21 = arith.constant dense<0.000000e+00> : vector<256x16xf32>
    %43 = tpu.matmul %40, %42, %cst_21 {dimension_numbers = #tpu.dot_dimension_numbers<[1], [0], [0], [1], [0, 0, 1, 1], [], []>} : vector<256x32xf32>, vector<32x16xf32>, vector<256x16xf32> -> vector<256x16xf32>
    %44 = arith.addf %38, %43 : vector<256x16xf32>
    %45 = vector.extract_strided_slice %16 {offsets = [1, 1, 0], sizes = [16, 16, 32], strides = [1, 1, 1]} : vector<18x18x32xf32> to vector<16x16x32xf32>
    %46 = vector.shape_cast %45 : vector<16x16x32xf32> to vector<256x32xf32>
    %c4 = arith.constant 4 : index
    %c0_22 = arith.constant 0 : index
    %c0_23 = arith.constant 0 : index
    %47 = vector.load %arg2[%c4, %c0_22, %c0_23] : memref<9x32x16xf32, #tpu.memory_space<vmem>>, vector<1x32x16xf32>
    %48 = vector.shape_cast %47 : vector<1x32x16xf32> to vector<32x16xf32>
    %cst_24 = arith.constant dense<0.000000e+00> : vector<256x16xf32>
    %49 = tpu.matmul %46, %48, %cst_24 {dimension_numbers = #tpu.dot_dimension_numbers<[1], [0], [0], [1], [0, 0, 1, 1], [], []>} : vector<256x32xf32>, vector<32x16xf32>, vector<256x16xf32> -> vector<256x16xf32>
    %50 = arith.addf %44, %49 : vector<256x16xf32>
    %51 = vector.extract_strided_slice %16 {offsets = [1, 2, 0], sizes = [16, 16, 32], strides = [1, 1, 1]} : vector<18x18x32xf32> to vector<16x16x32xf32>
    %52 = vector.shape_cast %51 : vector<16x16x32xf32> to vector<256x32xf32>
    %c5 = arith.constant 5 : index
    %c0_25 = arith.constant 0 : index
    %c0_26 = arith.constant 0 : index
    %53 = vector.load %arg2[%c5, %c0_25, %c0_26] : memref<9x32x16xf32, #tpu.memory_space<vmem>>, vector<1x32x16xf32>
    %54 = vector.shape_cast %53 : vector<1x32x16xf32> to vector<32x16xf32>
    %cst_27 = arith.constant dense<0.000000e+00> : vector<256x16xf32>
    %55 = tpu.matmul %52, %54, %cst_27 {dimension_numbers = #tpu.dot_dimension_numbers<[1], [0], [0], [1], [0, 0, 1, 1], [], []>} : vector<256x32xf32>, vector<32x16xf32>, vector<256x16xf32> -> vector<256x16xf32>
    %56 = arith.addf %50, %55 : vector<256x16xf32>
    %57 = vector.extract_strided_slice %16 {offsets = [2, 0, 0], sizes = [16, 16, 32], strides = [1, 1, 1]} : vector<18x18x32xf32> to vector<16x16x32xf32>
    %58 = vector.shape_cast %57 : vector<16x16x32xf32> to vector<256x32xf32>
    %c6 = arith.constant 6 : index
    %c0_28 = arith.constant 0 : index
    %c0_29 = arith.constant 0 : index
    %59 = vector.load %arg2[%c6, %c0_28, %c0_29] : memref<9x32x16xf32, #tpu.memory_space<vmem>>, vector<1x32x16xf32>
    %60 = vector.shape_cast %59 : vector<1x32x16xf32> to vector<32x16xf32>
    %cst_30 = arith.constant dense<0.000000e+00> : vector<256x16xf32>
    %61 = tpu.matmul %58, %60, %cst_30 {dimension_numbers = #tpu.dot_dimension_numbers<[1], [0], [0], [1], [0, 0, 1, 1], [], []>} : vector<256x32xf32>, vector<32x16xf32>, vector<256x16xf32> -> vector<256x16xf32>
    %62 = arith.addf %56, %61 : vector<256x16xf32>
    %63 = vector.extract_strided_slice %16 {offsets = [2, 1, 0], sizes = [16, 16, 32], strides = [1, 1, 1]} : vector<18x18x32xf32> to vector<16x16x32xf32>
    %64 = vector.shape_cast %63 : vector<16x16x32xf32> to vector<256x32xf32>
    %c7 = arith.constant 7 : index
    %c0_31 = arith.constant 0 : index
    %c0_32 = arith.constant 0 : index
    %65 = vector.load %arg2[%c7, %c0_31, %c0_32] : memref<9x32x16xf32, #tpu.memory_space<vmem>>, vector<1x32x16xf32>
    %66 = vector.shape_cast %65 : vector<1x32x16xf32> to vector<32x16xf32>
    %cst_33 = arith.constant dense<0.000000e+00> : vector<256x16xf32>
    %67 = tpu.matmul %64, %66, %cst_33 {dimension_numbers = #tpu.dot_dimension_numbers<[1], [0], [0], [1], [0, 0, 1, 1], [], []>} : vector<256x32xf32>, vector<32x16xf32>, vector<256x16xf32> -> vector<256x16xf32>
    %68 = arith.addf %62, %67 : vector<256x16xf32>
    %69 = vector.extract_strided_slice %16 {offsets = [2, 2, 0], sizes = [16, 16, 32], strides = [1, 1, 1]} : vector<18x18x32xf32> to vector<16x16x32xf32>
    %70 = vector.shape_cast %69 : vector<16x16x32xf32> to vector<256x32xf32>
    %c8 = arith.constant 8 : index
    %c0_34 = arith.constant 0 : index
    %c0_35 = arith.constant 0 : index
    %71 = vector.load %arg2[%c8, %c0_34, %c0_35] : memref<9x32x16xf32, #tpu.memory_space<vmem>>, vector<1x32x16xf32>
    %72 = vector.shape_cast %71 : vector<1x32x16xf32> to vector<32x16xf32>
    %cst_36 = arith.constant dense<0.000000e+00> : vector<256x16xf32>
    %73 = tpu.matmul %70, %72, %cst_36 {dimension_numbers = #tpu.dot_dimension_numbers<[1], [0], [0], [1], [0, 0, 1, 1], [], []>} : vector<256x32xf32>, vector<32x16xf32>, vector<256x16xf32> -> vector<256x16xf32>
    %74 = arith.addf %68, %73 : vector<256x16xf32>
    %cst_37 = arith.constant 5.000000e-01 : f32
    %75 = vector.broadcast %cst_37 : f32 to vector<256x16xf32>
    %76 = arith.mulf %75, %74 : vector<256x16xf32>
    %cst_38 = arith.constant 4.471500e-02 : f32
    %77 = vector.broadcast %cst_38 : f32 to vector<256x16xf32>
    %78 = arith.mulf %77, %74 : vector<256x16xf32>
    %79 = arith.mulf %78, %74 : vector<256x16xf32>
    %80 = arith.mulf %79, %74 : vector<256x16xf32>
    %81 = arith.addf %74, %80 : vector<256x16xf32>
    %cst_39 = arith.constant 0.797884583 : f32
    %82 = vector.broadcast %cst_39 : f32 to vector<256x16xf32>
    %83 = arith.mulf %82, %81 : vector<256x16xf32>
    %84 = math.tanh %83 : vector<256x16xf32>
    %cst_40 = arith.constant 1.000000e+00 : f32
    %85 = vector.broadcast %cst_40 : f32 to vector<256x16xf32>
    %86 = arith.addf %85, %84 : vector<256x16xf32>
    %87 = arith.mulf %76, %86 : vector<256x16xf32>
    %c0_41 = arith.constant 0 : index
    %c0_42 = arith.constant 0 : index
    %88 = vector.load %arg4[%c0_41, %c0_42] : memref<16x32xf32, #tpu.memory_space<vmem>>, vector<16x32xf32>
    %cst_43 = arith.constant dense<0.000000e+00> : vector<256x32xf32>
    %89 = tpu.matmul %87, %88, %cst_43 {dimension_numbers = #tpu.dot_dimension_numbers<[1], [0], [0], [1], [0, 0, 1, 1], [], []>} : vector<256x16xf32>, vector<16x32xf32>, vector<256x32xf32> -> vector<256x32xf32>
    %c0_44 = arith.constant 0 : index
    %c0_45 = arith.constant 0 : index
    %90 = vector.load %arg5[%c0_44, %c0_45] : memref<1x32xf32, #tpu.memory_space<vmem>>, vector<1x32xf32>
    %91 = vector.broadcast %90 : vector<1x32xf32> to vector<256x32xf32>
    %92 = arith.addf %89, %91 : vector<256x32xf32>
    %c0_46 = arith.constant 0 : index
    %c0_47 = arith.constant 0 : index
    %93 = vector.load %arg6[%c0_46, %c0_47] : memref<32x32xf32, #tpu.memory_space<vmem>>, vector<32x32xf32>
    %cst_48 = arith.constant dense<0.000000e+00> : vector<256x32xf32>
    %94 = tpu.matmul %3, %93, %cst_48 {dimension_numbers = #tpu.dot_dimension_numbers<[1], [0], [0], [1], [0, 0, 1, 1], [], []>} : vector<256x32xf32>, vector<32x32xf32>, vector<256x32xf32> -> vector<256x32xf32>
    %c0_49 = arith.constant 0 : index
    %c0_50 = arith.constant 0 : index
    %95 = vector.load %arg7[%c0_49, %c0_50] : memref<1x32xf32, #tpu.memory_space<vmem>>, vector<1x32xf32>
    %96 = vector.broadcast %95 : vector<1x32xf32> to vector<256x32xf32>
    %97 = arith.addf %94, %96 : vector<256x32xf32>
    %98 = arith.addf %92, %97 : vector<256x32xf32>
    %c0_51 = arith.constant 0 : index
    %c0_52 = arith.constant 0 : index
    %c0_53 = arith.constant 0 : index
    %99 = vector.load %arg8[%c0_51, %c0_52, %c0_53] : memref<1x256x32xf32, #tpu.memory_space<vmem>>, vector<1x256x32xf32>
    %100 = vector.shape_cast %99 : vector<1x256x32xf32> to vector<256x32xf32>
    %101 = vector.shape_cast %98 : vector<256x32xf32> to vector<1x256x32xf32>
    tpu.vector_store %arg8[%c0_51, %c0_52, %c0_53], %101 {strides = array<i32>} : memref<1x256x32xf32, #tpu.memory_space<vmem>>, vector<1x256x32xf32>,
    return
  }
  func.func @transform_0(%arg0: i32) -> (i32, i32, i32, i32) {
    %c0_i32 = arith.constant 0 : i32
    %c0_i32_0 = arith.constant 0 : i32
    %c0_i32_1 = arith.constant 0 : i32
    %c0_i32_2 = arith.constant 0 : i32
    return %arg0, %c0_i32, %c0_i32_0, %c0_i32_1 : i32, i32, i32, i32
  }
  func.func @transform_1(%arg0: i32) -> (i32, i32, i32) {
    %c0_i32 = arith.constant 0 : i32
    %c0_i32_0 = arith.constant 0 : i32
    %c0_i32_1 = arith.constant 0 : i32
    %c0_i32_2 = arith.constant 0 : i32
    return %c0_i32, %c0_i32_0, %c0_i32_1 : i32, i32, i32
  }
  func.func @transform_2(%arg0: i32) -> (i32, i32) {
    %c0_i32 = arith.constant 0 : i32
    %c0_i32_0 = arith.constant 0 : i32
    %c0_i32_1 = arith.constant 0 : i32
    return %c0_i32, %c0_i32_0 : i32, i32
  }
  func.func @transform_3(%arg0: i32) -> (i32, i32) {
    %c0_i32 = arith.constant 0 : i32
    %c0_i32_0 = arith.constant 0 : i32
    %c0_i32_1 = arith.constant 0 : i32
    return %c0_i32, %c0_i32_0 : i32, i32
  }
  func.func @transform_4(%arg0: i32) -> (i32, i32) {
    %c0_i32 = arith.constant 0 : i32
    %c0_i32_0 = arith.constant 0 : i32
    %c0_i32_1 = arith.constant 0 : i32
    return %c0_i32, %c0_i32_0 : i32, i32
  }
  func.func @transform_5(%arg0: i32) -> (i32, i32) {
    %c0_i32 = arith.constant 0 : i32
    %c0_i32_0 = arith.constant 0 : i32
    %c0_i32_1 = arith.constant 0 : i32
    return %c0_i32, %c0_i32_0 : i32, i32
  }
  func.func @transform_6(%arg0: i32) -> (i32, i32) {
    %c0_i32 = arith.constant 0 : i32
    %c0_i32_0 = arith.constant 0 : i32
    %c0_i32_1 = arith.constant 0 : i32
    return %c0_i32, %c0_i32_0 : i32, i32
  }
  func.func @transform_7(%arg0: i32) -> (i32, i32, i32) {
    %c0_i32 = arith.constant 0 : i32
    %c0_i32_0 = arith.constant 0 : i32
    %c0_i32_1 = arith.constant 0 : i32
    return %arg0, %c0_i32, %c0_i32_0 : i32, i32, i32
  }
}

</mosaic_0001>

<bundles_post_ra>
// kernel: hffb_forward.1
= control target key start
LH: loop header
LB: loop body
LE: loop exit
PB: predicated region body
PF: predicated region fallthrough
CT: control target
= control target key end

     0   :  { %12 = vsyncpa [#allocation3], 0  ;;  %s9396_s0 = inlined_call_operand.vmem [shape: f32[2,18,18,32], index: 0, kind: input, shape index: {}]   ;;  %s9397_s1 = inlined_call_operand.vmem [shape: f32[9,32,16], index: 1, kind: input, shape index: {}]   ;;  %s9398_s2 = inlined_call_operand.vmem [shape: f32[1,16], index: 2, kind: input, shape index: {}]   ;;  %s9399_s3 = inlined_call_operand.vmem [shape: f32[16,32], index: 3, kind: input, shape index: {}]   ;;  %s9400_s4 = inlined_call_operand.vmem [shape: f32[1,32], index: 4, kind: input, shape index: {}]   ;;  %s9401_s5 = inlined_call_operand.vmem [shape: f32[32,32], index: 5, kind: input, shape index: {}]   ;;  %s9402_s6 = inlined_call_operand.vmem [shape: f32[1,32], index: 6, kind: input, shape index: {}]   ;;  %s9403_s7 = inlined_call_operand.hbm [shape: f32[2,256,32], index: 7, kind: output, shape index: {}]  }
   0x1   :  { %14 = vsyncpa [#allocation3 + $0x1], 0  ;;  %s7068_s24 = smov 0   ;;  %s7070_s25 = smov 0  }
   0x2   :  { %s7072_s26 = smov 0   ;;  %s7074_s27 = smov 0  }
   0x3 LB: > { %s7089_s28 = sadd.s32 4294967295, %s7023_s27   ;;  %s4822_s29 = sadd.s32 4294967294, %s7023_s27   ;;  %s7023_s27 = sphi %s7074_s27, %s9613_s27   ;;  %s7019_s26 = sphi %s7072_s26, %s9612_s26   ;;  %s7015_s25 = sphi %s7070_s25, %s9611_s25   ;;  %s7011_s24 = sphi %s7068_s24, %s9610_s24  }
   0x4   : > { %s7093_s30 = sadd.s32 1, %s7023_s27   ;;  %s179_s8 = sadd.s32 1, %s7019_s26 }
   0x5   : > { %s176_s9 = ssub.s32 %s7023_s27, %s7093_s30  ;;  %p189_p0 = scmp.ne.s32.totalorder %s7019_s26, %s7015_s25 }
   0x6   : > { %p177_p1 = scmp.eq.s32.totalorder %s176_s9, 0  ;;  %p190_p2 = scmp.eq.s32.totalorder %s7089_s28, 1 }
   0x7   : > { %p195_p3 = scmp.ne.s32.totalorder %s7015_s25, %s7011_s24  ;;  %p196_p4 = scmp.eq.s32.totalorder %s4822_s29, 1 }
   0x8   : > { %s7104_s10 = scalar_select %p177_p1, %s7019_s26, %s179_s8  }
   0x9   : > { %p7106_p5 = por %p190_p2, %p189_p0  ;;  %p7110_p6 = por %p196_p4, %p195_p3 }
   0xa   : > { %p4825_p7 = scmp.ge.s32.totalorder %s7023_s27, 1  ;;  %p240_p8 = scmp.lt.s32.totalorder %s7023_s27, 3 }
   0xc   : > { %p241_p9 = pnand %p4825_p7, %p240_p8 }
   0xe   : > { %244 = sbr.rel (%p241_p9) target bundleno = 988 (0x3dc), region = 48 }
  0x15   : > { %v4933_v0 = vld [vmem:[%s9397_s1 + $0x60] sm:$0xff]  ;;  %v4934_v1 = vld [vmem:[%s9397_s1 + $0x68] sm:$0xff]  ;;  %p272_p10 = scmp.lt.s32.totalorder %s7089_s28, 1  ;;  %v4935_v5 = vld [vmem:[%s9397_s1 + $0x70] sm:$0xff]  ;;  %vm958_vm0 = vcmask 261120   ;;  %vm379_vm1 = vcmask 1046528  }
  0x16   : > { %v954_v2 = vld [vmem:[%s9397_s1] sm:$0xff]  ;;  %v7126_v3 = vpack.c.bf16 %v4934_v1, %v4933_v0  ;;  %v955_v4 = vld [vmem:[%s9397_s1 + $0x8] sm:$0xff]  ;;  %v4936_v6 = vld [vmem:[%s9397_s1 + $0x78] sm:$0xff]  ;;  %vm1734_vm2 = vcmask 1045504   ;;  %vm4060_vm3 = vcmask 130048   ;;  %s269_s29 = sand.u32 1, %s7015_s25  }
  0x17   : > { %v6227_v7 = vpack.c.bf16 %v955_v4, %v954_v2  ;;  %v7137_v8 = vpack.c.bf16 %v4936_v6, %v4935_v5  ;;  %v956_v9 = vld [vmem:[%s9397_s1 + $0x10] sm:$0xff]  ;;  %v957_v10 = vld [vmem:[%s9397_s1 + $0x18] sm:$0xff]  ;;  %s273_s15 = scalar_select %p272_p10, %s7089_s28, 1  ;;  %v4969_v11 = vld [vmem:[%s9397_s1 + $0x80] sm:$0xff] }
  0x18   : > { %6252 = vmatprep.subr.bf16.mxu0 %v7126_v3  ;;  %v6231_v12 = vpack.c.bf16 %v957_v10, %v956_v9  ;;  %v4970_v13 = vld [vmem:[%s9397_s1 + $0x88] sm:$0xff]  ;;  %v4861_v14 = vld [vmem:[%s9397_s1 + $0x20] sm:$0xff]  ;;  %v4971_v31 = vld [vmem:[%s9397_s1 + $0x90] sm:$0xff]  ;;  %s5220_s17 = sshll.u32 %s7089_s28, 12  ;;  %s9355_s28 = scalar_lea.sflag [#allocation3], %s269_s29 }
  0x19   : > { %9481 = vst [vmem:[#allocation5_spill] sm:$0xff] %v7137_v8  ;;  %6228 = vmatprep.subr.bf16.mxu1 %v6227_v7  ;;  %6254 = vmatpush3.bf16.msra.mxu0 %v7126_v3  ;;  %s6699_s20 = smul.u32 432, %s273_s15  ;;  %v7158_v15 = vpack.c.bf16 %v4970_v13, %v4969_v11  ;;  %v4862_v16 = vld [vmem:[%s9397_s1 + $0x28] sm:$0xff]  ;;  %v4972_v32 = vld [vmem:[%s9397_s1 + $0x98] sm:$0xff]  ;;  %v4863_v39 = vld [vmem:[%s9397_s1 + $0x30] sm:$0xff]  ;;  %s9344_s21 = scalar_lea.hbm %s9403_s7, %s5220_s17 }
  0x1a   : > { %6230 = vmatpush3.bf16.msra.mxu1 %v6227_v7  ;;  %6256 = vmatprep.subr.bf16.mxu0 %v7137_v8  ;;  %v7168_v17 = vpack.c.bf16 %v4862_v16, %v4861_v14  ;;  %v4864_v40 = vld [vmem:[%s9397_s1 + $0x38] sm:$0xff]  ;;  %v7211_v44 = vpack.c.bf16 %v4972_v32, %v4971_v31  ;;  %s7025_s23 = smov [#allocation2]  }
  0x1b   : > { %6232 = vmatprep.subr.bf16.mxu1 %v6231_v12  ;;  %s7166_s13 = scalar_lea.vmem %s9396_s0, %s6699_s20  ;;  %v7221_v53 = vpack.c.bf16 %v4864_v40, %v4863_v39  ;;  %s6965_s8 = sshll.u32 %s7025_s23, 4  ;;  %s6966_s8 = int_to_ptr.vmem [resolvable:$false] %s6965_s8 }
  0x1c   : > { %v277_v18 = vld [vmem:[%s7166_s13] sm:$0xff]  ;;  %v280_v19 = vld [vmem:[%s7166_s13 + $0x18] sm:$0xff]  ;;  %v7173_v20 = vld [vmem:[%s7166_s13 + $0x8] sm:$0xff]  ;;  %s6967_s9 = scalar_lea.vmem %s6966_s8, 8192 }
  0x1d   : > { %6258 = vmatpush3.bf16.msra.mxu0 %v7137_v8  ;;  %v514_v21 = vmul.f32 0.044715, %v277_v18  ;;  %v517_v22 = vmul.f32 0.044715, %v280_v19  ;;  %v515_v23 = vmul.f32 0.044715, %v7173_v20 }
  0x1e   : > { %6234 = vmatpush3.bf16.msra.mxu1 %v6231_v12  ;;  %6260 = vmatprep.subr.bf16.mxu0 %v7158_v15  ;;  %v7179_v24 = vld [vmem:[%s7166_s13 + $0x20] sm:$0xff]  ;;  %v7182_v25 = vld [vmem:[%s7166_s13 + $0x30] sm:$0xff]  ;;  %v7185_v26 = vld [vmem:[%s7166_s13 + $0x38] sm:$0xff]  ;;  %v460_v63 = vmul.f32 0.5, %v277_v18  ;;  %v463_v9 = vmul.f32 0.5, %v280_v19 }
  0x1f   : > { %v568_v27 = vmul.f32 %v514_v21, %v277_v18  ;;  %v571_v28 = vmul.f32 %v517_v22, %v280_v19  ;;  %v518_v29 = vmul.f32 0.044715, %v7179_v24  ;;  %v7189_v30 = vld [vmem:[%s7166_s13 + $0x48] sm:$0xff]  ;;  %6236 = vmatprep.subr.bf16.mxu1 %v7168_v17  ;;  %v569_v33 = vmul.f32 %v515_v23, %v7173_v20  ;;  %v7216_v49 = vld [vmem:[%s7166_s13 + $0x50] sm:$0xff]  ;;  %v7229_v62 = vld [vmem:[%s7166_s13 + $0x60] sm:$0xff] }
  0x20   : > { %v520_v34 = vmul.f32 0.044715, %v7182_v25  ;;  %v521_v38 = vmul.f32 0.044715, %v7185_v26  ;;  %v523_v43 = vmul.f32 0.044715, %v7189_v30 }
  0x21   : > { %v622_v35 = vmul.f32 %v568_v27, %v277_v18  ;;  %v625_v36 = vmul.f32 %v571_v28, %v280_v19  ;;  %v572_v37 = vmul.f32 %v518_v29, %v7179_v24  ;;  %v623_v41 = vmul.f32 %v569_v33, %v7173_v20  ;;  %v7233_v2 = vld [vmem:[%s7166_s13 + $0x68] sm:$0xff]  ;;  %v7238_v7 = vld [vmem:[%s7166_s13 + $0x78] sm:$0xff]  ;;  %v7244_v16 = vld [vmem:[%s7166_s13 + $0x80] sm:$0xff] }
  0x22   : > { %v574_v42 = vmul.f32 %v520_v34, %v7182_v25  ;;  %v575_v48 = vmul.f32 %v521_v38, %v7185_v26  ;;  %v577_v52 = vmul.f32 %v523_v43, %v7189_v30  ;;  %v524_v61 = vmul.f32 0.044715, %v7216_v49  ;;  %v7250_v22 = vld [vmem:[%s7166_s13 + $0x90] sm:$0xff]  ;;  %v7259_v32 = vld [vmem:[%s7166_s13 + $0x98] sm:$0xff] }
  0x23   : > { %v676_v45 = vadd.f32 %v622_v35, %v277_v18  ;;  %v679_v46 = vadd.f32 %v625_v36, %v280_v19  ;;  %v626_v47 = vmul.f32 %v572_v37, %v7179_v24  ;;  %v677_v50 = vadd.f32 %v623_v41, %v7173_v20 }
  0x24   : > { %v628_v51 = vmul.f32 %v574_v42, %v7182_v25  ;;  %v629_v57 = vmul.f32 %v575_v48, %v7185_v26  ;;  %v631_v60 = vmul.f32 %v577_v52, %v7189_v30  ;;  %v578_v6 = vmul.f32 %v524_v61, %v7216_v49  ;;  %v7281_v61 = vld [vmem:[%s7166_s13 + $0xa8] sm:$0xff] }
  0x25   : > { %v730_v54 = vmul.f32 0.7978846, %v676_v45  ;;  %v733_v55 = vmul.f32 0.7978846, %v679_v46  ;;  %v680_v56 = vadd.f32 %v626_v47, %v7179_v24  ;;  %v731_v58 = vmul.f32 0.7978846, %v677_v50 }
  0x26   : > { %v682_v59 = vadd.f32 %v628_v51, %v7182_v25  ;;  %v683_v1 = vadd.f32 %v629_v57, %v7185_v26  ;;  %v685_v5 = vadd.f32 %v631_v60, %v7189_v30  ;;  %v526_v11 = vmul.f32 0.044715, %v7229_v62 }
  0x27   : > { %6741 = vtanh.f32 %v730_v54  ;;  %v734_v0 = vmul.f32 0.7978846, %v680_v56  ;;  %v632_v13 = vmul.f32 %v578_v6, %v7216_v49  ;;  %v527_v14 = vmul.f32 0.044715, %v7233_v2 }
  0x28   : > { %6743 = vtanh.f32 %v733_v55  ;;  %v736_v4 = vmul.f32 0.7978846, %v682_v59  ;;  %v737_v10 = vmul.f32 0.7978846, %v683_v1  ;;  %v739_v12 = vmul.f32 0.7978846, %v685_v5 }
  0x29   : > { %6745 = vtanh.f32 %v731_v58  ;;  %v461_v18 = vmul.f32 0.5, %v7173_v20  ;;  %v580_v21 = vmul.f32 %v526_v11, %v7229_v62  ;;  %v529_v19 = vmul.f32 0.044715, %v7238_v7 }
  0x2a   : > { %6747 = vtanh.f32 %v734_v0  ;;  %v464_v23 = vmul.f32 0.5, %v7179_v24  ;;  %v686_v27 = vadd.f32 %v632_v13, %v7216_v49  ;;  %v581_v28 = vmul.f32 %v527_v14, %v7233_v2  ;;  %v7291_v13 = vld [vmem:[%s7166_s13 + $0xb0] sm:$0xff] }
  0x2b   : > { %6749 = vtanh.f32 %v736_v4  ;;  %v634_v29 = vmul.f32 %v580_v21, %v7229_v62  ;;  %v583_v31 = vmul.f32 %v529_v19, %v7238_v7  ;;  %v530_v20 = vmul.f32 0.044715, %v7244_v16 }
  0x2c   : > { %6751 = vtanh.f32 %v737_v10  ;;  %v466_v33 = vmul.f32 0.5, %v7182_v25  ;;  %v740_v34 = vmul.f32 0.7978846, %v686_v27  ;;  %v635_v35 = vmul.f32 %v581_v28, %v7233_v2  ;;  %v7299_v27 = vld [vmem:[%s7166_s13 + $0xc0] sm:$0xff]  ;;  %v5006_v28 = vld [vmem:[%s9397_s1 + $0xa8] sm:$0xff] }
  0x2d   : > { %6753 = vtanh.f32 %v739_v12  ;;  %v532_v24 = vmul.f32 0.044715, %v7250_v22  ;;  %v467_v36 = vmul.f32 0.5, %v7185_v26  ;;  %v688_v37 = vadd.f32 %v634_v29, %v7229_v62 }
  0x2e   : > { %v637_v38 = vmul.f32 %v583_v31, %v7238_v7  ;;  %v584_v39 = vmul.f32 %v530_v20, %v7244_v16  ;;  %6755 = vtanh.f32 %v740_v34  ;;  %v689_v40 = vadd.f32 %v635_v35, %v7233_v2 }
  0x2f   : > { %v586_v41 = vmul.f32 %v532_v24, %v7250_v22  ;;  %v533_v25 = vmul.f32 0.044715, %v7259_v32  ;;  %v469_v43 = vmul.f32 0.5, %v7189_v30  ;;  %v742_v45 = vmul.f32 0.7978846, %v688_v37 }
  0x30   : > { %v691_v46 = vadd.f32 %v637_v38, %v7238_v7  ;;  %v638_v26 = vmul.f32 %v584_v39, %v7244_v16  ;;  %v743_v50 = vmul.f32 0.7978846, %v689_v40  ;;  %v535_v19 = vmul.f32 0.044715, %v7281_v61 }
  0x31   : > { %v6742_v42 = vpop.eup %6741  ;;  %v640_v51 = vmul.f32 %v586_v41, %v7250_v22  ;;  %v587_v52 = vmul.f32 %v533_v25, %v7259_v32  ;;  %6757 = vtanh.f32 %v742_v45  ;;  %v470_v34 = vmul.f32 0.5, %v7216_v49 }
  0x32   : > { %v6744_v47 = vpop.eup %6743  ;;  %v838_v48 = vadd.f32 1.0, %v6742_v42  ;;  %v745_v56 = vmul.f32 0.7978846, %v691_v46  ;;  %v692_v57 = vadd.f32 %v638_v26, %v7244_v16  ;;  %6759 = vtanh.f32 %v743_v50 }
  0x33   : > { %v6746_v54 = vpop.eup %6745  ;;  %v841_v55 = vadd.f32 1.0, %v6744_v47  ;;  %v694_v60 = vadd.f32 %v640_v51, %v7250_v22  ;;  %v641_v12 = vmul.f32 %v587_v52, %v7259_v32  ;;  %v589_v35 = vmul.f32 %v535_v19, %v7281_v61 }
  0x34   : > { %v6748_v30 = vpop.eup %6747  ;;  %v7277_v58 = vmul.f32 %v838_v48, %v460_v63  ;;  %v839_v59 = vadd.f32 1.0, %v6746_v54  ;;  %6761 = vtanh.f32 %v745_v56  ;;  %v746_v5 = vmul.f32 0.7978846, %v692_v57  ;;  %v7359_v54 = vld [vmem:[%s7166_s13 + $0x28] sm:$0x3] }
  0x35   : > { %v6750_v0 = vpop.eup %6749  ;;  %v7283_v1 = vmul.f32 %v841_v55, %v463_v9  ;;  %v842_v4 = vadd.f32 1.0, %v6748_v30  ;;  %v748_v11 = vmul.f32 0.7978846, %v694_v60  ;;  %v695_v31 = vadd.f32 %v641_v12, %v7259_v32 }
  0x36   : > { %9482 = vst [vmem:[#allocation6_spill] sm:$0xff] %v7277_v58  ;;  %v6752_v6 = vpop.eup %6751  ;;  %5623 = vmatprep.mubr.msk.f32.mxu1 %vm958_vm0, %v7277_v58  ;;  %v7287_v63 = vmul.f32 %v839_v59, %v461_v18  ;;  %v844_v10 = vadd.f32 1.0, %v6750_v0  ;;  %6763 = vtanh.f32 %v746_v5  ;;  %v5005_v18 = vld [vmem:[%s9397_s1 + $0xa0] sm:$0xff]  ;;  %v536_v24 = vmul.f32 0.044715, %v7291_v13 }
  0x37   : > { %v6754_v14 = vpop.eup %6753  ;;  %5791 = vmatprep.mubr.msk.f32.mxu0 %vm958_vm0, %v7283_v1  ;;  %v7295_v9 = vmul.f32 %v842_v4, %v464_v23  ;;  %v845_v21 = vadd.f32 1.0, %v6752_v6  ;;  %6765 = vtanh.f32 %v748_v11  ;;  %v749_v39 = vmul.f32 0.7978846, %v695_v31  ;;  %v7382_v6 = vld [vmem:[%s7166_s13 + $0xd8] sm:$0xff] }
  0x38   : > { %5624 = vmatmul.mubr.msk.f32.vlgmr.msra.gmra.mrb[0].mxu1 %vm958_vm0, %v7287_v63  ;;  %v7309_v23 = vmul.f32 %v844_v10, %v466_v33  ;;  %v847_v29 = vadd.f32 1.0, %v6754_v14  ;;  %v7322_v33 = vld [vmem:[%s7166_s13 + $0xc8] sm:$0xff]  ;;  %v6756_v37 = vpop.eup %6755  ;;  %v7330_v40 = vpack.c.bf16 %v5006_v28, %v5005_v18  ;;  %v472_v41 = vmul.f32 0.5, %v7229_v62  ;;  %v5008_v10 = vld [vmem:[%s9397_s1 + $0xb8] sm:$0xff] }
  0x39   : > { %5792 = vmatmul.mubr.msk.f32.vlgmr.msra.gmra.mrb[0].mxu0 %vm958_vm0, %v7295_v9  ;;  %5626 = vmatprep.mubr.msk.f32.mxu1 %vm958_vm0, %v7283_v1  ;;  %v7316_v20 = vmul.f32 %v845_v21, %v467_v36  ;;  %v538_v36 = vmul.f32 0.044715, %v7299_v27  ;;  %v848_v49 = vadd.f32 1.0, %v6756_v37  ;;  %v643_v25 = vmul.f32 %v589_v35, %v7281_v61 }
  0x3a   : > { %6262 = vmatpush3.bf16.msra.mxu0 %v7158_v15  ;;  %5794 = vmatprep.mubr.msk.f32.mxu0 %vm958_vm0, %v7309_v23  ;;  %v7327_v38 = vmul.f32 %v847_v29, %v469_v43  ;;  %v590_v42 = vmul.f32 %v536_v24, %v7291_v13  ;;  %v473_v15 = vmul.f32 0.5, %v7233_v2  ;;  %6767 = vtanh.f32 %v749_v39  ;;  %v7394_v29 = vld [vmem:[%s7166_s13 + $0xe0] sm:$0xff] }
  0x3b   : > { %6264 = vmatprep.subr.bf16.mxu0 %v7211_v44  ;;  %6238 = vmatpush3.bf16.msra.mxu1 %v7168_v17  ;;  %v592_v43 = vmul.f32 %v538_v36, %v7299_v27  ;;  %v539_v45 = vmul.f32 0.044715, %v7322_v33  ;;  %v6758_v62 = vpop.eup %6757  ;;  %v7347_v17 = vmul.f32 %v848_v49, %v470_v34  ;;  %v475_v46 = vmul.f32 0.5, %v7238_v7  ;;  %v7411_v49 = vld [vmem:[%s7166_s13 + $0x40] sm:$0x3] }
  0x3c   : > { %9483 = vst [vmem:[#allocation7_spill] sm:$0xff] %v7327_v38  ;;  %5627 = vmatmul.mubr.msk.f32.gmra.mrb[2].mxu1 %vm958_vm0, %v7295_v9  ;;  %6240 = vmatprep.subr.bf16.mxu1 %v7221_v53  ;;  %v697_v2 = vadd.f32 %v643_v25, %v7281_v61  ;;  %v644_v26 = vmul.f32 %v590_v42, %v7291_v13  ;;  %v6760_v47 = vpop.eup %6759  ;;  %v850_v48 = vadd.f32 1.0, %v6758_v62  ;;  %v476_v50 = vmul.f32 0.5, %v7244_v16 }
  0x3d   : > { %5795 = vmatmul.mubr.msk.f32.gmra.mrb[2].mxu0 %vm958_vm0, %v7316_v20  ;;  %5629 = vmatprep.mubr.msk.f32.mxu1 %vm958_vm0, %v7309_v23  ;;  %9484 = vst [vmem:[#allocation8_spill] sm:$0xff] %v7347_v17  ;;  %v646_v51 = vmul.f32 %v592_v43, %v7299_v27  ;;  %v593_v52 = vmul.f32 %v539_v45, %v7322_v33  ;;  %v851_v55 = vadd.f32 1.0, %v6760_v47  ;;  %v478_v56 = vmul.f32 0.5, %v7250_v22  ;;  %v5007_v22 = vld [vmem:[%s9397_s1 + $0xb0] sm:$0xff] }
  0x3e   : > { %5797 = vmatprep.mubr.msk.f32.mxu0 %vm958_vm0, %v7327_v38  ;;  %6266 = vmatpush3.bf16.msra.mxu0 %v7211_v44  ;;  %v6762_v7 = vpop.eup %6761  ;;  %v751_v57 = vmul.f32 0.7978846, %v697_v2  ;;  %v698_v30 = vadd.f32 %v644_v26, %v7291_v13  ;;  %v7367_v44 = vmul.f32 %v850_v48, %v472_v41  ;;  %v519_v5 = vmul.f32 0.044715, %v7359_v54  ;;  %v7434_v48 = vld [vmem:[%s7166_s13 + $0xf8] sm:$0xff] }
  0x3f   : > { %6268 = vmatprep.subr.bf16.mxu0 %v7330_v40  ;;  %6242 = vmatpush3.bf16.msra.mxu1 %v7221_v53  ;;  %v853_v16 = vadd.f32 1.0, %v6762_v7  ;;  %v700_v59 = vadd.f32 %v646_v51, %v7299_v27  ;;  %v647_v60 = vmul.f32 %v593_v52, %v7322_v33  ;;  %v7378_v53 = vmul.f32 %v851_v55, %v473_v15 }
  0x40   : > { %5630 = vmatmul.mubr.msk.f32.gmra.mrb[4].mxu1 %vm958_vm0, %v7316_v20  ;;  %9485 = vst [vmem:[#allocation9_spill] sm:$0xff] %v7367_v44  ;;  %v6764_v0 = vpop.eup %6763  ;;  %6769 = vtanh.f32 %v751_v57  ;;  %v752_v4 = vmul.f32 0.7978846, %v698_v30  ;;  %v573_v28 = vmul.f32 %v519_v5, %v7359_v54  ;;  %v541_v34 = vmul.f32 0.044715, %v7382_v6 }
  0x41   : > { %5798 = vmatmul.mubr.msk.f32.gmra.mrb[4].mxu0 %vm958_vm0, %v7347_v17  ;;  %5632 = vmatprep.mubr.msk.f32.mxu1 %vm958_vm0, %v7327_v38  ;;  %9486 = vst [vmem:[#allocation10_spill] sm:$0xff] %v7378_v53  ;;  %v6766_v11 = vpop.eup %6765  ;;  %v7389_v12 = vmul.f32 %v853_v16, %v475_v46  ;;  %v854_v14 = vadd.f32 1.0, %v6764_v0  ;;  %v754_v21 = vmul.f32 0.7978846, %v700_v59  ;;  %v701_v19 = vadd.f32 %v647_v60, %v7322_v33 }
  0x42   : > { %5800 = vmatprep.mubr.msk.f32.mxu0 %vm958_vm0, %v7367_v44  ;;  %v856_v18 = vadd.f32 1.0, %v6766_v11  ;;  %6771 = vtanh.f32 %v752_v4  ;;  %v7399_v35 = vpack.c.bf16 %v5008_v10, %v5007_v22  ;;  %v479_v37 = vmul.f32 0.5, %v7259_v32  ;;  %v7420_v32 = vld [vmem:[%s7166_s13 + $0xf0] sm:$0xff] }
  0x43   : > { %9487 = vst [vmem:[#allocation11_spill] sm:$0xff] %v7389_v12  ;;  %6773 = vtanh.f32 %v754_v21  ;;  %v755_v31 = vmul.f32 0.7978846, %v701_v19  ;;  %v7405_v24 = vmul.f32 %v854_v14, %v476_v50  ;;  %v481_v39 = vmul.f32 0.5, %v7281_v61  ;;  %v7468_v14 = vld [vmem:[%s7166_s13 + $0x58] sm:$0x3] }
  0x44   : > { %5633 = vmatmul.mubr.msk.f32.gmra.mrb[6].mxu1 %vm958_vm0, %v7347_v17  ;;  %v627_v36 = vmul.f32 %v573_v28, %v7359_v54  ;;  %v6768_v41 = vpop.eup %6767  ;;  %v7415_v25 = vmul.f32 %v856_v18, %v478_v56  ;;  %v595_v42 = vmul.f32 %v541_v34, %v7382_v6  ;;  %v542_v15 = vmul.f32 0.044715, %v7394_v29 }
  0x45   : > { %5801 = vmatmul.mubr.msk.f32.gmra.mrb[6].mxu0 %vm958_vm0, %v7378_v53  ;;  %5635 = vmatprep.mubr.msk.f32.mxu1 %vm958_vm0, %v7367_v44  ;;  %9488 = vst [vmem:[#allocation12_spill] sm:$0xff] %v7405_v24  ;;  %6775 = vtanh.f32 %v755_v31  ;;  %v857_v61 = vadd.f32 1.0, %v6768_v41  ;;  %v482_v43 = vmul.f32 0.5, %v7291_v13  ;;  %v484_v45 = vmul.f32 0.5, %v7299_v27  ;;  %v7476_v41 = vld [vmem:[%s7166_s13 + $0x108] sm:$0xff] }
  0x46   : > { %5803 = vmatprep.mubr.msk.f32.mxu0 %vm958_vm0, %v7389_v12  ;;  %9489 = vst [vmem:[#allocation13_spill] sm:$0xff] %v7415_v25  ;;  %v681_v62 = vadd.f32 %v627_v36, %v7359_v54  ;;  %v7428_v46 = vmul.f32 0.5, %v7322_v33  ;;  %v649_v2 = vmul.f32 %v595_v42, %v7382_v6  ;;  %v596_v26 = vmul.f32 %v542_v15, %v7394_v29 }
  0x47   : > { %v522_v47 = vmul.f32 0.044715, %v7411_v49  ;;  %v7440_v13 = vmul.f32 %v857_v61, %v479_v37  ;;  %v1333_v27 = vrot.slane %v7283_v1, 1  ;;  %v544_v50 = vmul.f32 0.044715, %v7420_v32 }
  0x48   : > { %5636 = vmatmul.mubr.msk.f32.gmra.mrb[8].mxu1 %vm958_vm0, %v7378_v53  ;;  %v735_v33 = vmul.f32 0.7978846, %v681_v62  ;;  %v1334_v51 = vrot.slane %v7295_v9, 1  ;;  %v703_v52 = vadd.f32 %v649_v2, %v7382_v6  ;;  %v650_v7 = vmul.f32 %v596_v26, %v7394_v29 }
  0x49   : > { %5804 = vmatmul.mubr.msk.f32.gmra.mrb[8].mxu0 %vm958_vm0, %v7405_v24  ;;  %5638 = vmatprep.mubr.msk.f32.mxu1 %vm958_vm0, %v7389_v12  ;;  %9490 = vst [vmem:[#allocation14_spill] sm:$0xff] %v7440_v13  ;;  %v576_v55 = vmul.f32 %v522_v47, %v7411_v49  ;;  %v7451_v57 = vmul.f32 0.5, %v7359_v54  ;;  %v598_v30 = vmul.f32 %v544_v50, %v7420_v32  ;;  %v545_v16 = vmul.f32 0.044715, %v7434_v48 }
  0x4a   : > { %5806 = vmatprep.mubr.msk.f32.mxu0 %vm958_vm0, %v7415_v25  ;;  %v6770_v56 = vpop.eup %6769  ;;  %6777 = vtanh.f32 %v735_v33  ;;  %v757_v60 = vmul.f32 0.7978846, %v703_v52  ;;  %v704_v22 = vadd.f32 %v650_v7, %v7394_v29  ;;  %v1338_v54 = vrot.slane %v7309_v23, 1  ;;  %v7501_v52 = vld [vmem:[%s7166_s13 + $0x110] sm:$0xff] }
  0x4b   : > { %v859_v59 = vadd.f32 1.0, %v6770_v56  ;;  %v630_v0 = vmul.f32 %v576_v55, %v7411_v49  ;;  %v1339_v5 = vrot.slane %v7316_v20, 1  ;;  %v652_v10 = vmul.f32 %v598_v30, %v7420_v32  ;;  %v7504_v7 = vld [vmem:[%s7166_s13 + $0x70] sm:$0x3] }
  0x4c   : > { %5639 = vmatmul.mubr.msk.f32.gmra.mrb[10].mxu1 %vm958_vm0, %v7405_v24  ;;  %v6772_v4 = vpop.eup %6771  ;;  %v599_v11 = vmul.f32 %v545_v16, %v7434_v48  ;;  %6779 = vtanh.f32 %v757_v60  ;;  %v758_v28 = vmul.f32 0.7978846, %v704_v22  ;;  %v7487_v15 = vsel %vm379_vm1, %v1333_v27, %v1334_v51 }
  0x4d   : > { %5807 = vmatmul.mubr.msk.f32.gmra.mrb[10].mxu0 %vm958_vm0, %v7440_v13  ;;  %5641 = vmatprep.mubr.msk.f32.mxu1 %vm958_vm0, %v7415_v25  ;;  %v6774_v21 = vpop.eup %6773  ;;  %v7470_v19 = vmul.f32 %v859_v59, %v481_v39  ;;  %v860_v18 = vadd.f32 1.0, %v6772_v4  ;;  %v684_v34 = vadd.f32 %v630_v0, %v7411_v49  ;;  %v706_v37 = vadd.f32 %v652_v10, %v7420_v32  ;;  %v7522_v59 = vld [vmem:[%s7166_s13 + $0x120] sm:$0xff] }
  0x4e   : > { %v862_v31 = vadd.f32 1.0, %v6774_v21  ;;  %v653_v36 = vmul.f32 %v599_v11, %v7434_v48  ;;  %6781 = vtanh.f32 %v758_v28  ;;  %v525_v61 = vmul.f32 0.044715, %v7468_v14 }
  0x4f   : > { %9491 = vst [vmem:[#allocation15_spill] sm:$0xff] %v7470_v19  ;;  %v6776_v42 = vpop.eup %6775  ;;  %5809 = vmatprep.mubr.msk.f32.mxu0 %vm958_vm0, %v7470_v19  ;;  %v7482_v39 = vmul.f32 %v860_v18, %v482_v43  ;;  %v738_v26 = vmul.f32 0.7978846, %v684_v34  ;;  %v760_v47 = vmul.f32 0.7978846, %v706_v37  ;;  %v487_v43 = vmul.f32 0.5, %v7382_v6 }
  0x50   : > { %5642 = vmatmul.mubr.msk.f32.gmra.mrb[12].mxu1 %vm958_vm0, %v7440_v13  ;;  %v7492_v62 = vmul.f32 %v862_v31, %v484_v45  ;;  %v863_v2 = vadd.f32 1.0, %v6776_v42  ;;  %v707_v27 = vadd.f32 %v653_v36, %v7434_v48  ;;  %v579_v33 = vmul.f32 %v525_v61, %v7468_v14 }
  0x51   : > { %9492 = vst [vmem:[#allocation16_spill] sm:$0xff] %v7482_v39  ;;  %5644 = vmatprep.mubr.msk.f32.mxu1 %vm958_vm0, %v7470_v19  ;;  %5810 = vmatmul.mubr.msk.f32.gmra.mrb[12].mxu0 %vm958_vm0, %v7482_v39  ;;  %v547_v50 = vmul.f32 0.044715, %v7476_v41  ;;  %v7514_v6 = vsel %vm379_vm1, %v1338_v54, %v1339_v5  ;;  %v488_v55 = vmul.f32 0.5, %v7394_v29  ;;  %6783 = vtanh.f32 %v738_v26 }
  0x52   : > { %9493 = vst [vmem:[#allocation17_spill] sm:$0xff] %v7492_v62  ;;  %5812 = vmatprep.mubr.msk.f32.mxu0 %vm958_vm0, %v7492_v62  ;;  %v7509_v45 = vmul.f32 %v863_v2, %v7428_v46  ;;  %9495 = vst [vmem:[#allocation19_spill] sm:$0xff] %v7514_v6  ;;  %6785 = vtanh.f32 %v760_v47  ;;  %v761_v56 = vmul.f32 0.7978846, %v707_v27  ;;  %v633_v30 = vmul.f32 %v579_v33, %v7468_v14 }
  0x53   : > { %v601_v16 = vmul.f32 %v547_v50, %v7476_v41  ;;  %v468_v60 = vmul.f32 0.5, %v7411_v49  ;;  %v7528_v29 = vmul.f32 0.5, %v7420_v32  ;;  %v548_v22 = vmul.f32 0.044715, %v7501_v52 }
  0x54   : > { %9494 = vst [vmem:[#allocation18_spill] sm:$0xff] %v7509_v45  ;;  %5645 = vmatmul.mubr.msk.f32.gmra.mrb[14].mxu1 %vm958_vm0, %v7482_v39  ;;  %v6778_v46 = vpop.eup %6777  ;;  %v528_v0 = vmul.f32 0.044715, %v7504_v7  ;;  %6787 = vtanh.f32 %v761_v56  ;;  %v687_v54 = vadd.f32 %v633_v30, %v7468_v14  ;;  %v1343_v49 = vrot.slane %v7327_v38, 1 }
  0x55   : > { %5647 = vmatprep.mubr.msk.f32.mxu1 %vm958_vm0, %v7492_v62  ;;  %5813 = vmatmul.mubr.msk.f32.gmra.mrb[14].mxu0 %vm958_vm0, %v7509_v45  ;;  %v843_v4 = vadd.f32 1.0, %v6778_v46  ;;  %v655_v10 = vmul.f32 %v601_v16, %v7476_v41  ;;  %v602_v32 = vmul.f32 %v548_v22, %v7501_v52  ;;  %v550_v21 = vmul.f32 0.044715, %v7522_v59  ;;  %v7559_v16 = vld [vmem:[%s7166_s13 + $0x128] sm:$0xff] }
  0x56   : > { %5847 = vmatprep.mubr.msk.f32.mxu0 %vm958_vm0, %v7487_v15  ;;  %v582_v11 = vmul.f32 %v528_v0, %v7504_v7  ;;  %v6780_v18 = vpop.eup %6779  ;;  %v1344_v31 = vrot.slane %v7347_v17, 1  ;;  %v741_v34 = vmul.f32 0.7978846, %v687_v54  ;;  %v7573_v22 = vld [vmem:[%s7166_s13 + $0x88] sm:$0x3] }
  0x57   : > { %v7545_v28 = vmul.f32 %v843_v4, %v7451_v57  ;;  %v709_v37 = vadd.f32 %v655_v10, %v7476_v41  ;;  %v865_v36 = vadd.f32 1.0, %v6780_v18  ;;  %v656_v42 = vmul.f32 %v602_v32, %v7501_v52 }
  0x58   : > { %5648 = vmatmul.mubr.msk.f32.gmra.mrb[16].mxu1 %vm958_vm0, %v7509_v45  ;;  %v636_v61 = vmul.f32 %v582_v11, %v7504_v7  ;;  %v604_v2 = vmul.f32 %v550_v21, %v7522_v59  ;;  %v6782_v26 = vpop.eup %6781  ;;  %v491_v57 = vmul.f32 0.5, %v7434_v48  ;;  %6789 = vtanh.f32 %v741_v34  ;;  %v7589_v34 = vld [vmem:[%s7166_s13 + $0x138] sm:$0xff] }
  0x59   : > { %v1336_v47 = vrot.slane %v7545_v28, 1  ;;  %v763_v27 = vmul.f32 0.7978846, %v709_v37  ;;  %v7554_v33 = vmul.f32 %v865_v36, %v487_v43  ;;  %v866_v50 = vadd.f32 1.0, %v6782_v26 }
  0x5a   : > { %v710_v56 = vadd.f32 %v656_v42, %v7501_v52  ;;  %v690_v30 = vadd.f32 %v636_v61, %v7504_v7  ;;  %v7569_v48 = vsel %vm379_vm1, %v1343_v49, %v1344_v31  ;;  %v658_v43 = vmul.f32 %v604_v2, %v7522_v59 }
  0x5b   : > { %9496 = vst [vmem:[#allocation20_spill] sm:$0xff] %v7554_v33  ;;  %v7564_v46 = vsel %vm379_vm1, %v1334_v51, %v1336_v47  ;;  %9497 = vst [vmem:[#allocation21_spill] sm:$0xff] %v7569_v48  ;;  %6791 = vtanh.f32 %v763_v27  ;;  %v6784_v0 = vpop.eup %6783  ;;  %5650 = vmatprep.mubr.msk.f32.mxu1 %vm958_vm0, %v7554_v33  ;;  %v7579_v51 = vmul.f32 %v866_v50, %v488_v55  ;;  %v471_v4 = vmul.f32 0.5, %v7468_v14  ;;  %v7605_v50 = vld [vmem:[%s7166_s13 + $0x140] sm:$0xff] }
  0x5c   : > { %5848 = vmatmul.mubr.msk.f32.vlgmr.msra.gmra.mrb[0].mxu0 %vm958_vm0, %v7564_v46  ;;  %v764_v54 = vmul.f32 0.7978846, %v710_v56  ;;  %v744_v10 = vmul.f32 0.7978846, %v690_v30  ;;  %v6786_v49 = vpop.eup %6785  ;;  %v846_v32 = vadd.f32 1.0, %v6784_v0  ;;  %v1348_v11 = vrot.slane %v7367_v44, 1 }
  0x5d   : > { %6270 = vmatpush3.bf16.msra.mxu0 %v7330_v40  ;;  %5850 = vmatprep.mubr.msk.f32.mxu0 %vm958_vm0, %v7514_v6  ;;  %v712_v21 = vadd.f32 %v658_v43, %v7522_v59  ;;  %v551_v18 = vmul.f32 0.044715, %v7559_v16  ;;  %v868_v14 = vadd.f32 1.0, %v6786_v49  ;;  %v1349_v55 = vrot.slane %v7378_v53, 1 }
  0x5e   : > { %5651 = vmatmul.mubr.msk.f32.gmra.mrb[18].mxu1 %vm958_vm0, %v7579_v51  ;;  %6793 = vtanh.f32 %v764_v54  ;;  %v531_v40 = vmul.f32 0.044715, %v7573_v22  ;;  %6272 = vmatprep.subr.bf16.mxu0 %v7399_v35  ;;  %v6788_v37 = vpop.eup %6787  ;;  %v7596_v36 = vmul.f32 %v846_v32, %v468_v60  ;;  %v553_v27 = vmul.f32 0.044715, %v7589_v34 }
  0x5f   : > { %6795 = vtanh.f32 %v744_v10  ;;  %v766_v42 = vmul.f32 0.7978846, %v712_v21  ;;  %v605_v61 = vmul.f32 %v551_v18, %v7559_v16  ;;  %v7600_v2 = vmul.f32 %v868_v14, %v7528_v29  ;;  %v7619_v10 = vld [vmem:[%s7166_s13 + $0xa0] sm:$0x3] }
  0x60   : > { %v869_v26 = vadd.f32 1.0, %v6788_v37  ;;  %v585_v47 = vmul.f32 %v531_v40, %v7573_v22  ;;  %v1341_v56 = vrot.slane %v7596_v36, 1  ;;  %v493_v60 = vmul.f32 0.5, %v7476_v41 }
  0x61   : > { %9498 = vst [vmem:[#allocation22_spill] sm:$0xff] %v7600_v2  ;;  %6797 = vtanh.f32 %v766_v42  ;;  %v659_v30 = vmul.f32 %v605_v61, %v7559_v16  ;;  %6274 = vmatpush3.bf16.msra.mxu0 %v7399_v35  ;;  %5653 = vmatprep.mubr.msk.f32.mxu1 %vm958_vm0, %v7600_v2  ;;  %v494_v43 = vmul.f32 0.5, %v7501_v52  ;;  %v607_v54 = vmul.f32 %v553_v27, %v7589_v34  ;;  %v7649_v27 = vld [vmem:[%s7166_s13 + $0x150] sm:$0xff] }
  0x62   : > { %v7613_v29 = vmul.f32 %v869_v26, %v491_v57  ;;  %v639_v0 = vmul.f32 %v585_v47, %v7573_v22  ;;  %v6790_v49 = vpop.eup %6789  ;;  %v7624_v41 = vsel %vm379_vm1, %v1339_v5, %v1341_v56  ;;  %v7629_v35 = vsel %vm379_vm1, %v1348_v11, %v1349_v55 }
  0x63   : > { %9499 = vst [vmem:[#allocation23_spill] sm:$0xff] %v7624_v41  ;;  %9500 = vst [vmem:[#allocation24_spill] sm:$0xff] %v7629_v35  ;;  %v713_v57 = vadd.f32 %v659_v30, %v7559_v16  ;;  %v554_v52 = vmul.f32 0.044715, %v7605_v50  ;;  %5851 = vmatmul.mubr.msk.f32.gmra.mrb[2].mxu0 %vm958_vm0, %v7624_v41  ;;  %v849_v32 = vadd.f32 1.0, %v6790_v49  ;;  %v474_v5 = vmul.f32 0.5, %v7504_v7 }
  0x64   : > { %5654 = vmatmul.mubr.msk.f32.gmra.mrb[20].mxu1 %vm958_vm0, %v7613_v29  ;;  %v693_v21 = vadd.f32 %v639_v0, %v7573_v22  ;;  %v661_v18 = vmul.f32 %v607_v54, %v7589_v34  ;;  %5853 = vmatprep.mubr.msk.f32.mxu0 %vm958_vm0, %v7569_v48  ;;  %v1353_v14 = vrot.slane %v7389_v12, 1  ;;  %v534_v42 = vmul.f32 0.044715, %v7619_v10 }
  0x65   : > { %v6792_v11 = vpop.eup %6791  ;;  %v767_v40 = vmul.f32 0.7978846, %v713_v57  ;;  %v608_v37 = vmul.f32 %v554_v52, %v7605_v50  ;;  %v7645_v61 = vmul.f32 %v849_v32, %v471_v4  ;;  %v9404_v56 = vrot.slane %v7405_v24, 1 }
  0x66   : > { %v871_v26 = vadd.f32 1.0, %v6792_v11  ;;  %v747_v47 = vmul.f32 0.7978846, %v693_v21  ;;  %v715_v7 = vadd.f32 %v661_v18, %v7589_v34  ;;  %v588_v0 = vmul.f32 %v534_v42, %v7619_v10  ;;  %v7669_v42 = vld [vmem:[%s7166_s13 + $0x158] sm:$0xff] }
  0x67   : > { %9501 = vst [vmem:[#allocation25_spill] sm:$0xff] %v7645_v61  ;;  %6799 = vtanh.f32 %v767_v40  ;;  %v662_v30 = vmul.f32 %v608_v37, %v7605_v50  ;;  %v1346_v49 = vrot.slane %v7645_v61, 1  ;;  %v556_v11 = vmul.f32 0.044715, %v7649_v27 }
  0x68   : > { %v6794_v54 = vpop.eup %6793  ;;  %v7655_v57 = vmul.f32 %v871_v26, %v493_v60  ;;  %6801 = vtanh.f32 %v747_v47  ;;  %v769_v4 = vmul.f32 0.7978846, %v715_v7  ;;  %v642_v18 = vmul.f32 %v588_v0, %v7619_v10 }
  0x69   : > { %v6796_v52 = vpop.eup %6795  ;;  %v872_v32 = vadd.f32 1.0, %v6794_v54  ;;  %v716_v21 = vadd.f32 %v662_v30, %v7605_v50  ;;  %v7663_v40 = vsel %vm379_vm1, %v1344_v31, %v1346_v49  ;;  %v496_v37 = vmul.f32 0.5, %v7522_v59  ;;  %v7687_v49 = vld [vmem:[%s7166_s13 + $0xb8] sm:$0x3] }
  0x6a   : > { %9502 = vst [vmem:[#allocation26_spill] sm:$0xff] %v7655_v57  ;;  %9503 = vst [vmem:[#allocation27_spill] sm:$0xff] %v7663_v40  ;;  %5656 = vmatprep.mubr.msk.f32.mxu1 %vm958_vm0, %v7655_v57  ;;  %v852_v60 = vadd.f32 1.0, %v6796_v52  ;;  %6803 = vtanh.f32 %v769_v4  ;;  %5854 = vmatmul.mubr.msk.f32.gmra.mrb[4].mxu0 %vm958_vm0, %v7663_v40  ;;  %v696_v31 = vadd.f32 %v642_v18, %v7619_v10  ;;  %v557_v52 = vmul.f32 0.044715, %v7669_v42 }
  0x6b   : > { %v6798_v26 = vpop.eup %6797  ;;  %v7673_v47 = vmul.f32 %v872_v32, %v494_v43  ;;  %v770_v7 = vmul.f32 0.7978846, %v716_v21  ;;  %v610_v30 = vmul.f32 %v556_v11, %v7649_v27  ;;  %5856 = vmatprep.mubr.msk.f32.mxu0 %vm958_vm0, %v7629_v35  ;;  %v7684_v54 = vsel %vm379_vm1, %v1353_v14, %v9404_v56 }
  0x6c   : > { %v7679_v0 = vmul.f32 %v852_v60, %v474_v5  ;;  %v874_v59 = vadd.f32 1.0, %v6798_v26  ;;  %9505 = vst [vmem:[#allocation29_spill] sm:$0xff] %v7684_v54  ;;  %v750_v43 = vmul.f32 0.7978846, %v696_v31  ;;  %v7694_v5 = vld [vmem:[%s7166_s13 + $0x168] sm:$0xff]  ;;  %v497_v14 = vmul.f32 0.5, %v7559_v16 }
  0x6d   : > { %5657 = vmatmul.mubr.msk.f32.gmra.mrb[22].mxu1 %vm958_vm0, %v7673_v47  ;;  %6805 = vtanh.f32 %v770_v7  ;;  %v664_v4 = vmul.f32 %v610_v30, %v7649_v27  ;;  %v477_v18 = vmul.f32 0.5, %v7573_v22  ;;  %v611_v60 = vmul.f32 %v557_v52, %v7669_v42  ;;  %v7705_v7 = vld [vmem:[%s7166_s13 + $0x170] sm:$0xff] }
  0x6e   : > { %9504 = vst [vmem:[#allocation28_spill] sm:$0xff] %v7679_v0  ;;  %v1351_v32 = vrot.slane %v7679_v0, 1  ;;  %v7697_v21 = vmul.f32 %v874_v59, %v496_v37  ;;  %6807 = vtanh.f32 %v750_v43  ;;  %v537_v26 = vmul.f32 0.044715, %v7687_v49 }
  0x6f   : > { %v718_v11 = vadd.f32 %v664_v4, %v7649_v27  ;;  %v1358_v16 = vrot.slane %v7415_v25, 1  ;;  %v559_v37 = vmul.f32 0.044715, %v7694_v5  ;;  %v499_v59 = vmul.f32 0.5, %v7589_v34 }
  0x70   : > { %v7710_v31 = vsel %vm379_vm1, %v1349_v55, %v1351_v32  ;;  %5659 = vmatprep.mubr.msk.f32.mxu1 %vm958_vm0, %v7697_v21  ;;  %v665_v55 = vmul.f32 %v611_v60, %v7669_v42  ;;  %v591_v4 = vmul.f32 %v537_v26, %v7687_v49  ;;  %v500_v56 = vmul.f32 0.5, %v7605_v50  ;;  %v7730_v60 = vld [vmem:[%s7166_s13 + $0xd0] sm:$0x3] }
  0x71   : > { %9506 = vst [vmem:[#allocation30_spill] sm:$0xff] %v7710_v31  ;;  %v6800_v30 = vpop.eup %6799  ;;  %5857 = vmatmul.mubr.msk.f32.gmra.mrb[6].mxu0 %vm958_vm0, %v7710_v31  ;;  %v772_v43 = vmul.f32 0.7978846, %v718_v11  ;;  %v613_v22 = vmul.f32 %v559_v37, %v7694_v5  ;;  %v560_v8 = vmul.f32 0.044715, %v7705_v7  ;;  %v9508_v0 = vrot.slane %v7440_v13, 1 }
  0x72   : > { %v6802_v52 = vpop.eup %6801  ;;  %5859 = vmatprep.mubr.msk.f32.mxu0 %vm958_vm0, %v7684_v54  ;;  %v875_v32 = vadd.f32 1.0, %v6800_v30  ;;  %v719_v34 = vadd.f32 %v665_v55, %v7669_v42  ;;  %v645_v11 = vmul.f32 %v591_v4, %v7687_v49  ;;  %v9511_v53 = vrot.slane %v7405_v24, 1 }
  0x73   : > { %v855_v25 = vadd.f32 1.0, %v6802_v52  ;;  %6809 = vtanh.f32 %v772_v43  ;;  %v7737_v30 = vsel %vm379_vm1, %v1358_v16, %v9508_v0  ;;  %v667_v50 = vmul.f32 %v613_v22, %v7694_v5 }
  0x74   : > { %v6804_v26 = vpop.eup %6803  ;;  %v7732_v12 = vmul.f32 %v875_v32, %v497_v14  ;;  %9509 = vst [vmem:[#allocation32_spill] sm:$0xff] %v7737_v30  ;;  %v614_v37 = vmul.f32 %v560_v8, %v7705_v7  ;;  %v773_v55 = vmul.f32 0.7978846, %v719_v34  ;;  %v699_v4 = vadd.f32 %v645_v11, %v7687_v49 }
  0x75   : > { %v7741_v52 = vmul.f32 %v855_v25, %v477_v18  ;;  %v877_v43 = vadd.f32 1.0, %v6804_v26  ;;  %v480_v14 = vmul.f32 0.5, %v7619_v10  ;;  %v721_v32 = vadd.f32 %v667_v50, %v7694_v5 }
  0x76   : > { %9507 = vst [vmem:[#allocation31_spill] sm:$0xff] %v7732_v12  ;;  %5660 = vmatmul.mubr.msk.f32.gmra.mrb[24].mxu1 %vm958_vm0, %v7732_v12  ;;  %v668_v0 = vmul.f32 %v614_v37, %v7705_v7  ;;  %v540_v16 = vmul.f32 0.044715, %v7730_v60  ;;  %6811 = vtanh.f32 %v773_v55  ;;  %v753_v18 = vmul.f32 0.7978846, %v699_v4 }
  0x77   : > { %9510 = vst [vmem:[#allocation33_spill] sm:$0xff] %v7741_v52  ;;  %v6806_v22 = vpop.eup %6805  ;;  %v1356_v8 = vrot.slane %v7741_v52, 1  ;;  %v7751_v25 = vmul.f32 %v877_v43, %v499_v59  ;;  %v775_v11 = vmul.f32 0.7978846, %v721_v32  ;;  %v7763_v59 = vld [vmem:[%s7166_s13 + $0x10] sm:$0x3] }
  0x78   : > { %v878_v34 = vadd.f32 1.0, %v6806_v22  ;;  %v722_v26 = vadd.f32 %v668_v0, %v7705_v7  ;;  %v594_v10 = vmul.f32 %v540_v16, %v7730_v60  ;;  %v6808_v50 = vpop.eup %6807  ;;  %6813 = vtanh.f32 %v753_v18  ;;  %v7770_v32 = vld [vmem:[%s7166_s13 + $0xe8] sm:$0x3] }
  0x79   : > { %v7758_v37 = vsel %vm379_vm1, %v9511_v53, %v1356_v8  ;;  %5662 = vmatprep.mubr.msk.f32.mxu1 %vm958_vm0, %v7751_v25  ;;  %v858_v55 = vadd.f32 1.0, %v6808_v50  ;;  %6815 = vtanh.f32 %v775_v11  ;;  %v1363_v53 = vrot.slane %v7470_v19, 1 }
  0x7a   : > { %9512 = vst [vmem:[#allocation34_spill] sm:$0xff] %v7758_v37  ;;  %5860 = vmatmul.mubr.msk.f32.gmra.mrb[8].mxu0 %vm958_vm0, %v7758_v37  ;;  %v7767_v43 = vmul.f32 %v878_v34, %v500_v56  ;;  %v776_v4 = vmul.f32 0.7978846, %v722_v26  ;;  %v648_v16 = vmul.f32 %v594_v10, %v7730_v60  ;;  %v502_v22 = vmul.f32 0.5, %v7649_v27  ;;  %v7786_v26 = vld [vmem:[%s7166_s13 + $0x100] sm:$0x3] }
  0x7b   : > { %5862 = vmatprep.mubr.msk.f32.mxu0 %vm958_vm0, %v7737_v30  ;;  %v7779_v56 = vmul.f32 %v858_v55, %v480_v14  ;;  %v516_v8 = vmul.f32 0.044715, %v7763_v59  ;;  %v543_v11 = vmul.f32 0.044715, %v7770_v32  ;;  %v503_v0 = vmul.f32 0.5, %v7669_v42 }
  0x7c   : > { %5663 = vmatmul.mubr.msk.f32.gmra.mrb[26].mxu1 %vm958_vm0, %v7767_v43  ;;  %6817 = vtanh.f32 %v776_v4  ;;  %v702_v34 = vadd.f32 %v648_v16, %v7730_v60  ;;  %v9514_v27 = vrot.slane %v7482_v39, 1  ;;  %v483_v4 = vmul.f32 0.5, %v7687_v49 }
  0x7d   : > { %9513 = vst [vmem:[#allocation35_spill] sm:$0xff] %v7779_v56  ;;  %v6810_v18 = vpop.eup %6809  ;;  %v1361_v10 = vrot.slane %v7779_v56, 1  ;;  %v570_v14 = vmul.f32 %v516_v8, %v7763_v59  ;;  %v597_v16 = vmul.f32 %v543_v11, %v7770_v32  ;;  %v9516_v52 = vrot.slane %v7440_v13, 1  ;;  %v7808_v56 = vld [vmem:[%s7166_s13 + $0x118] sm:$0x3] }
  0x7e   : > { %v880_v50 = vadd.f32 1.0, %v6810_v18  ;;  %v7794_v55 = vsel %vm379_vm1, %v1363_v53, %v9514_v27  ;;  %v756_v19 = vmul.f32 0.7978846, %v702_v34  ;;  %v546_v8 = vmul.f32 0.044715, %v7786_v26 }
  0x7f   : > { %9515 = vst [vmem:[#allocation36_spill] sm:$0xff] %v7794_v55  ;;  %v7801_v24 = vsel %vm379_vm1, %v9516_v52, %v1361_v10  ;;  %v624_v42 = vmul.f32 %v570_v14, %v7763_v59  ;;  %v505_v49 = vmul.f32 0.5, %v7694_v5  ;;  %v1368_v34 = vrot.slane %v7492_v62, 1 }
  0x80   : > { %9517 = vst [vmem:[#allocation37_spill] sm:$0xff] %v7801_v24  ;;  %v7803_v18 = vmul.f32 %v880_v50, %v502_v22  ;;  %v6812_v53 = vpop.eup %6811  ;;  %5863 = vmatmul.mubr.msk.f32.gmra.mrb[10].mxu0 %vm958_vm0, %v7801_v24  ;;  %6819 = vtanh.f32 %v756_v19  ;;  %v651_v52 = vmul.f32 %v597_v16, %v7770_v32  ;;  %v600_v50 = vmul.f32 %v546_v8, %v7786_v26 }
  0x81   : > { %5865 = vmatprep.mubr.msk.f32.mxu0 %vm958_vm0, %v7794_v55  ;;  %v881_v22 = vadd.f32 1.0, %v6812_v53  ;;  %v678_v10 = vadd.f32 %v624_v42, %v7763_v59  ;;  %v1328_v5 = vrot.slane %v7277_v58, 1  ;;  %v549_v16 = vmul.f32 0.044715, %v7808_v56 }
  0x82   : > { %5665 = vmatprep.mubr.msk.f32.mxu1 %vm958_vm0, %v7803_v18  ;;  %v6814_v14 = vpop.eup %6813  ;;  %v705_v27 = vadd.f32 %v651_v52, %v7770_v32  ;;  %v654_v11 = vmul.f32 %v600_v50, %v7786_v26  ;;  %v506_v8 = vmul.f32 0.5, %v7705_v7 }
  0x83   : > { %v6816_v62 = vpop.eup %6815  ;;  %v7826_v13 = vmul.f32 %v881_v22, %v503_v0  ;;  %v861_v53 = vadd.f32 1.0, %v6814_v14  ;;  %v732_v44 = vmul.f32 0.7978846, %v678_v10  ;;  %v603_v58 = vmul.f32 %v549_v16, %v7808_v56  ;;  %v7842_v10 = vld [vmem:[%s7166_s13 + $0x130] sm:$0x3] }
  0x84   : > { %v883_v42 = vadd.f32 1.0, %v6816_v62  ;;  %v759_v61 = vmul.f32 0.7978846, %v705_v27  ;;  %v9519_v0 = vrot.slane %v7509_v45, 1  ;;  %v708_v62 = vadd.f32 %v654_v11, %v7786_v26 }
  0x85   : > { %5666 = vmatmul.mubr.msk.f32.gmra.mrb[28].mxu1 %vm958_vm0, %v7826_v13  ;;  %v7833_v52 = vmul.f32 %v861_v53, %v483_v4  ;;  %6821 = vtanh.f32 %v732_v44  ;;  %v657_v14 = vmul.f32 %v603_v58, %v7808_v56  ;;  %v486_v27 = vmul.f32 0.5, %v7730_v60  ;;  %v7853_v53 = vld [vmem:[%s7166_s13 + $0x148] sm:$0x3] }
  0x86   : > { %v6818_v19 = vpop.eup %6817  ;;  %v7838_v22 = vsel %vm379_vm1, %v1368_v34, %v9519_v0  ;;  %v7844_v7 = vmul.f32 %v883_v42, %v505_v49  ;;  %6823 = vtanh.f32 %v759_v61  ;;  %v9521_v16 = vrot.slane %v7287_v63, 1  ;;  %v7870_v0 = vld [vmem:[%s7166_s13 + $0x160] sm:$0x3] }
  0x87   : > { %9518 = vst [vmem:[#allocation38_spill] sm:$0xff] %v7833_v52  ;;  %9520 = vst [vmem:[#allocation39_spill] sm:$0xff] %v7838_v22  ;;  %v884_v50 = vadd.f32 1.0, %v6818_v19  ;;  %v1366_v4 = vrot.slane %v7833_v52, 1  ;;  %v762_v44 = vmul.f32 0.7978846, %v708_v62  ;;  %v711_v58 = vadd.f32 %v657_v14, %v7808_v56 }
  0x88   : > { %v1330_v34 = vsel %vm379_vm1, %v1328_v5, %v9521_v16  ;;  %5668 = vmatprep.mubr.msk.f32.mxu1 %vm958_vm0, %v7844_v7  ;;  %v1373_v61 = vrot.slane %v7554_v33, 1  ;;  %v552_v11 = vmul.f32 0.044715, %v7842_v10  ;;  %v9523_v60 = vrot.slane %v7482_v39, 1 }
  0x89   : > { %v7857_v49 = vmul.f32 %v884_v50, %v506_v8  ;;  %v1378_v42 = vrot.slane %v7600_v2, 1  ;;  %6825 = vtanh.f32 %v762_v44  ;;  %v765_v50 = vmul.f32 0.7978846, %v711_v58  ;;  %v7887_v58 = vld [vmem:[%s7166_s13 + $0x178] sm:$0x3] }
  0x8a   : > { %v7865_v19 = vsel %vm379_vm1, %v9523_v60, %v1366_v4  ;;  %v6820_v8 = vpop.eup %6819  ;;  %v606_v14 = vmul.f32 %v552_v11, %v7842_v10  ;;  %v555_v4 = vmul.f32 0.044715, %v7853_v53  ;;  %v462_v44 = vmul.f32 0.5, %v7763_v59 }
  0x8b   : > { %9522 = vst [vmem:[#allocation40_spill] sm:$0xff] %v7857_v49  ;;  %9524 = vst [vmem:[#allocation41_spill] sm:$0xff] %v7865_v19  ;;  %5866 = vmatmul.mubr.msk.f32.gmra.mrb[12].mxu0 %vm958_vm0, %v7865_v19  ;;  %5669 = vmatmul.mubr.msk.f32.gmra.mrb[30].mxu1 %vm958_vm0, %v7857_v49  ;;  %v864_v16 = vadd.f32 1.0, %v6820_v8  ;;  %6827 = vtanh.f32 %v765_v50  ;;  %v558_v62 = vmul.f32 0.044715, %v7870_v0  ;;  %v9526_v2 = vrot.slane %v7579_v51, 1 }
  0x8c   : > { %5868 = vmatprep.mubr.msk.f32.mxu0 %vm958_vm0, %v7838_v22  ;;  %5679 = vmatprep.mubr.msk.f32.mxu1 %vm958_vm0, %v1330_v34  ;;  %v660_v60 = vmul.f32 %v606_v14, %v7842_v10  ;;  %v609_v5 = vmul.f32 %v555_v4, %v7853_v53  ;;  %v489_v34 = vmul.f32 0.5, %v7770_v32  ;;  %v492_v59 = vmul.f32 0.5, %v7786_v26 }
  0x8d   : > { %v7889_v11 = vmul.f32 %v864_v16, %v486_v27  ;;  %v7894_v33 = vsel %vm379_vm1, %v1373_v61, %v9526_v2  ;;  %v9528_v8 = vrot.slane %v7613_v29, 1  ;;  %v612_v4 = vmul.f32 %v558_v62, %v7870_v0 }
  0x8e   : > { %9527 = vst [vmem:[#allocation43_spill] sm:$0xff] %v7894_v33  ;;  %v714_v14 = vadd.f32 %v660_v60, %v7842_v10  ;;  %v663_v27 = vmul.f32 %v609_v5, %v7853_v53  ;;  %v1383_v32 = vrot.slane %v7655_v57, 1  ;;  %v561_v26 = vmul.f32 0.044715, %v7887_v58  ;;  %v7916_v5 = vld [vmem:[%s7166_s13 + $0x188] sm:$0xff] }
  0x8f   : > { %9525 = vst [vmem:[#allocation42_spill] sm:$0xff] %v7889_v11  ;;  %v7901_v50 = vsel %vm379_vm1, %v1378_v42, %v9528_v8  ;;  %v6822_v16 = vpop.eup %6821  ;;  %v1371_v2 = vrot.slane %v7889_v11, 1  ;;  %v666_v60 = vmul.f32 %v612_v4, %v7870_v0  ;;  %v7913_v8 = vld [vmem:[%s7166_s13 + $0x180] sm:$0xff]  ;;  %v9530_v62 = vrot.slane %v7509_v45, 1 }
  0x90   : > { %9529 = vst [vmem:[#allocation44_spill] sm:$0xff] %v7901_v50  ;;  %v6824_v52 = vpop.eup %6823  ;;  %v840_v39 = vadd.f32 1.0, %v6822_v16  ;;  %v768_v17 = vmul.f32 0.7978846, %v714_v14  ;;  %v717_v42 = vadd.f32 %v663_v27, %v7853_v53  ;;  %v495_v61 = vmul.f32 0.5, %v7808_v56 }
  0x91   : > { %v7921_v11 = vsel %vm379_vm1, %v9530_v62, %v1371_v2  ;;  %v867_v57 = vadd.f32 1.0, %v6824_v52  ;;  %v615_v38 = vmul.f32 %v561_v26, %v7887_v58  ;;  %v720_v4 = vadd.f32 %v666_v60, %v7870_v0 }
  0x92   : > { %9531 = vst [vmem:[#allocation45_spill] sm:$0xff] %v7921_v11  ;;  %5869 = vmatmul.mubr.msk.f32.gmra.mrb[14].mxu0 %vm958_vm0, %v7921_v11  ;;  %v7927_v14 = vmul.f32 %v840_v39, %v462_v44  ;;  %6829 = vtanh.f32 %v768_v17  ;;  %v771_v27 = vmul.f32 0.7978846, %v717_v42  ;;  %v562_v52 = vmul.f32 0.044715, %v7913_v8 }
  0x93   : > { %v6826_v16 = vpop.eup %6825  ;;  %5871 = vmatprep.mubr.msk.f32.mxu0 %vm958_vm0, %v7894_v33  ;;  %v7932_v2 = vmul.f32 %v867_v57, %v489_v34  ;;  %v669_v56 = vmul.f32 %v615_v38, %v7887_v58  ;;  %v563_v26 = vmul.f32 0.044715, %v7916_v5  ;;  %v774_v17 = vmul.f32 0.7978846, %v720_v4  ;;  %v7943_v34 = vld [vmem:[%s7166_s13 + $0x190] sm:$0x3] }
  0x94   : > { %v1331_v39 = vrot.slane %v7927_v14, 1  ;;  %v870_v44 = vadd.f32 1.0, %v6826_v16  ;;  %6831 = vtanh.f32 %v771_v27  ;;  %v616_v62 = vmul.f32 %v562_v52, %v7913_v8 }
  0x95   : > { %v1376_v42 = vrot.slane %v7932_v2, 1  ;;  %v723_v60 = vadd.f32 %v669_v56, %v7887_v58  ;;  %v617_v57 = vmul.f32 %v563_v26, %v7916_v5  ;;  %v6828_v38 = vpop.eup %6827  ;;  %v9532_v45 = vrot.slane %v7287_v63, 1 }
  0x96   : > { %v7948_v11 = vmul.f32 %v870_v44, %v492_v59  ;;  %v1388_v27 = vrot.slane %v7697_v21, 1  ;;  %6833 = vtanh.f32 %v774_v17  ;;  %v9533_v4 = vrot.slane %v7579_v51, 1  ;;  %v5041_v44 = vld [vmem:[%s9397_s1 + $0xc0] sm:$0xff]  ;;  %v5042_v17 = vld [vmem:[%s9397_s1 + $0xc8] sm:$0xff] }
  0x97   : > { %v1332_v33 = vsel %vm379_vm1, %v9532_v45, %v1331_v39  ;;  %v873_v56 = vadd.f32 1.0, %v6828_v38  ;;  %v777_v52 = vmul.f32 0.7978846, %v723_v60  ;;  %v670_v26 = vmul.f32 %v616_v62, %v7913_v8 }
  0x98   : > { %5680 = vmatmul.mubr.msk.f32.vlgmr.msra.gmra.mrb[0].mxu1 %vm958_vm0, %v1332_v33  ;;  %v7955_v16 = vsel %vm379_vm1, %v9533_v4, %v1376_v42  ;;  %v1381_v45 = vrot.slane %v7948_v11, 1  ;;  %v1389_v59 = vrot.slane %v7732_v12, 1  ;;  %v671_v33 = vmul.f32 %v617_v57, %v7916_v5 }
  0x99   : > { %9534 = vst [vmem:[#allocation46_spill] sm:$0xff] %v7955_v16  ;;  %5872 = vmatmul.mubr.msk.f32.gmra.mrb[16].mxu0 %vm958_vm0, %v7955_v16  ;;  %5682 = vmatprep.mubr.msk.f32.mxu1 %vm958_vm0, %v7487_v15  ;;  %v564_v39 = vmul.f32 0.044715, %v7943_v34  ;;  %v7974_v15 = vmul.f32 %v873_v56, %v495_v61  ;;  %6835 = vtanh.f32 %v777_v52  ;;  %v724_v42 = vadd.f32 %v670_v26, %v7913_v8 }
  0x9a   : > { %5874 = vmatprep.mubr.msk.f32.mxu0 %vm958_vm0, %v7901_v50  ;;  %v9535_v60 = vrot.slane %v7613_v29, 1  ;;  %v9537_v57 = vrot.slane %v7673_v47, 1  ;;  %v725_v4 = vadd.f32 %v671_v33, %v7916_v5  ;;  %v498_v56 = vmul.f32 0.5, %v7842_v10 }
  0x9b   : > { %v618_v12 = vmul.f32 %v564_v39, %v7943_v34  ;;  %v1386_v61 = vrot.slane %v7974_v15, 1  ;;  %v778_v52 = vmul.f32 0.7978846, %v724_v42  ;;  %v7993_v26 = vpack.c.bf16 %v5042_v17, %v5041_v44 }
  0x9c   : > { %v7980_v62 = vsel %vm379_vm1, %v9535_v60, %v1381_v45  ;;  %v7985_v38 = vsel %vm379_vm1, %v1383_v32, %v9537_v57  ;;  %5683 = vmatmul.mubr.msk.f32.gmra.mrb[2].mxu1 %vm958_vm0, %v7564_v46  ;;  %v6830_v45 = vpop.eup %6829  ;;  %v8000_v32 = vsel %vm379_vm1, %v1388_v27, %v1389_v59  ;;  %v779_v33 = vmul.f32 0.7978846, %v725_v4 }
  0x9d   : > { %9536 = vst [vmem:[#allocation47_spill] sm:$0xff] %v7980_v62  ;;  %9538 = vst [vmem:[#allocation48_spill] sm:$0xff] %v7985_v38  ;;  %5875 = vmatmul.mubr.msk.f32.gmra.mrb[18].mxu0 %vm958_vm0, %v7980_v62  ;;  %5685 = vmatprep.mubr.msk.f32.mxu1 %vm958_vm0, %v7514_v6  ;;  %v672_v46 = vmul.f32 %v618_v12, %v7943_v34  ;;  %v9540_v10 = vmov %v9537_v57  ;;  %v876_v44 = vadd.f32 1.0, %v6830_v45  ;;  %v501_v17 = vmul.f32 0.5, %v7853_v53 }
  0x9e   : > { %9539 = vst [vmem:[#allocation49_spill] sm:$0xff] %v8000_v32  ;;  %5877 = vmatprep.mubr.msk.f32.mxu0 %vm958_vm0, %v7985_v38  ;;  %v8008_v39 = vsel %vm379_vm1, %v9540_v10, %v1386_v61  ;;  %6837 = vtanh.f32 %v778_v52  ;;  %6276 = vmatprep.subr.bf16.mxu0 %v7993_v26  ;;  %v6832_v42 = vpop.eup %6831  ;;  %v1393_v27 = vrot.slane %v7751_v25, 1  ;;  %v1394_v60 = vrot.slane %v7767_v43, 1 }
  0x9f   : > { %9541 = vst [vmem:[#allocation50_spill] sm:$0xff] %v8008_v39  ;;  %6839 = vtanh.f32 %v779_v33  ;;  %v726_v12 = vadd.f32 %v672_v46, %v7943_v34  ;;  %v8017_v57 = vmul.f32 %v876_v44, %v498_v56  ;;  %v879_v4 = vadd.f32 1.0, %v6832_v42 }
  0xa0   : > { %5686 = vmatmul.mubr.msk.f32.gmra.mrb[4].mxu1 %vm958_vm0, %v7624_v41  ;;  %v504_v61 = vmul.f32 0.5, %v7870_v0  ;;  %v6834_v53 = vpop.eup %6833  ;;  %v1398_v52 = vrot.slane %v7803_v18, 1  ;;  %v1399_v46 = vrot.slane %v7826_v13, 1  ;;  %v8032_v10 = vsel %vm379_vm1, %v1393_v27, %v1394_v60 }
  0xa1   : > { %5878 = vmatmul.mubr.msk.f32.gmra.mrb[20].mxu0 %vm958_vm0, %v8008_v39  ;;  %5688 = vmatprep.mubr.msk.f32.mxu1 %vm958_vm0, %v7569_v48  ;;  %v780_v45 = vmul.f32 0.7978846, %v726_v12  ;;  %v1391_v33 = vrot.slane %v8017_v57, 1  ;;  %v8028_v56 = vmul.f32 %v879_v4, %v501_v17  ;;  %v882_v0 = vadd.f32 1.0, %v6834_v53  ;;  %9542 = vst [vmem:[#allocation51_spill] sm:$0xff] %v8032_v10 }
  0xa2   : > { %5880 = vmatprep.mubr.msk.f32.mxu0 %vm958_vm0, %v8000_v32  ;;  %v507_v44 = vmul.f32 0.5, %v7887_v58  ;;  %v1404_v53 = vrot.slane %v7857_v49, 1  ;;  %v510_v6 = vmul.f32 0.5, %v7943_v34 }
  0xa3   : > { %6841 = vtanh.f32 %v780_v45  ;;  %v6836_v42 = vpop.eup %6835  ;;  %v8038_v12 = vsel %vm379_vm1, %v1389_v59, %v1391_v33  ;;  %v1396_v48 = vrot.slane %v8028_v56, 1  ;;  %v8041_v17 = vmul.f32 %v882_v0, %v504_v61  ;;  %v4897_v0 = vld [vmem:[%s9397_s1 + $0x40] sm:$0xff] }
  0xa4   : > { %5689 = vmatmul.mubr.msk.f32.gmra.mrb[6].mxu1 %vm958_vm0, %v7663_v40  ;;  %9543 = vst [vmem:[#allocation52_spill] sm:$0xff] %v8038_v12  ;;  %v885_v27 = vadd.f32 1.0, %v6836_v42  ;;  %v8053_v59 = vsel %vm379_vm1, %v1398_v52, %v1399_v46  ;;  %v1403_v61 = vrot.slane %v7844_v7, 1  ;;  %v508_v33 = vmul.f32 0.5, %v7913_v8 }
  0xa5   : > { %5881 = vmatmul.mubr.msk.f32.gmra.mrb[22].mxu0 %vm958_vm0, %v8038_v12  ;;  %5691 = vmatprep.mubr.msk.f32.mxu1 %vm958_vm0, %v7629_v35  ;;  %v8050_v58 = vsel %vm379_vm1, %v1394_v60, %v1396_v48  ;;  %9545 = vst [vmem:[#allocation54_spill] sm:$0xff] %v8053_v59  ;;  %v1401_v4 = vrot.slane %v8041_v17, 1  ;;  %v4898_v48 = vld [vmem:[%s9397_s1 + $0x48] sm:$0xff]  ;;  %v509_v52 = vmul.f32 0.5, %v7916_v5 }
  0xa6   : > { %5883 = vmatprep.mubr.msk.f32.mxu0 %vm958_vm0, %v8032_v10  ;;  %9544 = vst [vmem:[#allocation53_spill] sm:$0xff] %v8050_v58  ;;  %v8058_v45 = vmul.f32 %v885_v27, %v507_v44  ;;  %v4899_v44 = vld [vmem:[%s9397_s1 + $0x50] sm:$0xff]  ;;  %v4900_v27 = vld [vmem:[%s9397_s1 + $0x58] sm:$0xff]  ;;  %v6243_v40 = vpack.c.bf16 %v4898_v48, %v4897_v0  ;;  %v1741_v0 = vrot.slane %v7295_v9, 2  ;;  %v1743_v9 = vrot.slane %v7545_v28, 2 }
  0xa7   : > { %v8083_v5 = vsel %vm379_vm1, %v1399_v46, %v1401_v4  ;;  %v6247_v49 = vpack.c.bf16 %v4900_v27, %v4899_v44  ;;  %v5043_v28 = vld [vmem:[%s9397_s1 + $0xd0] sm:$0xff] }
  0xa8   : > { %v6838_v60 = vpop.eup %6837  ;;  %5692 = vmatmul.mubr.msk.f32.gmra.mrb[8].mxu1 %vm958_vm0, %v7710_v31  ;;  %9546 = vst [vmem:[#allocation55_spill] sm:$0xff] %v8083_v5  ;;  %v1406_v31 = vrot.slane %v8058_v45, 1  ;;  %6244 = vmatprep.subr.bf16.mxu1 %v6243_v40  ;;  %v9550_v27 = vld [vmem:[#allocation7_spill] sm:$0xff] }
  0xa9   : > { %v6840_v42 = vpop.eup %6839  ;;  %5884 = vmatmul.mubr.msk.f32.gmra.mrb[24].mxu0 %vm958_vm0, %v8050_v58  ;;  %5694 = vmatprep.mubr.msk.f32.mxu1 %vm958_vm0, %v7684_v54  ;;  %v886_v8 = vadd.f32 1.0, %v6838_v60  ;;  %v8087_v60 = vsel %vm379_vm1, %v1403_v61, %v1404_v53 }
  0xaa   : > { %5886 = vmatprep.mubr.msk.f32.mxu0 %vm958_vm0, %v8053_v59  ;;  %v887_v35 = vadd.f32 1.0, %v6840_v42  ;;  %v8104_v61 = vsel %vm379_vm1, %v1404_v53, %v1406_v31  ;;  %6246 = vmatpush3.bf16.msra.mxu1 %v6243_v40  ;;  %v1746_v31 = vrot.slane %v7316_v20, 2  ;;  %v8148_v42 = vsel %vm1734_vm2, %v1741_v0, %v1743_v9 }
  0xab   : > { %v8089_v54 = vmul.f32 %v886_v8, %v508_v33  ;;  %9547 = vst [vmem:[#allocation56_spill] sm:$0xff] %v8104_v61  ;;  %v1740_v33 = vrot.slane %v7283_v1, 2  ;;  %6248 = vmatprep.subr.bf16.mxu1 %v6247_v49  ;;  %v1748_v8 = vrot.slane %v7596_v36, 2  ;;  %v9553_v36 = vld [vmem:[#allocation43_spill] sm:$0xff] }
  0xac   : > { %5695 = vmatmul.mubr.msk.f32.gmra.mrb[10].mxu1 %vm958_vm0, %v7758_v37  ;;  %v8093_v41 = vmul.f32 %v887_v35, %v509_v52 }
  0xad   : > { %v6842_v46 = vpop.eup %6841  ;;  %5887 = vmatmul.mubr.msk.f32.gmra.mrb[26].mxu0 %vm958_vm0, %v8083_v5  ;;  %5697 = vmatprep.mubr.msk.f32.mxu1 %vm958_vm0, %v7737_v30  ;;  %v2410_v4 = vrot.slane %v8089_v54, 1  ;;  %v8125_v40 = vsel %vm1734_vm2, %v1740_v33, %v1741_v0  ;;  %v9552_v33 = vld [vmem:[#allocation45_spill] sm:$0xff]  ;;  %v5078_v0 = vld [vmem:[%s9397_s1 + $0xe8] sm:$0xff]  ;;  %v8172_v9 = vsel %vm1734_vm2, %v1746_v31, %v1748_v8 }
  0xae   : > { %5889 = vmatprep.mubr.msk.f32.mxu0 %vm958_vm0, %v8087_v60  ;;  %v2411_v35 = vrot.slane %v8093_v41, 1  ;;  %v888_v34 = vadd.f32 1.0, %v6842_v46  ;;  %6250 = vmatpush3.bf16.msra.mxu1 %v6247_v49  ;;  %v5044_v49 = vld [vmem:[%s9397_s1 + $0xd8] sm:$0xff]  ;;  %v1750_v46 = vrot.slane %v9550_v27, 2 }
  0xaf   : > { %6311 = vmatprep.subr.bf16.mxu1 %v7126_v3 }
  0xb0   : > { %5698 = vmatmul.mubr.msk.f32.gmra.mrb[12].mxu1 %vm958_vm0, %v7801_v24  ;;  %v8112_v48 = vsel %vm379_vm1, %v2410_v4, %v2411_v35  ;;  %v8114_v52 = vmul.f32 %v888_v34, %v510_v6  ;;  %v1745_v6 = vrot.slane %v7309_v23, 2  ;;  %v9551_v4 = vld [vmem:[#allocation8_spill] sm:$0xff]  ;;  %v6279_v34 = vpack.c.bf16 %v5044_v49, %v5043_v28 }
  0xb1   : > { %9548 = vst [vmem:[#allocation57_spill] sm:$0xff] %v8112_v48  ;;  %5890 = vmatmul.mubr.msk.f32.gmra.mrb[28].mxu0 %vm958_vm0, %v8104_v61  ;;  %5700 = vmatprep.mubr.msk.f32.mxu1 %vm958_vm0, %v7794_v55 }
  0xb2   : > { %5892 = vmatprep.mubr.msk.f32.mxu0 %vm958_vm0, %v8112_v48  ;;  %v2413_v1 = vrot.slane %v8114_v52, 1  ;;  %v8152_v44 = vsel %vm1734_vm2, %v1745_v6, %v1746_v31  ;;  %v9554_v6 = vld [vmem:[#allocation25_spill] sm:$0xff]  ;;  %v9557_v31 = vld [vmem:[#allocation28_spill] sm:$0xff] }
  0xb3   : > { %v1753_v28 = vrot.slane %v9554_v6, 2  ;;  %v1758_v8 = vrot.slane %v9557_v31, 2  ;;  %v9559_v6 = vld [vmem:[#allocation12_spill] sm:$0xff]  ;;  %v9561_v31 = vld [vmem:[#allocation13_spill] sm:$0xff] }
  0xb4   : > { %5701 = vmatmul.mubr.msk.f32.gmra.mrb[14].mxu1 %vm958_vm0, %v7865_v19  ;;  %v8133_v53 = vsel %vm379_vm1, %v2411_v35, %v2413_v1  ;;  %v1751_v35 = vrot.slane %v9551_v4, 2  ;;  %v5077_v1 = vld [vmem:[%s9397_s1 + $0xe0] sm:$0xff] }
  0xb5   : > { %9549 = vst [vmem:[#allocation58_spill] sm:$0xff] %v8133_v53  ;;  %5893 = vmatmul.mubr.msk.f32.gmra.mrb[30].mxu0 %vm958_vm0, %v8133_v53  ;;  %5703 = vmatprep.mubr.msk.f32.mxu1 %vm958_vm0, %v7838_v22  ;;  %v9555_v53 = vld [vmem:[#allocation9_spill] sm:$0xff]  ;;  %v8180_v19 = vpack.c.bf16 %v5078_v0, %v5077_v1  ;;  %v9558_v1 = vld [vmem:[#allocation11_spill] sm:$0xff] }
  0xb6   : > { %5903 = vmatprep.mubr.msk.f32.mxu0 %vm958_vm0, %v8125_v40  ;;  %v8176_v49 = vsel %vm1734_vm2, %v1750_v46, %v1751_v35  ;;  %v1755_v48 = vrot.slane %v9555_v53, 2  ;;  %v1760_v0 = vrot.slane %v9558_v1, 2 }
  0xb8   : > { %5704 = vmatmul.mubr.msk.f32.gmra.mrb[16].mxu1 %vm958_vm0, %v9552_v33  ;;  %v9556_v33 = vld [vmem:[#allocation10_spill] sm:$0xff] }
  0xb9   : > { %5904 = vmatmul.mubr.msk.f32.vlgmr.msra.gmra.mrb[0].mxu0 %vm958_vm0, %v8148_v42  ;;  %5706 = vmatprep.mubr.msk.f32.mxu1 %vm958_vm0, %v9553_v36  ;;  %v1756_v22 = vrot.slane %v9556_v33, 2 }
  0xba   : > { %6278 = vmatpush3.bf16.msra.mxu0 %v7993_v26  ;;  %5906 = vmatprep.mubr.msk.f32.mxu0 %vm958_vm0, %v8152_v44  ;;  %v8191_v26 = vsel %vm1734_vm2, %v1751_v35, %v1753_v28  ;;  %v9560_v35 = vld [vmem:[#allocation33_spill] sm:$0xff] }
  0xbb   : > { %6280 = vmatprep.subr.bf16.mxu0 %v6279_v34  ;;  %v8195_v46 = vsel %vm1734_vm2, %v1755_v48, %v1756_v22  ;;  %v8209_v48 = vsel %vm1734_vm2, %v1756_v22, %v1758_v8  ;;  %v9563_v8 = vld [vmem:[#allocation35_spill] sm:$0xff] }
  0xbc   : > { %5707 = vmatmul.mubr.msk.f32.gmra.mrb[18].mxu1 %vm958_vm0, %v7955_v16  ;;  %v1761_v16 = vrot.slane %v9559_v6, 2 }
  0xbd   : > { %5907 = vmatmul.mubr.msk.f32.gmra.mrb[2].mxu0 %vm958_vm0, %v8172_v9  ;;  %5709 = vmatprep.mubr.msk.f32.mxu1 %vm958_vm0, %v7901_v50  ;;  %v1765_v50 = vrot.slane %v9561_v31, 2 }
  0xbe   : > { %5909 = vmatprep.mubr.msk.f32.mxu0 %vm958_vm0, %v8176_v49  ;;  %6282 = vmatpush3.bf16.msra.mxu0 %v6279_v34  ;;  %v1763_v34 = vrot.slane %v9560_v35, 2  ;;  %v8213_v28 = vsel %vm1734_vm2, %v1760_v0, %v1761_v16  ;;  %v1768_v0 = vrot.slane %v9563_v8, 2 }
  0xbf   : > { %6284 = vmatprep.subr.bf16.mxu0 %v8180_v19 }
  0xc0   : > { %5710 = vmatmul.mubr.msk.f32.gmra.mrb[20].mxu1 %vm958_vm0, %v7980_v62  ;;  %v9562_v62 = vld [vmem:[#allocation14_spill] sm:$0xff]  ;;  %v8226_v22 = vsel %vm1734_vm2, %v1761_v16, %v1763_v34 }
  0xc1   : > { %5910 = vmatmul.mubr.msk.f32.gmra.mrb[4].mxu0 %vm958_vm0, %v8191_v26  ;;  %5712 = vmatprep.mubr.msk.f32.mxu1 %vm958_vm0, %v7985_v38  ;;  %v1766_v36 = vrot.slane %v9562_v62, 2  ;;  %v9564_v38 = vld [vmem:[#allocation15_spill] sm:$0xff] }
  0xc2   : > { %5912 = vmatprep.mubr.msk.f32.mxu0 %vm958_vm0, %v8195_v46  ;;  %v1770_v55 = vrot.slane %v9564_v38, 2  ;;  %v1781_v38 = vrot.slane %v7579_v51, 2 }
  0xc3   : > { %v8230_v35 = vsel %vm1734_vm2, %v1765_v50, %v1766_v36  ;;  %v8243_v16 = vsel %vm1734_vm2, %v1766_v36, %v1768_v0  ;;  %v9566_v50 = vld [vmem:[#allocation38_spill] sm:$0xff] }
  0xc4   : > { %5713 = vmatmul.mubr.msk.f32.gmra.mrb[22].mxu1 %vm958_vm0, %v8008_v39  ;;  %v9565_v39 = vld [vmem:[#allocation16_spill] sm:$0xff]  ;;  %v1773_v34 = vrot.slane %v9566_v50, 2  ;;  %v9570_v50 = vld [vmem:[#allocation6_spill] sm:$0xff] }
  0xc5   : > { %5913 = vmatmul.mubr.msk.f32.gmra.mrb[6].mxu0 %vm958_vm0, %v8209_v48  ;;  %5715 = vmatprep.mubr.msk.f32.mxu1 %vm958_vm0, %v8000_v32  ;;  %v1771_v24 = vrot.slane %v9565_v39, 2  ;;  %v9567_v32 = vld [vmem:[#allocation17_spill] sm:$0xff] }
  0xc6   : > { %5915 = vmatprep.mubr.msk.f32.mxu0 %vm958_vm0, %v8213_v28  ;;  %v1775_v30 = vrot.slane %v9567_v32, 2  ;;  %v9571_v32 = vld [vmem:[#allocation20_spill] sm:$0xff] }
  0xc7   : > { %v8247_v8 = vsel %vm1734_vm2, %v1770_v55, %v1771_v24  ;;  %v8260_v36 = vsel %vm1734_vm2, %v1771_v24, %v1773_v34  ;;  %v9569_v55 = vld [vmem:[#allocation42_spill] sm:$0xff]  ;;  %v1780_v39 = vrot.slane %v9571_v32, 2  ;;  %v1738_v24 = vrot.slane %v7927_v14, 2 }
  0xc8   : > { %5716 = vmatmul.mubr.msk.f32.gmra.mrb[24].mxu1 %vm958_vm0, %v8038_v12  ;;  %v9568_v12 = vld [vmem:[#allocation18_spill] sm:$0xff]  ;;  %v1778_v0 = vrot.slane %v9569_v55, 2  ;;  %v1783_v34 = vrot.slane %v7932_v2, 2  ;;  %v1788_v2 = vrot.slane %v7948_v11, 2 }
  0xc9   : > { %5916 = vmatmul.mubr.msk.f32.gmra.mrb[8].mxu0 %vm958_vm0, %v8226_v22  ;;  %5718 = vmatprep.mubr.msk.f32.mxu1 %vm958_vm0, %v8032_v10  ;;  %v1776_v37 = vrot.slane %v9568_v12, 2  ;;  %v1735_v10 = vrot.slane %v9570_v50, 2  ;;  %v1736_v12 = vrot.slane %v7287_v63, 2  ;;  %v8285_v55 = vsel %vm1734_vm2, %v1780_v39, %v1781_v38  ;;  %v9572_v50 = vld [vmem:[#allocation22_spill] sm:$0xff] }
  0xca   : > { %5918 = vmatprep.mubr.msk.f32.mxu0 %vm958_vm0, %v8230_v35  ;;  %v8298_v14 = vsel %vm1734_vm2, %v1781_v38, %v1783_v34  ;;  %v1793_v38 = vrot.slane %v7974_v15, 2  ;;  %v9575_v34 = vld [vmem:[#allocation5_spill] sm:$0xff]  ;;  %v1798_v15 = vrot.slane %v8017_v57, 2 }
  0xcb   : > { %v8280_v63 = vsel %vm1734_vm2, %v1776_v37, %v1778_v0 }
  0xcc   : > { %5719 = vmatmul.mubr.msk.f32.gmra.mrb[26].mxu1 %vm958_vm0, %v8050_v58  ;;  %v8266_v58 = vsel %vm1734_vm2, %v1775_v30, %v1776_v37  ;;  %v1737_v30 = vsel %vm1734_vm2, %v1735_v10, %v1736_v12  ;;  %v1739_v37 = vsel %vm1734_vm2, %v1736_v12, %v1738_v24  ;;  %v9573_v10 = vld [vmem:[#allocation26_spill] sm:$0xff]  ;;  %v9574_v24 = vld [vmem:[#allocation31_spill] sm:$0xff] }
  0xcd   : > { %5919 = vmatmul.mubr.msk.f32.gmra.mrb[10].mxu0 %vm958_vm0, %v8243_v16  ;;  %5721 = vmatprep.mubr.msk.f32.mxu1 %vm958_vm0, %v8053_v59  ;;  %v1786_v59 = vrot.slane %v7613_v29, 2  ;;  %v1790_v0 = vrot.slane %v9573_v10, 2 }
  0xce   : > { %5921 = vmatprep.mubr.msk.f32.mxu0 %vm958_vm0, %v8247_v8 }
  0xcf   : > { %v8314_v11 = vsel %vm1734_vm2, %v1786_v59, %v1788_v2  ;;  %v1805_v2 = vrot.slane %v7803_v18, 2 }
  0xd0   : > { %5722 = vmatmul.mubr.msk.f32.gmra.mrb[28].mxu1 %vm958_vm0, %v8083_v5  ;;  %v1785_v5 = vrot.slane %v9572_v50, 2 }
  0xd1   : > { %5922 = vmatmul.mubr.msk.f32.gmra.mrb[12].mxu0 %vm958_vm0, %v8260_v36  ;;  %5724 = vmatprep.mubr.msk.f32.mxu1 %vm958_vm0, %v8087_v60 }
  0xd2   : > { %5924 = vmatprep.mubr.msk.f32.mxu0 %vm958_vm0, %v8266_v58  ;;  %v8302_v39 = vsel %vm1734_vm2, %v1785_v5, %v1786_v59  ;;  %v1795_v5 = vrot.slane %v7697_v21, 2 }
  0xd4   : > { %5725 = vmatmul.mubr.msk.f32.gmra.mrb[30].mxu1 %vm958_vm0, %v8104_v61  ;;  %v1791_v61 = vrot.slane %v7673_v47, 2 }
  0xd5   : > { %5925 = vmatmul.mubr.msk.f32.gmra.mrb[14].mxu0 %vm958_vm0, %v8280_v63  ;;  %5735 = vmatprep.mubr.msk.f32.mxu1 %vm958_vm0, %v1737_v30  ;;  %v1796_v30 = vrot.slane %v9574_v24, 2 }
  0xd6   : > { %5927 = vmatprep.mubr.msk.f32.mxu0 %vm958_vm0, %v8285_v55  ;;  %v8319_v12 = vsel %vm1734_vm2, %v1790_v0, %v1791_v61  ;;  %v1806_v0 = vrot.slane %v7826_v13, 2 }
  0xd7   : > { %v8338_v59 = vsel %vm1734_vm2, %v1795_v5, %v1796_v30  ;;  %v8351_v57 = vsel %vm1734_vm2, %v1796_v30, %v1798_v15  ;;  %v1810_v30 = vrot.slane %v7844_v7, 2 }
  0xd8   : > { %5736 = vmatmul.mubr.msk.f32.vlgmr.msra.gmra.mrb[0].mxu1 %vm958_vm0, %v1739_v37  ;;  %v8372_v5 = vsel %vm1734_vm2, %v1805_v2, %v1806_v0  ;;  %v2682_v2 = vrot.slane %v8093_v41, 2 }
  0xd9   : > { %5928 = vmatmul.mubr.msk.f32.gmra.mrb[16].mxu0 %vm958_vm0, %v8298_v14  ;;  %5738 = vmatprep.mubr.msk.f32.mxu1 %vm958_vm0, %v8125_v40  ;;  %v1800_v40 = vrot.slane %v7751_v25, 2 }
  0xda   : > { %5930 = vmatprep.mubr.msk.f32.mxu0 %vm958_vm0, %v8302_v39  ;;  %6313 = vmatpush3.bf16.msra.mxu1 %v7126_v3  ;;  %v8333_v3 = vsel %vm1734_vm2, %v1791_v61, %v1793_v38  ;;  %v1803_v61 = vrot.slane %v8028_v56, 2  ;;  %v1808_v38 = vrot.slane %v8041_v17, 2 }
  0xdb   : > { %6312 = vmatprep.subr.bf16.mxu1 %v9575_v34 }
  0xdc   : > { %5739 = vmatmul.mubr.msk.f32.gmra.mrb[2].mxu1 %vm958_vm0, %v8148_v42  ;;  %v1801_v42 = vrot.slane %v7767_v43, 2  ;;  %v8385_v17 = vsel %vm1734_vm2, %v1806_v0, %v1808_v38  ;;  %v2684_v0 = vrot.slane %v8114_v52, 2  ;;  %v5079_v52 = vld [vmem:[%s9397_s1 + $0xf0] sm:$0xff] }
  0xdd   : > { %5931 = vmatmul.mubr.msk.f32.gmra.mrb[18].mxu0 %vm958_vm0, %v8314_v11  ;;  %5741 = vmatprep.mubr.msk.f32.mxu1 %vm958_vm0, %v8152_v44 }
  0xde   : > { %5933 = vmatprep.mubr.msk.f32.mxu0 %vm958_vm0, %v8319_v12  ;;  %6314 = vmatpush3.bf16.msra.mxu1 %v9575_v34  ;;  %v8355_v37 = vsel %vm1734_vm2, %v1800_v40, %v1801_v42  ;;  %v8368_v56 = vsel %vm1734_vm2, %v1801_v42, %v1803_v61  ;;  %v9576_v34 = vld [vmem:[#allocation40_spill] sm:$0xff]  ;;  %v1813_v40 = vrot.slane %v8058_v45, 2  ;;  %v2681_v61 = vrot.slane %v8089_v54, 2 }
  0xdf   : > { %v1811_v15 = vrot.slane %v9576_v34, 2 }
  0xe0   : > { %5742 = vmatmul.mubr.msk.f32.gmra.mrb[4].mxu1 %vm958_vm0, %v8172_v9  ;;  %v8406_v38 = vsel %vm1734_vm2, %v2681_v61, %v2682_v2  ;;  %v5113_v61 = vld [vmem:[%s9397_s1 + $0x100] sm:$0xff] }
  0xe1   : > { %5934 = vmatmul.mubr.msk.f32.gmra.mrb[20].mxu0 %vm958_vm0, %v8333_v3  ;;  %5744 = vmatprep.mubr.msk.f32.mxu1 %vm958_vm0, %v8176_v49  ;;  %v8389_v42 = vsel %vm1734_vm2, %v1810_v30, %v1811_v15  ;;  %v8402_v45 = vsel %vm1734_vm2, %v1811_v15, %v1813_v40  ;;  %v8417_v30 = vsel %vm1734_vm2, %v2682_v2, %v2684_v0  ;;  %v5080_v15 = vld [vmem:[%s9397_s1 + $0xf8] sm:$0xff]  ;;  %v5114_v2 = vld [vmem:[%s9397_s1 + $0x108] sm:$0xff] }
  0xe2   : > { %5936 = vmatprep.mubr.msk.f32.mxu0 %vm958_vm0, %v8338_v59  ;;  %v6287_v40 = vpack.c.bf16 %v5080_v15, %v5079_v52 }
  0xe4   : > { %5745 = vmatmul.mubr.msk.f32.gmra.mrb[6].mxu1 %vm958_vm0, %v8191_v26 }
  0xe5   : > { %5937 = vmatmul.mubr.msk.f32.gmra.mrb[22].mxu0 %vm958_vm0, %v8351_v57  ;;  %5747 = vmatprep.mubr.msk.f32.mxu1 %vm958_vm0, %v8195_v46 }
  0xe6   : > { %5939 = vmatprep.mubr.msk.f32.mxu0 %vm958_vm0, %v8355_v37 }
  0xe8   : > { %5748 = vmatmul.mubr.msk.f32.gmra.mrb[8].mxu1 %vm958_vm0, %v8209_v48 }
  0xe9   : > { %5940 = vmatmul.mubr.msk.f32.gmra.mrb[24].mxu0 %vm958_vm0, %v8368_v56  ;;  %5750 = vmatprep.mubr.msk.f32.mxu1 %vm958_vm0, %v8213_v28 }
  0xea   : > { %5942 = vmatprep.mubr.msk.f32.mxu0 %vm958_vm0, %v8372_v5 }
  0xec   : > { %5751 = vmatmul.mubr.msk.f32.gmra.mrb[10].mxu1 %vm958_vm0, %v8226_v22 }
  0xed   : > { %5943 = vmatmul.mubr.msk.f32.gmra.mrb[26].mxu0 %vm958_vm0, %v8385_v17  ;;  %5753 = vmatprep.mubr.msk.f32.mxu1 %vm958_vm0, %v8230_v35 }
  0xee   : > { %5945 = vmatprep.mubr.msk.f32.mxu0 %vm958_vm0, %v8389_v42 }
  0xf0   : > { %5754 = vmatmul.mubr.msk.f32.gmra.mrb[12].mxu1 %vm958_vm0, %v8243_v16 }
  0xf1   : > { %5946 = vmatmul.mubr.msk.f32.gmra.mrb[28].mxu0 %vm958_vm0, %v8402_v45  ;;  %5756 = vmatprep.mubr.msk.f32.mxu1 %vm958_vm0, %v8247_v8 }
  0xf2   : > { %5948 = vmatprep.mubr.msk.f32.mxu0 %vm958_vm0, %v8406_v38 }
  0xf4   : > { %5757 = vmatmul.mubr.msk.f32.gmra.mrb[14].mxu1 %vm958_vm0, %v8260_v36 }
  0xf5   : > { %5949 = vmatmul.mubr.msk.f32.gmra.mrb[30].mxu0 %vm958_vm0, %v8417_v30  ;;  %5759 = vmatprep.mubr.msk.f32.mxu1 %vm958_vm0, %v8266_v58 }
  0xf6   : > { %5959 = vmatprep.mubr.msk.f32.mxu0 %vm958_vm0, %v7309_v23  ;;  %v8448_v23 = vpack.c.bf16 %v5114_v2, %v5113_v61  ;;  %v9585_v2 = vld [vmem:[#allocation24_spill] sm:$0xff] }
  0xf8   : > { %5760 = vmatmul.mubr.msk.f32.gmra.mrb[16].mxu1 %vm958_vm0, %v8280_v63 }
  0xf9   : > { %5960 = vmatmul.mubr.msk.f32.vlgmr.msra.gmra.mrb[0].mxu0 %vm958_vm0, %v7316_v20  ;;  %5762 = vmatprep.mubr.msk.f32.mxu1 %vm958_vm0, %v8285_v55  ;;  %v328_v20 = vld [vmem:[%s7166_s13 + $0x198] sm:$0xff] }
  0xfa   : > { %6286 = vmatpush3.bf16.msra.mxu0 %v8180_v19  ;;  %5962 = vmatprep.mubr.msk.f32.mxu0 %vm958_vm0, %v9550_v27  ;;  %v565_v19 = vmul.f32 0.044715, %v328_v20  ;;  %v9577_v27 = vld [vmem:[#allocation15_spill] sm:$0xff] }
  0xfb   : > { %6288 = vmatprep.subr.bf16.mxu0 %v6287_v40 }
  0xfc   : > { %5763 = vmatmul.mubr.msk.f32.gmra.mrb[18].mxu1 %vm958_vm0, %v8298_v14 }
  0xfd   : > { %5963 = vmatmul.mubr.msk.f32.gmra.mrb[2].mxu0 %vm958_vm0, %v9551_v4  ;;  %5765 = vmatprep.mubr.msk.f32.mxu1 %vm958_vm0, %v8302_v39 }
  0xfe   : > { %5965 = vmatprep.mubr.msk.f32.mxu0 %vm958_vm0, %v9555_v53  ;;  %6290 = vmatpush3.bf16.msra.mxu0 %v6287_v40  ;;  %v329_v53 = vld [vmem:[%s7166_s13 + $0x1a0] sm:$0xff] }
  0xff   : > { %6292 = vmatprep.subr.bf16.mxu0 %v8448_v23  ;;  %v566_v4 = vmul.f32 0.044715, %v329_v53 }
 0x100   : > { %5766 = vmatmul.mubr.msk.f32.gmra.mrb[20].mxu1 %vm958_vm0, %v8314_v11 }
 0x101   : > { %5966 = vmatmul.mubr.msk.f32.gmra.mrb[4].mxu0 %vm958_vm0, %v9556_v33  ;;  %5768 = vmatprep.mubr.msk.f32.mxu1 %vm958_vm0, %v8319_v12  ;;  %v9578_v33 = vld [vmem:[#allocation16_spill] sm:$0xff] }
 0x102   : > { %5968 = vmatprep.mubr.msk.f32.mxu0 %vm958_vm0, %v9558_v1  ;;  %v619_v1 = vmul.f32 %v565_v19, %v328_v20  ;;  %v9587_v19 = vld [vmem:[#allocation29_spill] sm:$0xff] }
 0x104   : > { %5769 = vmatmul.mubr.msk.f32.gmra.mrb[22].mxu1 %vm958_vm0, %v8333_v3  ;;  %v673_v0 = vmul.f32 %v619_v1, %v328_v20 }
 0x105   : > { %5969 = vmatmul.mubr.msk.f32.gmra.mrb[6].mxu0 %vm958_vm0, %v9559_v6  ;;  %5771 = vmatprep.mubr.msk.f32.mxu1 %vm958_vm0, %v8338_v59  ;;  %v620_v6 = vmul.f32 %v566_v4, %v329_v53  ;;  %v9589_v4 = vld [vmem:[#allocation32_spill] sm:$0xff] }
 0x106   : > { %5971 = vmatprep.mubr.msk.f32.mxu0 %vm958_vm0, %v9561_v31  ;;  %v9580_v31 = vld [vmem:[#allocation18_spill] sm:$0xff]  ;;  %v727_v15 = vadd.f32 %v673_v0, %v328_v20  ;;  %v9593_v0 = vld [vmem:[#allocation39_spill] sm:$0xff] }
 0x107   : > { %v674_v52 = vmul.f32 %v620_v6, %v329_v53  ;;  %v9592_v6 = vld [vmem:[#allocation41_spill] sm:$0xff] }
 0x108   : > { %5772 = vmatmul.mubr.msk.f32.gmra.mrb[24].mxu1 %vm958_vm0, %v8351_v57  ;;  %v781_v61 = vmul.f32 0.7978846, %v727_v15 }
 0x109   : > { %5972 = vmatmul.mubr.msk.f32.gmra.mrb[8].mxu0 %vm958_vm0, %v9562_v62  ;;  %5774 = vmatprep.mubr.msk.f32.mxu1 %vm958_vm0, %v8355_v37  ;;  %v9579_v62 = vld [vmem:[#allocation17_spill] sm:$0xff]  ;;  %v728_v40 = vadd.f32 %v674_v52, %v329_v53 }
 0x10a   : > { %5974 = vmatprep.mubr.msk.f32.mxu0 %vm958_vm0, %v9577_v27  ;;  %6843 = vtanh.f32 %v781_v61  ;;  %v9588_v27 = vld [vmem:[#allocation34_spill] sm:$0xff]  ;;  %v9594_v52 = vld [vmem:[#allocation45_spill] sm:$0xff] }
 0x10b   : > { %v9596_v61 = vld [vmem:[#allocation46_spill] sm:$0xff] }
 0x10c   : > { %5775 = vmatmul.mubr.msk.f32.gmra.mrb[26].mxu1 %vm958_vm0, %v8368_v56 }
 0x10d   : > { %5975 = vmatmul.mubr.msk.f32.gmra.mrb[10].mxu0 %vm958_vm0, %v9578_v33  ;;  %5777 = vmatprep.mubr.msk.f32.mxu1 %vm958_vm0, %v8372_v5  ;;  %v9590_v33 = vld [vmem:[#allocation37_spill] sm:$0xff] }
 0x10e   : > { %5977 = vmatprep.mubr.msk.f32.mxu0 %vm958_vm0, %v9579_v62  ;;  %v9591_v62 = vld [vmem:[#allocation36_spill] sm:$0xff] }
 0x110   : > { %5778 = vmatmul.mubr.msk.f32.gmra.mrb[28].mxu1 %vm958_vm0, %v8385_v17 }
 0x111   : > { %5978 = vmatmul.mubr.msk.f32.gmra.mrb[12].mxu0 %vm958_vm0, %v9580_v31  ;;  %5780 = vmatprep.mubr.msk.f32.mxu1 %vm958_vm0, %v8389_v42 }
 0x112   : > { %5980 = vmatprep.mubr.msk.f32.mxu0 %vm958_vm0, %v9571_v32 }
 0x114   : > { %5781 = vmatmul.mubr.msk.f32.gmra.mrb[30].mxu1 %vm958_vm0, %v8402_v45 }
 0x115   : > { %5981 = vmatmul.mubr.msk.f32.gmra.mrb[14].mxu0 %vm958_vm0, %v7579_v51  ;;  %5815 = vmatprep.mubr.msk.f32.mxu1 %vm958_vm0, %v9571_v32  ;;  %v782_v32 = vmul.f32 0.7978846, %v728_v40  ;;  %v9595_v40 = vld [vmem:[#allocation43_spill] sm:$0xff] }
 0x116   : > { %5983 = vmatprep.mubr.msk.f32.mxu0 %vm958_vm0, %v9572_v50 }
 0x117   : > { %6845 = vtanh.f32 %v782_v32 }
 0x118   : > { %5816 = vmatmul.mubr.msk.f32.vlgmr.msra.gmra.mrb[16].mxu1 %vm958_vm0, %v7579_v51  ;;  %v6844_v51 = vpop.eup %6843 }
 0x119   : > { %5984 = vmatmul.mubr.msk.f32.gmra.mrb[16].mxu0 %vm958_vm0, %v7613_v29  ;;  %5818 = vmatprep.mubr.msk.f32.mxu1 %vm958_vm0, %v9572_v50  ;;  %v5116_v50 = vld [vmem:[%s9397_s1 + $0x118] sm:$0xff] }
 0x11a   : > { %5986 = vmatprep.mubr.msk.f32.mxu0 %vm958_vm0, %v9573_v10 }
 0x11c   : > { %5819 = vmatmul.mubr.msk.f32.gmra.mrb[18].mxu1 %vm958_vm0, %v7613_v29 }
 0x11d   : > { %5987 = vmatmul.mubr.msk.f32.gmra.mrb[18].mxu0 %vm958_vm0, %v7673_v47  ;;  %5821 = vmatprep.mubr.msk.f32.mxu1 %vm958_vm0, %v9573_v10 }
 0x11e   : > { %5989 = vmatprep.mubr.msk.f32.mxu0 %vm958_vm0, %v7697_v21 }
 0x120   : > { %5822 = vmatmul.mubr.msk.f32.gmra.mrb[20].mxu1 %vm958_vm0, %v7673_v47  ;;  %v511_v47 = vmul.f32 0.5, %v328_v20  ;;  %v9586_v20 = vld [vmem:[#allocation30_spill] sm:$0xff] }
 0x121   : > { %5990 = vmatmul.mubr.msk.f32.gmra.mrb[20].mxu0 %vm958_vm0, %v9574_v24  ;;  %5824 = vmatprep.mubr.msk.f32.mxu1 %vm958_vm0, %v7697_v21  ;;  %v6846_v29 = vpop.eup %6845  ;;  %v889_v21 = vadd.f32 1.0, %v6844_v51  ;;  %v9597_v51 = vld [vmem:[#allocation44_spill] sm:$0xff] }
 0x122   : > { %5992 = vmatprep.mubr.msk.f32.mxu0 %vm958_vm0, %v7751_v25 }
 0x124   : > { %5825 = vmatmul.mubr.msk.f32.gmra.mrb[22].mxu1 %vm958_vm0, %v9574_v24  ;;  %v9582_v24 = vld [vmem:[#allocation23_spill] sm:$0xff] }
 0x125   : > { %5993 = vmatmul.mubr.msk.f32.gmra.mrb[22].mxu0 %vm958_vm0, %v7767_v43  ;;  %5827 = vmatprep.mubr.msk.f32.mxu1 %vm958_vm0, %v7751_v25  ;;  %v512_v25 = vmul.f32 0.5, %v329_v53  ;;  %v330_v53 = vld [vmem:[%s7166_s13 + $0x1a8] sm:$0x3] }
 0x126   : > { %5995 = vmatprep.mubr.msk.f32.mxu0 %vm958_vm0, %v7803_v18 }
 0x128   : > { %5828 = vmatmul.mubr.msk.f32.gmra.mrb[24].mxu1 %vm958_vm0, %v7767_v43  ;;  %v890_v43 = vadd.f32 1.0, %v6846_v29  ;;  %v9598_v29 = vld [vmem:[#allocation47_spill] sm:$0xff] }
 0x129   : > { %5996 = vmatmul.mubr.msk.f32.gmra.mrb[24].mxu0 %vm958_vm0, %v7826_v13  ;;  %5830 = vmatprep.mubr.msk.f32.mxu1 %vm958_vm0, %v7803_v18  ;;  %v8557_v18 = vmul.f32 %v889_v21, %v511_v47  ;;  %v9599_v47 = vld [vmem:[#allocation48_spill] sm:$0xff]  ;;  %v9600_v21 = vld [vmem:[#allocation50_spill] sm:$0xff] }
 0x12a   : > { %5998 = vmatprep.mubr.msk.f32.mxu0 %vm958_vm0, %v7844_v7 }
 0x12c   : > { %5831 = vmatmul.mubr.msk.f32.gmra.mrb[26].mxu1 %vm958_vm0, %v7826_v13  ;;  %v8565_v13 = vmul.f32 %v890_v43, %v512_v25  ;;  %v9601_v25 = vld [vmem:[#allocation49_spill] sm:$0xff]  ;;  %v9602_v43 = vld [vmem:[#allocation52_spill] sm:$0xff] }
 0x12d   : > { %5999 = vmatmul.mubr.msk.f32.gmra.mrb[26].mxu0 %vm958_vm0, %v9576_v34  ;;  %5833 = vmatprep.mubr.msk.f32.mxu1 %vm958_vm0, %v7844_v7  ;;  %v5115_v7 = vld [vmem:[%s9397_s1 + $0x110] sm:$0xff] }
 0x12e   : > { %6001 = vmatprep.mubr.msk.f32.mxu0 %vm958_vm0, %v8089_v54  ;;  %v6295_v10 = vpack.c.bf16 %v5116_v50, %v5115_v7  ;;  %v9603_v7 = vld [vmem:[#allocation51_spill] sm:$0xff] }
 0x130   : > { %5834 = vmatmul.mubr.msk.f32.gmra.mrb[28].mxu1 %vm958_vm0, %v9576_v34  ;;  %v9584_v34 = vld [vmem:[#allocation27_spill] sm:$0xff] }
 0x131   : > { %6002 = vmatmul.mubr.msk.f32.gmra.mrb[28].mxu0 %vm958_vm0, %v8093_v41  ;;  %5836 = vmatprep.mubr.msk.f32.mxu1 %vm958_vm0, %v8089_v54  ;;  %v9581_v54 = vld [vmem:[#allocation19_spill] sm:$0xff] }
 0x132   : > { %6004 = vmatprep.mubr.msk.f32.mxu0 %vm958_vm0, %v8557_v18 }
 0x134   : > { %5837 = vmatmul.mubr.msk.f32.gmra.mrb[30].mxu1 %vm958_vm0, %v8093_v41  ;;  %v9583_v41 = vld [vmem:[#allocation21_spill] sm:$0xff] }
 0x135   : > { %6005 = vmatmul.mubr.msk.f32.gmra.mrb[30].mxu0 %vm958_vm0, %v8565_v13 }
 0x136   : > { %6015 = vmatprep.mubr.msk.f32.mxu0 %vm958_vm0, %v9581_v54  ;;  %v9604_v54 = vld [vmem:[#allocation53_spill] sm:$0xff] }
 0x139   : > { %6016 = vmatmul.mubr.msk.f32.vlgmr.msra.gmra.mrb[0].mxu0 %vm958_vm0, %v9582_v24  ;;  %v513_v24 = vmul.f32 0.5, %v330_v53 }
 0x13a   : > { %6294 = vmatpush3.bf16.msra.mxu0 %v8448_v23  ;;  %6018 = vmatprep.mubr.msk.f32.mxu0 %vm958_vm0, %v9583_v41  ;;  %v567_v23 = vmul.f32 0.044715, %v330_v53 }
 0x13b   : > { %6296 = vmatprep.subr.bf16.mxu0 %v6295_v10 }
 0x13c   : > { %v621_v1 = vmul.f32 %v567_v23, %v330_v53  ;;  %v9608_v23 = vld [vmem:[#allocation57_spill] sm:$0xff] }
 0x13d   : > { %6019 = vmatmul.mubr.msk.f32.gmra.mrb[2].mxu0 %vm958_vm0, %v9584_v34  ;;  %v9606_v34 = vld [vmem:[#allocation55_spill] sm:$0xff] }
 0x13e   : > { %6021 = vmatprep.mubr.msk.f32.mxu0 %vm958_vm0, %v9585_v2  ;;  %6298 = vmatpush3.bf16.msra.mxu0 %v6295_v10  ;;  %v675_v31 = vmul.f32 %v621_v1, %v330_v53  ;;  %v9605_v10 = vld [vmem:[#allocation54_spill] sm:$0xff] }
 0x140   : > { %v729_v15 = vadd.f32 %v675_v31, %v330_v53 }
 0x141   : > { %6022 = vmatmul.mubr.msk.f32.gmra.mrb[4].mxu0 %vm958_vm0, %v9586_v20  ;;  %v3221_v20 = vrot.slane %v8557_v18, 1 }
 0x142   : > { %6024 = vmatprep.mubr.msk.f32.mxu0 %vm958_vm0, %v9587_v19  ;;  %v783_v32 = vmul.f32 0.7978846, %v729_v15  ;;  %v3222_v19 = vrot.slane %v8565_v13, 1 }
 0x144   : > { %6847 = vtanh.f32 %v783_v32  ;;  %v3223_v53 = vsel %vm379_vm1, %v3221_v20, %v3222_v19 }
 0x145   : > { %6025 = vmatmul.mubr.msk.f32.gmra.mrb[6].mxu0 %vm958_vm0, %v9588_v27  ;;  %v9607_v27 = vld [vmem:[#allocation56_spill] sm:$0xff] }
 0x146   : > { %6027 = vmatprep.mubr.msk.f32.mxu0 %vm958_vm0, %v9589_v4 }
 0x149   : > { %6028 = vmatmul.mubr.msk.f32.gmra.mrb[8].mxu0 %vm958_vm0, %v9590_v33  ;;  %v9609_v33 = vld [vmem:[#allocation58_spill] sm:$0xff] }
 0x14a   : > { %6030 = vmatprep.mubr.msk.f32.mxu0 %vm958_vm0, %v9591_v62 }
 0x14d   : > { %6031 = vmatmul.mubr.msk.f32.gmra.mrb[10].mxu0 %vm958_vm0, %v9592_v6 }
 0x14e   : > { %6033 = vmatprep.mubr.msk.f32.mxu0 %vm958_vm0, %v9593_v0  ;;  %v6848_v50 = vpop.eup %6847 }
 0x14f   : > { %v891_v41 = vadd.f32 1.0, %v6848_v50 }
 0x151   : > { %6034 = vmatmul.mubr.msk.f32.gmra.mrb[12].mxu0 %vm958_vm0, %v9594_v52  ;;  %v945_v2 = vmul.f32 %v891_v41, %v513_v24 }
 0x152   : > { %6036 = vmatprep.mubr.msk.f32.mxu0 %vm958_vm0, %v9595_v40 }
 0x153   : > { %v3224_v4 = vrot.slane %v945_v2, 1 }
 0x155   : > { %6037 = vmatmul.mubr.msk.f32.gmra.mrb[14].mxu0 %vm958_vm0, %v9596_v61 }
 0x156   : > { %6039 = vmatprep.mubr.msk.f32.mxu0 %vm958_vm0, %v9597_v51 }
 0x159   : > { %6040 = vmatmul.mubr.msk.f32.gmra.mrb[16].mxu0 %vm958_vm0, %v9598_v29  ;;  %v8743_v29 = vld [vmem:[%s9398_s2] ss:$0 sm:$0xff] }
 0x15a   : > { %6042 = vmatprep.mubr.msk.f32.mxu0 %vm958_vm0, %v9599_v47 }
 0x15d   : > { %6043 = vmatmul.mubr.msk.f32.gmra.mrb[18].mxu0 %vm958_vm0, %v9600_v21 }
 0x15e   : > { %6045 = vmatprep.mubr.msk.f32.mxu0 %vm958_vm0, %v9601_v25 }
 0x161   : > { %6046 = vmatmul.mubr.msk.f32.gmra.mrb[20].mxu0 %vm958_vm0, %v9602_v43 }
 0x162   : > { %6048 = vmatprep.mubr.msk.f32.mxu0 %vm958_vm0, %v9603_v7 }
 0x165   : > { %6049 = vmatmul.mubr.msk.f32.gmra.mrb[22].mxu0 %vm958_vm0, %v9604_v54 }
 0x166   : > { %6051 = vmatprep.mubr.msk.f32.mxu0 %vm958_vm0, %v9605_v10 }
 0x169   : > { %6052 = vmatmul.mubr.msk.f32.gmra.mrb[24].mxu0 %vm958_vm0, %v9606_v34 }
 0x16a   : > { %6054 = vmatprep.mubr.msk.f32.mxu0 %vm958_vm0, %v8087_v60  ;;  %v3225_v60 = vsel %vm379_vm1, %v3222_v19, %v3224_v4 }
 0x16d   : > { %6055 = vmatmul.mubr.msk.f32.gmra.mrb[26].mxu0 %vm958_vm0, %v9607_v27 }
 0x16e   : > { %6057 = vmatprep.mubr.msk.f32.mxu0 %vm958_vm0, %v9608_v23 }
 0x171   : > { %6058 = vmatmul.mubr.msk.f32.gmra.mrb[28].mxu0 %vm958_vm0, %v9609_v33 }
 0x172   : > { %6060 = vmatprep.mubr.msk.f32.mxu0 %vm958_vm0, %v3223_v53 }
 0x175   : > { %6061 = vmatmul.mubr.msk.f32.gmra.mrb[30].mxu0 %vm958_vm0, %v3225_v60 }
 0x176   : > { %6071 = vmatprep.mubr.msk.f32.mxu0 %vm958_vm0, %v8152_v44  ;;  %v4051_v44 = vld [vmem:[%s9399_s3] sm:$0xff] }
 0x179   : > { %6072 = vmatmul.mubr.msk.f32.vlgmr.msra.gmra.mrb[0].mxu0 %vm958_vm0, %v8172_v9  ;;  %v4052_v9 = vld [vmem:[%s9399_s3 + $0x8] sm:$0xff] }
 0x17a   : > { %6074 = vmatprep.mubr.msk.f32.mxu0 %vm958_vm0, %v8176_v49  ;;  %v6299_v49 = vpack.c.bf16 %v4052_v9, %v4051_v44 }
 0x17c   : > { %6300 = vmatprep.subr.bf16.mxu1 %v6299_v49 }
 0x17d   : > { %6075 = vmatmul.mubr.msk.f32.gmra.mrb[2].mxu0 %vm958_vm0, %v8191_v26  ;;  %6302 = vmatpush3.bf16.msra.mxu1 %v6299_v49  ;;  %v3492_v26 = vrot.slane %v8557_v18, 2 }
 0x17e   : > { %6077 = vmatprep.mubr.msk.f32.mxu0 %vm958_vm0, %v8195_v46  ;;  %v3493_v46 = vrot.slane %v8565_v13, 2 }
 0x181   : > { %6078 = vmatmul.mubr.msk.f32.gmra.mrb[4].mxu0 %vm958_vm0, %v8209_v48 }
 0x182   : > { %6080 = vmatprep.mubr.msk.f32.mxu0 %vm958_vm0, %v8213_v28  ;;  %v3495_v28 = vrot.slane %v945_v2, 2 }
 0x185   : > { %6081 = vmatmul.mubr.msk.f32.gmra.mrb[6].mxu0 %vm958_vm0, %v8226_v22 }
 0x186   : > { %6083 = vmatprep.mubr.msk.f32.mxu0 %vm958_vm0, %v8230_v35  ;;  %v3494_v35 = vsel %vm1734_vm2, %v3492_v26, %v3493_v46 }
 0x189   : > { %6084 = vmatmul.mubr.msk.f32.gmra.mrb[8].mxu0 %vm958_vm0, %v8243_v16 }
 0x18a   : > { %6086 = vmatprep.mubr.msk.f32.mxu0 %vm958_vm0, %v8247_v8  ;;  %v3496_v8 = vsel %vm1734_vm2, %v3493_v46, %v3495_v28 }
 0x18d   : > { %6087 = vmatmul.mubr.msk.f32.gmra.mrb[10].mxu0 %vm958_vm0, %v8260_v36 }
 0x18e   : > { %6089 = vmatprep.mubr.msk.f32.mxu0 %vm958_vm0, %v8266_v58 }
 0x191   : > { %6090 = vmatmul.mubr.msk.f32.gmra.mrb[12].mxu0 %vm958_vm0, %v8280_v63 }
 0x192   : > { %6092 = vmatprep.mubr.msk.f32.mxu0 %vm958_vm0, %v8285_v55 }
 0x195   : > { %6093 = vmatmul.mubr.msk.f32.gmra.mrb[14].mxu0 %vm958_vm0, %v8298_v14 }
 0x196   : > { %6095 = vmatprep.mubr.msk.f32.mxu0 %vm958_vm0, %v8302_v39 }
 0x199   : > { %6096 = vmatmul.mubr.msk.f32.gmra.mrb[16].mxu0 %vm958_vm0, %v8314_v11 }
 0x19a   : > { %6098 = vmatprep.mubr.msk.f32.mxu0 %vm958_vm0, %v8319_v12 }
 0x19d   : > { %6099 = vmatmul.mubr.msk.f32.gmra.mrb[18].mxu0 %vm958_vm0, %v8333_v3 }
 0x19e   : > { %6101 = vmatprep.mubr.msk.f32.mxu0 %vm958_vm0, %v8338_v59 }
 0x1a1   : > { %6102 = vmatmul.mubr.msk.f32.gmra.mrb[20].mxu0 %vm958_vm0, %v8351_v57 }
 0x1a2   : > { %6104 = vmatprep.mubr.msk.f32.mxu0 %vm958_vm0, %v8355_v37 }
 0x1a5   : > { %6105 = vmatmul.mubr.msk.f32.gmra.mrb[22].mxu0 %vm958_vm0, %v8368_v56 }
 0x1a6   : > { %6107 = vmatprep.mubr.msk.f32.mxu0 %vm958_vm0, %v8372_v5 }
 0x1a9   : > { %6108 = vmatmul.mubr.msk.f32.gmra.mrb[24].mxu0 %vm958_vm0, %v8385_v17 }
 0x1aa   : > { %6110 = vmatprep.mubr.msk.f32.mxu0 %vm958_vm0, %v8389_v42 }
 0x1ab   : > { %v5737_v58 = vpop.f32.mrb[0].mxu1 }
 0x1ac   : > { %v1950_v48 = vpop.f32.mrb[1].mxu1  ;;  %v6315_v47 = vadd.f32 %v5737_v58, %v8743_v29 }
 0x1ad   : > { %6111 = vmatmul.mubr.msk.f32.gmra.mrb[26].mxu0 %vm958_vm0, %v8402_v45  ;;  %v6317_v21 = vadd.f32 %v8743_v29, %v1950_v48 }
 0x1ae   : > { %6113 = vmatprep.mubr.msk.f32.mxu0 %vm958_vm0, %v8406_v38  ;;  %v4382_v38 = vld [vmem:[%s9401_s5] sm:$0xff] }
 0x1af   : > { %v5740_v22 = vpop.f32.mrb[2].mxu1 }
 0x1b0   : > { %v1960_v16 = vpop.f32.mrb[3].mxu1  ;;  %v6319_v43 = vadd.f32 %v5740_v22, %v8743_v29 }
 0x1b1   : > { %6114 = vmatmul.mubr.msk.f32.gmra.mrb[28].mxu0 %vm958_vm0, %v8417_v30  ;;  %v4383_v30 = vld [vmem:[%s9401_s5 + $0x8] sm:$0xff]  ;;  %v6321_v7 = vadd.f32 %v8743_v29, %v1960_v16 }
 0x1b2   : > { %6116 = vmatprep.mubr.msk.f32.mxu0 %vm958_vm0, %v3494_v35  ;;  %v8725_v13 = vpack.c.bf16 %v4383_v30, %v4382_v38 }
 0x1b3   : > { %v5743_v36 = vpop.f32.mrb[4].mxu1 }
 0x1b4   : > { %v1970_v63 = vpop.f32.mrb[5].mxu1  ;;  %6304 = vmatprep.subr.bf16.mxu1 %v8725_v13  ;;  %v6323_v50 = vadd.f32 %v5743_v36, %v8743_v29 }
 0x1b5   : > { %6117 = vmatmul.mubr.msk.f32.gmra.mrb[30].mxu0 %vm958_vm0, %v3496_v8  ;;  %v6325_v24 = vadd.f32 %v8743_v29, %v1970_v63 }
 0x1b7   : > { %v5746_v55 = vpop.f32.mrb[6].mxu1 }
 0x1b8   : > { %v1980_v14 = vpop.f32.mrb[7].mxu1  ;;  %v6327_v41 = vadd.f32 %v5746_v55, %v8743_v29 }
 0x1b9   : > { %v6329_v34 = vadd.f32 %v8743_v29, %v1980_v14 }
 0x1bb   : > { %v5749_v39 = vpop.f32.mrb[8].mxu1 }
 0x1bc   : > { %v1990_v11 = vpop.f32.mrb[9].mxu1  ;;  %v8758_v20 = vadd.f32 %v5749_v39, %v8743_v29 }
 0x1bd   : > { %v8761_v19 = vadd.f32 %v8743_v29, %v1990_v11 }
 0x1bf   : > { %v5752_v12 = vpop.f32.mrb[10].mxu1 }
 0x1c0   : > { %v2000_v3 = vpop.f32.mrb[11].mxu1  ;;  %v8764_v27 = vadd.f32 %v5752_v12, %v8743_v29 }
 0x1c1   : > { %v8768_v4 = vadd.f32 %v8743_v29, %v2000_v3 }
 0x1c3   : > { %v5755_v59 = vpop.f32.mrb[12].mxu1 }
 0x1c4   : > { %v2010_v57 = vpop.f32.mrb[13].mxu1  ;;  %v8771_v53 = vadd.f32 %v5755_v59, %v8743_v29 }
 0x1c5   : > { %v8774_v33 = vadd.f32 %v8743_v29, %v2010_v57 }
 0x1c7   : > { %v5758_v37 = vpop.f32.mrb[14].mxu1 }
 0x1c8   : > { %v2020_v56 = vpop.f32.mrb[15].mxu1  ;;  %v8778_v9 = vadd.f32 %v5758_v37, %v8743_v29 }
 0x1c9   : > { %v8781_v49 = vadd.f32 %v8743_v29, %v2020_v56 }
 0x1eb   : > { %v5817_v5 = vpop.f32.mrb[16].mxu1 }
 0x1ec   : > { %v2298_v17 = vpop.f32.mrb[17].mxu1  ;;  %v8787_v48 = vadd.f32 %v5817_v5, %v8743_v29 }
 0x1ed   : > { %v8790_v28 = vadd.f32 %v8743_v29, %v2298_v17 }
 0x1ef   : > { %v5820_v42 = vpop.f32.mrb[18].mxu1 }
 0x1f0   : > { %v2308_v45 = vpop.f32.mrb[19].mxu1  ;;  %v8796_v16 = vadd.f32 %v5820_v42, %v8743_v29 }
 0x1f1   : > { %v8799_v8 = vadd.f32 %v8743_v29, %v2308_v45 }
 0x1f3   : > { %v5823_v18 = vpop.f32.mrb[20].mxu1 }
 0x1f4   : > { %v2318_v1 = vpop.f32.mrb[21].mxu1  ;;  %v8804_v55 = vadd.f32 %v5823_v18, %v8743_v29 }
 0x1f5   : > { %v8807_v14 = vadd.f32 %v8743_v29, %v2318_v1 }
 0x1f7   : > { %v5826_v62 = vpop.f32.mrb[22].mxu1 }
 0x1f8   : > { %v2328_v6 = vpop.f32.mrb[23].mxu1  ;;  %v8812_v3 = vadd.f32 %v5826_v62, %v8743_v29 }
 0x1f9   : > { %v8819_v5 = vadd.f32 %v8743_v29, %v2328_v6 }
 0x1fb   : > { %v5829_v31 = vpop.f32.mrb[24].mxu1 }
 0x1fc   : > { %v2338_v0 = vpop.f32.mrb[25].mxu1  ;;  %v8826_v38 = vadd.f32 %v5829_v31, %v8743_v29 }
 0x1fd   : > { %v8831_v62 = vadd.f32 %v8743_v29, %v2338_v0 }
 0x1ff   : > { %v8728_v52 = vpop.f32.mrb[26].mxu1 }
 0x200   : > { %v8730_v15 = vpop.f32.mrb[27].mxu1 }
 0x203   : > { %v8732_v40 = vpop.f32.mrb[28].mxu1 }
 0x204   : > { %v8734_v61 = vpop.f32.mrb[29].mxu1 }
 0x207   : > { %v8736_v32 = vpop.f32.mrb[30].mxu1 }
 0x208   : > { %v8738_v51 = vpop.f32.mrb[31].mxu1 }
 0x24c   : > { %v6073_v25 = vpop.f32.mrb[0].mxu0 }
 0x24d   : > { %v8750_v54 = vadd.f32 %v6315_v47, %v6073_v25  ;;  %v3572_v10 = vpop.f32.mrb[1].mxu0 }
 0x24e   : > { %v8755_v2 = vadd.f32 %v6317_v21, %v3572_v10 }
 0x24f   : > { %v3796_v23 = vmul.f32 0.044715, %v8750_v54 }
 0x250   : > { %v3795_v60 = vmul.f32 0.044715, %v8755_v2  ;;  %v6076_v44 = vpop.f32.mrb[2].mxu0 }
 0x251   : > { %v3828_v58 = vmul.f32 %v8750_v54, %v3796_v23  ;;  %v8784_v26 = vadd.f32 %v6319_v43, %v6076_v44  ;;  %v3582_v46 = vpop.f32.mrb[3].mxu0  ;;  %v8845_v23 = vadd.f32 %v8728_v52, %v8743_v29 }
 0x252   : > { %v3827_v22 = vmul.f32 %v8755_v2, %v3795_v60  ;;  %v8793_v35 = vadd.f32 %v6321_v7, %v3582_v46 }
 0x253   : > { %v3860_v36 = vmul.f32 %v8750_v54, %v3828_v58  ;;  %v3798_v63 = vmul.f32 0.044715, %v8784_v26 }
 0x254   : > { %v3859_v39 = vmul.f32 %v8755_v2, %v3827_v22  ;;  %v3797_v11 = vmul.f32 0.044715, %v8793_v35  ;;  %v6079_v12 = vpop.f32.mrb[4].mxu0 }
 0x255   : > { %v3892_v59 = vadd.f32 %v8750_v54, %v3860_v36  ;;  %v3830_v57 = vmul.f32 %v8784_v26, %v3798_v63  ;;  %v8816_v37 = vadd.f32 %v6323_v50, %v6079_v12  ;;  %v3592_v56 = vpop.f32.mrb[5].mxu0 }
 0x256   : > { %v3891_v17 = vadd.f32 %v8755_v2, %v3859_v39  ;;  %v3829_v42 = vmul.f32 %v8793_v35, %v3797_v11  ;;  %v8823_v45 = vadd.f32 %v6325_v24, %v3592_v56 }
 0x257   : > { %v3924_v30 = vmul.f32 0.7978846, %v3892_v59  ;;  %v3862_v18 = vmul.f32 %v8784_v26, %v3830_v57  ;;  %v3800_v1 = vmul.f32 0.044715, %v8816_v37  ;;  %v8867_v57 = vadd.f32 %v8732_v40, %v8743_v29 }
 0x258   : > { %v3861_v6 = vmul.f32 %v8793_v35, %v3829_v42  ;;  %v3799_v47 = vmul.f32 0.044715, %v8823_v45  ;;  %v6082_v21 = vpop.f32.mrb[6].mxu0  ;;  %v3923_v25 = vmul.f32 0.7978846, %v3891_v17  ;;  %v4384_v42 = vld [vmem:[%s9401_s5 + $0x10] sm:$0xff] }
 0x259   : > { %6849 = vtanh.f32 %v3924_v30  ;;  %v3894_v43 = vadd.f32 %v8784_v26, %v3862_v18  ;;  %v3832_v31 = vmul.f32 %v8816_v37, %v3800_v1  ;;  %v8837_v7 = vadd.f32 %v6327_v41, %v6082_v21  ;;  %v3602_v50 = vpop.f32.mrb[7].mxu0 }
 0x25a   : > { %v3893_v10 = vadd.f32 %v8793_v35, %v3861_v6  ;;  %v3831_v24 = vmul.f32 %v8823_v45, %v3799_v47  ;;  %v8841_v0 = vadd.f32 %v6329_v34, %v3602_v50  ;;  %6851 = vtanh.f32 %v3923_v25  ;;  %v4385_v6 = vld [vmem:[%s9401_s5 + $0x18] sm:$0xff] }
 0x25b   : > { %v3864_v60 = vmul.f32 %v8816_v37, %v3832_v31  ;;  %v3802_v44 = vmul.f32 0.044715, %v8837_v7  ;;  %v3926_v58 = vmul.f32 0.7978846, %v3894_v43  ;;  %v8851_v41 = vadd.f32 %v8743_v29, %v8730_v15 }
 0x25c   : > { %v3863_v46 = vmul.f32 %v8823_v45, %v3831_v24  ;;  %v3801_v22 = vmul.f32 0.044715, %v8841_v0  ;;  %v6085_v34 = vpop.f32.mrb[8].mxu0  ;;  %v3925_v36 = vmul.f32 0.7978846, %v3893_v10  ;;  %v8876_v30 = vadd.f32 %v8743_v29, %v8734_v61 }
 0x25d   : > { %v3896_v63 = vadd.f32 %v8816_v37, %v3864_v60  ;;  %v3834_v52 = vmul.f32 %v8837_v7, %v3802_v44  ;;  %v8858_v39 = vadd.f32 %v8758_v20, %v6085_v34  ;;  %v3612_v11 = vpop.f32.mrb[9].mxu0  ;;  %6853 = vtanh.f32 %v3926_v58 }
 0x25e   : > { %v3895_v12 = vadd.f32 %v8823_v45, %v3863_v46  ;;  %v3833_v15 = vmul.f32 %v8841_v0, %v3801_v22  ;;  %v8863_v59 = vadd.f32 %v8761_v19, %v3612_v11  ;;  %6855 = vtanh.f32 %v3925_v36 }
 0x25f   : > { %v3866_v56 = vmul.f32 %v8837_v7, %v3834_v52  ;;  %v3804_v20 = vmul.f32 0.044715, %v8858_v39  ;;  %v3928_v17 = vmul.f32 0.7978846, %v3896_v63  ;;  %v8895_v58 = vpack.c.bf16 %v4385_v6, %v4384_v42 }
 0x260   : > { %v3865_v19 = vmul.f32 %v8841_v0, %v3833_v15  ;;  %v3803_v18 = vmul.f32 0.044715, %v8863_v59  ;;  %v6088_v1 = vpop.f32.mrb[10].mxu0  ;;  %v3927_v40 = vmul.f32 0.7978846, %v3895_v12  ;;  %v3763_v12 = vmul.f32 0.5, %v8755_v2 }
 0x261   : > { %v3898_v47 = vadd.f32 %v8837_v7, %v3866_v56  ;;  %v3836_v21 = vmul.f32 %v8858_v39, %v3804_v20  ;;  %v8886_v25 = vadd.f32 %v8764_v27, %v6088_v1  ;;  %v3622_v43 = vpop.f32.mrb[11].mxu0  ;;  %6857 = vtanh.f32 %v3928_v17 }
 0x262   : > { %v3897_v61 = vadd.f32 %v8841_v0, %v3865_v19  ;;  %v3835_v31 = vmul.f32 %v8863_v59, %v3803_v18  ;;  %v8891_v50 = vadd.f32 %v8768_v4, %v3622_v43  ;;  %6859 = vtanh.f32 %v3927_v40 }
 0x263   : > { %v6850_v10 = vpop.eup %6849  ;;  %v3868_v24 = vmul.f32 %v8858_v39, %v3836_v21  ;;  %v3806_v60 = vmul.f32 0.044715, %v8886_v25  ;;  %v3930_v44 = vmul.f32 0.7978846, %v3898_v47  ;;  %v3764_v4 = vmul.f32 0.5, %v8750_v54 }
 0x264   : > { %v6852_v27 = vpop.eup %6851  ;;  %v3988_v46 = vadd.f32 1.0, %v6850_v10  ;;  %v3867_v22 = vmul.f32 %v8863_v59, %v3835_v31  ;;  %v3805_v34 = vmul.f32 0.044715, %v8891_v50  ;;  %v6091_v36 = vpop.f32.mrb[12].mxu0  ;;  %v3929_v63 = vmul.f32 0.7978846, %v3897_v61 }
 0x265   : > { %v8901_v52 = vadd.f32 %v8771_v53, %v6091_v36  ;;  %v3632_v11 = vpop.f32.mrb[13].mxu0  ;;  %v3987_v15 = vadd.f32 1.0, %v6852_v27  ;;  %v3900_v56 = vadd.f32 %v8858_v39, %v3868_v24  ;;  %v3838_v20 = vmul.f32 %v8886_v25, %v3806_v60 }
 0x266   : > { %v3837_v17 = vmul.f32 %v8891_v50, %v3805_v34  ;;  %v8908_v42 = vadd.f32 %v8774_v33, %v3632_v11  ;;  %v3899_v18 = vadd.f32 %v8863_v59, %v3867_v22  ;;  %6861 = vtanh.f32 %v3929_v63 }
 0x267   : > { %v6854_v19 = vpop.eup %6853  ;;  %v3808_v54 = vmul.f32 0.044715, %v8901_v52  ;;  %v4019_v53 = vmul.f32 %v3987_v15, %v3763_v12  ;;  %v4020_v40 = vmul.f32 %v3988_v46, %v3764_v4  ;;  %6863 = vtanh.f32 %v3930_v44 }
 0x268   : > { %v6856_v1 = vpop.eup %6855  ;;  %v3807_v2 = vmul.f32 0.044715, %v8908_v42  ;;  %v6094_v6 = vpop.f32.mrb[14].mxu0  ;;  %v3990_v47 = vadd.f32 1.0, %v6854_v19  ;;  %v3869_v21 = vmul.f32 %v8891_v50, %v3837_v17  ;;  %v3765_v61 = vmul.f32 0.5, %v8793_v35 }
 0x269   : > { %v8915_v43 = vadd.f32 %v8778_v9, %v6094_v6  ;;  %v3642_v33 = vpop.f32.mrb[15].mxu0  ;;  %6123 = vmatprep.mubr.msk.f32.mxu1 %vm4060_vm3, %v4019_v53  ;;  %v3989_v31 = vadd.f32 1.0, %v6856_v1  ;;  %v3870_v10 = vmul.f32 %v8886_v25, %v3838_v20  ;;  %v3840_v24 = vmul.f32 %v8901_v52, %v3808_v54 }
 0x26a   : > { %v8922_v60 = vadd.f32 %v8781_v49, %v3642_v33  ;;  %6124 = vmatmul.mubr.msk.f32.vlgmr.msra.gmra.mrb[32].mxu1 %vm4060_vm3, %v4020_v40  ;;  %v3766_v44 = vmul.f32 0.5, %v8784_v26  ;;  %v8928_v9 = vadd.f32 %v8736_v32, %v8743_v29  ;;  %v3839_v46 = vmul.f32 %v8908_v42, %v3807_v2 }
 0x26b   : > { %v6858_v27 = vpop.eup %6857  ;;  %6306 = vmatpush3.bf16.msra.mxu1 %v8725_v13  ;;  %v4021_v35 = vmul.f32 %v3989_v31, %v3765_v61  ;;  %v3931_v22 = vmul.f32 0.7978846, %v3899_v18  ;;  %v3768_v49 = vmul.f32 0.5, %v8816_v37  ;;  %v3932_v11 = vmul.f32 0.7978846, %v3900_v56 }
 0x26c   : > { %v6860_v34 = vpop.eup %6859  ;;  %v6097_v36 = vpop.f32.mrb[16].mxu0  ;;  %v4022_v63 = vmul.f32 %v3990_v47, %v3766_v44  ;;  %v3992_v4 = vadd.f32 1.0, %v6858_v27  ;;  %6308 = vmatprep.subr.bf16.mxu1 %v8895_v58  ;;  %v3901_v26 = vadd.f32 %v8891_v50, %v3869_v21  ;;  %v3767_v13 = vmul.f32 0.5, %v8823_v45 }
 0x26d   : > { %v8936_v32 = vadd.f32 %v8787_v48, %v6097_v36  ;;  %v3652_v12 = vpop.f32.mrb[17].mxu0  ;;  %6126 = vmatprep.mubr.msk.f32.mxu1 %vm4060_vm3, %v4021_v35  ;;  %v3991_v15 = vadd.f32 1.0, %v6860_v34  ;;  %v3902_v20 = vadd.f32 %v8886_v25, %v3870_v10  ;;  %v3872_v17 = vmul.f32 %v8901_v52, %v3840_v24 }
 0x26e   : > { %v3809_v37 = vmul.f32 0.044715, %v8922_v60  ;;  %v8944_v56 = vadd.f32 %v8790_v28, %v3652_v12  ;;  %6127 = vmatmul.mubr.msk.f32.gmra.mrb[34].mxu1 %vm4060_vm3, %v4022_v63  ;;  %v3871_v48 = vmul.f32 %v8908_v42, %v3839_v46  ;;  %v3810_v19 = vmul.f32 0.044715, %v8915_v43 }
 0x26f   : > { %v4023_v18 = vmul.f32 %v3991_v15, %v3767_v13  ;;  %6865 = vtanh.f32 %v3931_v22  ;;  %6310 = vmatpush3.bf16.msra.mxu1 %v8895_v58  ;;  %v3812_v45 = vmul.f32 0.044715, %v8936_v32  ;;  %v4024_v1 = vmul.f32 %v3992_v4, %v3768_v49 }
 0x270   : > { %v3811_v54 = vmul.f32 0.044715, %v8944_v56  ;;  %v6100_v53 = vpop.f32.mrb[18].mxu0  ;;  %6867 = vtanh.f32 %v3932_v11  ;;  %v6862_v40 = vpop.eup %6861  ;;  %v3769_v6 = vmul.f32 0.5, %v8841_v0  ;;  %v3770_v47 = vmul.f32 0.5, %v8837_v7 }
 0x271   : > { %v8953_v28 = vadd.f32 %v8796_v16, %v6100_v53  ;;  %v3662_v2 = vpop.f32.mrb[19].mxu0  ;;  %6129 = vmatprep.mubr.msk.f32.mxu1 %vm4060_vm3, %v4023_v18  ;;  %v3933_v21 = vmul.f32 0.7978846, %v3901_v26  ;;  %v6864_v58 = vpop.eup %6863  ;;  %v3904_v33 = vadd.f32 %v8901_v52, %v3872_v17  ;;  %v3841_v61 = vmul.f32 %v8922_v60, %v3809_v37 }
 0x272   : > { %v8961_v31 = vadd.f32 %v8799_v8, %v3662_v2  ;;  %6130 = vmatmul.mubr.msk.f32.gmra.mrb[36].mxu1 %vm4060_vm3, %v4024_v1  ;;  %v3993_v16 = vadd.f32 1.0, %v6862_v40  ;;  %v3903_v10 = vadd.f32 %v8908_v42, %v3871_v48  ;;  %v3842_v24 = vmul.f32 %v8915_v43, %v3810_v19 }
 0x273   : > { %v3994_v44 = vadd.f32 1.0, %v6864_v58  ;;  %6869 = vtanh.f32 %v3933_v21  ;;  %v3844_v7 = vmul.f32 %v8936_v32, %v3812_v45  ;;  %v3843_v0 = vmul.f32 %v8944_v56, %v3811_v54 }
 0x274   : > { %v6103_v27 = vpop.f32.mrb[20].mxu0  ;;  %v4025_v46 = vmul.f32 %v3993_v16, %v3769_v6  ;;  %v3934_v35 = vmul.f32 0.7978846, %v3902_v20  ;;  %v8970_v8 = vadd.f32 %v8743_v29, %v8738_v51  ;;  %v3814_v22 = vmul.f32 0.044715, %v8953_v28 }
 0x275   : > { %v8974_v34 = vadd.f32 %v8804_v55, %v6103_v27  ;;  %v3672_v36 = vpop.f32.mrb[21].mxu0  ;;  %v4026_v63 = vmul.f32 %v3994_v44, %v3770_v47  ;;  %v3873_v49 = vmul.f32 %v8922_v60, %v3841_v61  ;;  %v3772_v11 = vmul.f32 0.5, %v8858_v39 }
 0x276   : > { %v8978_v4 = vadd.f32 %v8807_v14, %v3672_v36  ;;  %6132 = vmatprep.mubr.msk.f32.mxu1 %vm4060_vm3, %v4025_v46  ;;  %6871 = vtanh.f32 %v3934_v35  ;;  %v3813_v51 = vmul.f32 0.044715, %v8961_v31  ;;  %v3771_v29 = vmul.f32 0.5, %v8863_v59 }
 0x277   : > { %6133 = vmatmul.mubr.msk.f32.gmra.mrb[38].mxu1 %vm4060_vm3, %v4026_v63  ;;  %v3774_v55 = vmul.f32 0.5, %v8886_v25  ;;  %v3935_v26 = vmul.f32 0.7978846, %v3903_v10  ;;  %v3874_v12 = vmul.f32 %v8915_v43, %v3842_v24  ;;  %v3876_v13 = vmul.f32 %v8936_v32, %v3844_v7 }
 0x278   : > { %v3875_v14 = vmul.f32 %v8944_v56, %v3843_v0  ;;  %v6106_v15 = vpop.f32.mrb[22].mxu0  ;;  %v3936_v20 = vmul.f32 0.7978846, %v3904_v33  ;;  %v3846_v39 = vmul.f32 %v8953_v28, %v3814_v22  ;;  %v3816_v37 = vmul.f32 0.044715, %v8974_v34 }
 0x279   : > { %v6866_v17 = vpop.eup %6865  ;;  %v8992_v48 = vadd.f32 %v8812_v3, %v6106_v15  ;;  %v3682_v59 = vpop.f32.mrb[23].mxu0  ;;  %6873 = vtanh.f32 %v3935_v26  ;;  %v3905_v19 = vadd.f32 %v8922_v60, %v3873_v49  ;;  %v3773_v54 = vmul.f32 0.5, %v8891_v50 }
 0x27a   : > { %v6868_v25 = vpop.eup %6867  ;;  %v8996_v18 = vadd.f32 %v8819_v5, %v3682_v59  ;;  %v3995_v45 = vadd.f32 1.0, %v6866_v17  ;;  %v3845_v53 = vmul.f32 %v8961_v31, %v3813_v51  ;;  %v3815_v1 = vmul.f32 0.044715, %v8978_v4 }
 0x27b   : > { %v3996_v40 = vadd.f32 1.0, %v6868_v25  ;;  %6875 = vtanh.f32 %v3936_v20  ;;  %v3906_v3 = vadd.f32 %v8915_v43, %v3874_v12  ;;  %v9003_v2 = vadd.f32 %v8936_v32, %v3876_v13 }
 0x27c   : > { %v3907_v6 = vadd.f32 %v8944_v56, %v3875_v14  ;;  %v4027_v47 = vmul.f32 %v3995_v45, %v3771_v29  ;;  %v6109_v21 = vpop.f32.mrb[24].mxu0  ;;  %v3878_v58 = vmul.f32 %v8953_v28, %v3846_v39  ;;  %v3848_v50 = vmul.f32 %v8974_v34, %v3816_v37 }
 0x27d   : > { %v6870_v5 = vpop.eup %6869  ;;  %v4028_v33 = vmul.f32 %v3996_v40, %v3772_v11  ;;  %v9009_v61 = vadd.f32 %v8826_v38, %v6109_v21  ;;  %v3692_v16 = vpop.f32.mrb[25].mxu0  ;;  %v3818_v10 = vmul.f32 0.044715, %v8992_v48  ;;  %v3817_v24 = vmul.f32 0.044715, %v8996_v18 }
 0x27e   : > { %6135 = vmatprep.mubr.msk.f32.mxu1 %vm4060_vm3, %v4027_v47  ;;  %v9015_v44 = vadd.f32 %v8831_v62, %v3692_v16  ;;  %v3997_v7 = vadd.f32 1.0, %v6870_v5  ;;  %v3877_v0 = vmul.f32 %v8961_v31, %v3845_v53  ;;  %v3847_v27 = vmul.f32 %v8978_v4, %v3815_v1 }
 0x27f   : > { %6136 = vmatmul.mubr.msk.f32.gmra.mrb[40].mxu1 %vm4060_vm3, %v4028_v33  ;;  %v3775_v38 = vmul.f32 0.5, %v8908_v42  ;;  %v3937_v46 = vmul.f32 0.7978846, %v3905_v19  ;;  %v3776_v49 = vmul.f32 0.5, %v8901_v52  ;;  %v3938_v11 = vmul.f32 0.7978846, %v3906_v3 }
 0x280   : > { %v6872_v35 = vpop.eup %6871  ;;  %v3819_v22 = vmul.f32 0.044715, %v9015_v44  ;;  %v4029_v36 = vmul.f32 %v3997_v7, %v3773_v54  ;;  %v6112_v63 = vpop.f32.mrb[26].mxu0  ;;  %v3910_v62 = vadd.f32 %v8953_v28, %v3878_v58  ;;  %v3880_v51 = vmul.f32 %v8974_v34, %v3848_v50 }
 0x281   : > { %v3998_v29 = vadd.f32 1.0, %v6872_v35  ;;  %v9026_v26 = vadd.f32 %v8845_v23, %v6112_v63  ;;  %v3702_v12 = vpop.f32.mrb[27].mxu0  ;;  %v3850_v42 = vmul.f32 %v8992_v48, %v3818_v10  ;;  %v3849_v13 = vmul.f32 %v8996_v18, %v3817_v24 }
 0x282   : > { %6138 = vmatprep.mubr.msk.f32.mxu1 %vm4060_vm3, %v4029_v36  ;;  %v9032_v14 = vadd.f32 %v8851_v41, %v3702_v12  ;;  %6877 = vtanh.f32 %v3937_v46  ;;  %v3909_v15 = vadd.f32 %v8961_v31, %v3877_v0  ;;  %v3879_v20 = vmul.f32 %v8978_v4, %v3847_v27 }
 0x283   : > { %v6874_v52 = vpop.eup %6873  ;;  %v4030_v17 = vmul.f32 %v3998_v29, %v3774_v55  ;;  %6879 = vtanh.f32 %v3938_v11  ;;  %v3820_v23 = vmul.f32 0.044715, %v9009_v61  ;;  %v3851_v39 = vmul.f32 %v9015_v44, %v3819_v22 }
 0x284   : > { %v3999_v37 = vadd.f32 1.0, %v6874_v52  ;;  %v6115_v59 = vpop.f32.mrb[28].mxu0  ;;  %v3777_v25 = vmul.f32 0.5, %v8922_v60  ;;  %v3912_v41 = vadd.f32 %v8974_v34, %v3880_v51  ;;  %v3821_v45 = vmul.f32 0.044715, %v9032_v14 }
 0x285   : > { %v6876_v19 = vpop.eup %6875  ;;  %6139 = vmatmul.mubr.msk.f32.gmra.mrb[42].mxu1 %vm4060_vm3, %v4030_v17  ;;  %v9043_v54 = vadd.f32 %v8867_v57, %v6115_v59  ;;  %v3712_v55 = vpop.f32.mrb[29].mxu0  ;;  %v3939_v53 = vmul.f32 0.7978846, %v3907_v6  ;;  %v3882_v1 = vmul.f32 %v8992_v48, %v3850_v42  ;;  %v3881_v40 = vmul.f32 %v8996_v18, %v3849_v13 }
 0x286   : > { %v4031_v3 = vmul.f32 %v3999_v37, %v3775_v38  ;;  %v4000_v47 = vadd.f32 1.0, %v6876_v19  ;;  %v3911_v60 = vadd.f32 %v8978_v4, %v3879_v20  ;;  %v3822_v21 = vmul.f32 0.044715, %v9026_v26 }
 0x287   : > { %v9050_v5 = vadd.f32 %v8876_v30, %v3712_v55  ;;  %6881 = vtanh.f32 %v3939_v53  ;;  %v3852_v58 = vmul.f32 %v9009_v61, %v3820_v23  ;;  %v3883_v57 = vmul.f32 %v9015_v44, %v3851_v39 }
 0x288   : > { %6141 = vmatprep.mubr.msk.f32.mxu1 %vm4060_vm3, %v4031_v3  ;;  %v4032_v6 = vmul.f32 %v4000_v47, %v3776_v49  ;;  %v6118_v50 = vpop.f32.mrb[30].mxu0  ;;  %v3940_v33 = vmul.f32 0.7978846, %v9003_v2  ;;  %v3853_v16 = vmul.f32 %v9032_v14, %v3821_v45  ;;  %v3778_v24 = vmul.f32 0.5, %v8915_v43 }
 0x289   : > { %v3823_v10 = vmul.f32 0.044715, %v9050_v5  ;;  %v9060_v30 = vadd.f32 %v8928_v9, %v6118_v50  ;;  %v3722_v7 = vpop.f32.mrb[31].mxu0  ;;  %v3914_v0 = vadd.f32 %v8992_v48, %v3882_v1  ;;  %v3913_v27 = vadd.f32 %v8996_v18, %v3881_v40 }
 0x28a   : > { %6142 = vmatmul.mubr.msk.f32.gmra.mrb[44].mxu1 %vm4060_vm3, %v4032_v6  ;;  %v9066_v38 = vadd.f32 %v8970_v8, %v3722_v7  ;;  %6883 = vtanh.f32 %v3940_v33  ;;  %v3854_v2 = vmul.f32 %v9026_v26, %v3822_v21  ;;  %v3824_v46 = vmul.f32 0.044715, %v9043_v54 }
 0x28b   : > { %v3855_v43 = vmul.f32 %v9050_v5, %v3823_v10  ;;  %v3941_v35 = vmul.f32 0.7978846, %v3909_v15  ;;  %v3884_v22 = vmul.f32 %v9009_v61, %v3852_v58  ;;  %v3915_v36 = vadd.f32 %v9015_v44, %v3883_v57 }
 0x28c   : > { %v6878_v9 = vpop.eup %6877  ;;  %v3825_v63 = vmul.f32 0.044715, %v9066_v38  ;;  %v3942_v49 = vmul.f32 0.7978846, %v3910_v62  ;;  %v3885_v8 = vmul.f32 %v9032_v14, %v3853_v16  ;;  %v3826_v12 = vmul.f32 0.044715, %v9060_v30 }
 0x28d   : > { %v6880_v11 = vpop.eup %6879  ;;  %v3887_v51 = vmul.f32 %v9050_v5, %v3855_v43  ;;  %v4001_v29 = vadd.f32 1.0, %v6878_v9  ;;  %6885 = vtanh.f32 %v3941_v35  ;;  %v3943_v52 = vmul.f32 0.7978846, %v3911_v60 }
 0x28e   : > { %v4002_v42 = vadd.f32 1.0, %v6880_v11  ;;  %v3857_v13 = vmul.f32 %v9066_v38, %v3825_v63  ;;  %v3886_v15 = vmul.f32 %v9026_v26, %v3854_v2  ;;  %v3856_v20 = vmul.f32 %v9043_v54, %v3824_v46 }
 0x28f   : > { %v4033_v17 = vmul.f32 %v4001_v29, %v3777_v25  ;;  %6887 = vtanh.f32 %v3942_v49  ;;  %v3916_v62 = vadd.f32 %v9009_v61, %v3884_v22  ;;  %v3779_v39 = vmul.f32 0.5, %v8944_v56 }
 0x290   : > { %v4034_v23 = vmul.f32 %v4002_v42, %v3778_v24  ;;  %6889 = vtanh.f32 %v3943_v52  ;;  %v3917_v59 = vadd.f32 %v9032_v14, %v3885_v8  ;;  %v3858_v19 = vmul.f32 %v9060_v30, %v3826_v12 }
 0x291   : > { %v6882_v37 = vpop.eup %6881  ;;  %6144 = vmatprep.mubr.msk.f32.mxu1 %vm4060_vm3, %v4033_v17  ;;  %v3944_v45 = vmul.f32 0.7978846, %v3912_v41  ;;  %v3945_v55 = vmul.f32 0.7978846, %v3913_v27  ;;  %v3919_v53 = vadd.f32 %v9050_v5, %v3887_v51  ;;  %v3889_v25 = vmul.f32 %v9066_v38, %v3857_v13 }
 0x292   : > { %6145 = vmatmul.mubr.msk.f32.gmra.mrb[46].mxu1 %vm4060_vm3, %v4034_v23  ;;  %v4003_v1 = vadd.f32 1.0, %v6882_v37  ;;  %v3946_v40 = vmul.f32 0.7978846, %v3914_v0  ;;  %v3918_v56 = vadd.f32 %v9026_v26, %v3886_v15  ;;  %v3888_v3 = vmul.f32 %v9043_v54, %v3856_v20 }
 0x293   : > { %6891 = vtanh.f32 %v3944_v45  ;;  %v3947_v47 = vmul.f32 0.7978846, %v3915_v36  ;;  %v3948_v58 = vmul.f32 0.7978846, %v3916_v62  ;;  %v3780_v41 = vmul.f32 0.5, %v8936_v32 }
 0x294   : > { %v6884_v60 = vpop.eup %6883  ;;  %v4035_v21 = vmul.f32 %v4003_v1, %v3779_v39  ;;  %6893 = vtanh.f32 %v3945_v55  ;;  %v3949_v6 = vmul.f32 0.7978846, %v3917_v59  ;;  %v3890_v50 = vmul.f32 %v9060_v30, %v3858_v19 }
 0x295   : > { %v4004_v57 = vadd.f32 1.0, %v6884_v60  ;;  %6895 = vtanh.f32 %v3946_v40  ;;  %v3921_v33 = vadd.f32 %v9066_v38, %v3889_v25  ;;  %v3951_v16 = vmul.f32 0.7978846, %v3919_v53 }
 0x296   : > { %6147 = vmatprep.mubr.msk.f32.mxu1 %vm4060_vm3, %v4035_v21  ;;  %6897 = vtanh.f32 %v3947_v47  ;;  %v3920_v10 = vadd.f32 %v9043_v54, %v3888_v3  ;;  %v3950_v7 = vmul.f32 0.7978846, %v3918_v56  ;;  %v3781_v32 = vmul.f32 0.5, %v8961_v31 }
 0x297   : > { %v4036_v24 = vmul.f32 %v4004_v57, %v3780_v41  ;;  %6899 = vtanh.f32 %v3948_v58  ;;  %v6886_v0 = vpop.eup %6885  ;;  %v3782_v46 = vmul.f32 0.5, %v8953_v28  ;;  %v3783_v43 = vmul.f32 0.5, %v8978_v4 }
 0x298   : > { %6901 = vtanh.f32 %v3949_v6  ;;  %v4005_v2 = vadd.f32 1.0, %v6886_v0  ;;  %v3922_v9 = vadd.f32 %v9060_v30, %v3890_v50  ;;  %v3953_v36 = vmul.f32 0.7978846, %v3921_v33 }
 0x299   : > { %v6888_v27 = vpop.eup %6887  ;;  %6148 = vmatmul.mubr.msk.f32.gmra.mrb[48].mxu1 %vm4060_vm3, %v4036_v24  ;;  %6903 = vtanh.f32 %v3951_v16  ;;  %v3952_v11 = vmul.f32 0.7978846, %v3920_v10  ;;  %v3784_v28 = vmul.f32 0.5, %v8974_v34  ;;  %v3785_v42 = vmul.f32 0.5, %v8996_v18  ;;  %v6913_v10 = vld [vmem:[%s7166_s13 + $0x18] sm:$0xff] }
 0x29a   : > { %v6890_v35 = vpop.eup %6889  ;;  %v4006_v22 = vadd.f32 1.0, %v6888_v27  ;;  %v4037_v63 = vmul.f32 %v4005_v2, %v3781_v32  ;;  %6905 = vtanh.f32 %v3950_v7  ;;  %v3954_v52 = vmul.f32 0.7978846, %v3922_v9  ;;  %v6914_v7 = vld [vmem:[%s7166_s13 + $0x20] sm:$0xff] }
 0x29b   : > { %v4007_v49 = vadd.f32 1.0, %v6890_v35  ;;  %6907 = vtanh.f32 %v3953_v36  ;;  %v3787_v39 = vmul.f32 0.5, %v9015_v44  ;;  %v3786_v34 = vmul.f32 0.5, %v8992_v48  ;;  %v6917_v35 = vld [vmem:[%s7166_s13 + $0x38] sm:$0xff] }
 0x29c   : > { %v4038_v8 = vmul.f32 %v4006_v22, %v3782_v46  ;;  %6150 = vmatprep.mubr.msk.f32.mxu1 %vm4060_vm3, %v4037_v63  ;;  %6909 = vtanh.f32 %v3952_v11  ;;  %v3789_v1 = vmul.f32 0.5, %v9032_v14  ;;  %v3788_v44 = vmul.f32 0.5, %v9009_v61  ;;  %v6916_v46 = vld [vmem:[%s7166_s13 + $0x30] sm:$0xff]  ;;  %v6918_v22 = vld [vmem:[%s7166_s13 + $0x40] sm:$0x3] }
 0x29d   : > { %v6892_v51 = vpop.eup %6891  ;;  %v4039_v31 = vmul.f32 %v4007_v49, %v3783_v43  ;;  %6911 = vtanh.f32 %v3954_v52  ;;  %v3791_v21 = vmul.f32 0.5, %v9050_v5  ;;  %v3790_v58 = vmul.f32 0.5, %v9026_v26  ;;  %v6919_v49 = vld [vmem:[%s7166_s13 + $0x48] sm:$0xff] }
 0x29e   : > { %v6894_v29 = vpop.eup %6893  ;;  %6151 = vmatmul.mubr.msk.f32.gmra.mrb[50].mxu1 %vm4060_vm3, %v4038_v8  ;;  %v4008_v4 = vadd.f32 1.0, %v6892_v51  ;;  %v3793_v50 = vmul.f32 0.5, %v9066_v38  ;;  %v3792_v5 = vmul.f32 0.5, %v9043_v54  ;;  %v380_v24 = vrot.slane %v6913_v10, 1  ;;  %v6915_v54 = vld [vmem:[%s7166_s13 + $0x28] sm:$0x3] }
 0x29f   : > { %v6896_v12 = vpop.eup %6895  ;;  %6153 = vmatprep.mubr.msk.f32.mxu1 %vm4060_vm3, %v4039_v31  ;;  %v4009_v13 = vadd.f32 1.0, %v6894_v29  ;;  %v381_v0 = vrot.slane %v6914_v7, 1  ;;  %v3794_v38 = vmul.f32 0.5, %v9060_v30  ;;  %v383_v27 = vrot.slane %v6915_v54, 1  ;;  %v6920_v8 = vld [vmem:[%s7166_s13 + $0x50] sm:$0xff] }
 0x2a0   : > { %v6898_v15 = vpop.eup %6897  ;;  %v4040_v20 = vmul.f32 %v4008_v4, %v3784_v28  ;;  %v4010_v17 = vadd.f32 1.0, %v6896_v12  ;;  %v385_v43 = vrot.slane %v6916_v46, 1  ;;  %v386_v9 = vrot.slane %v6917_v35, 1  ;;  %v6921_v29 = vld [vmem:[%s7166_s13 + $0x58] sm:$0x3]  ;;  %v6922_v12 = vld [vmem:[%s7166_s13 + $0x60] sm:$0xff] }
 0x2a1   : > { %v6900_v62 = vpop.eup %6899  ;;  %v4041_v23 = vmul.f32 %v4009_v13, %v3785_v42  ;;  %v4011_v37 = vadd.f32 1.0, %v6898_v15  ;;  %v382_v2 = vsel %vm379_vm1, %v380_v24, %v381_v0  ;;  %v384_v30 = vsel %vm379_vm1, %v381_v0, %v383_v27  ;;  %v6923_v13 = vld [vmem:[%s7166_s13 + $0x68] sm:$0xff]  ;;  %v6937_v24 = vld [vmem:[%s7166_s13 + $0xd8] sm:$0xff]  ;;  %v6938_v0 = vld [vmem:[%s7166_s13 + $0xe0] sm:$0xff] }
 0x2a2   : > { %v6902_v59 = vpop.eup %6901  ;;  %6154 = vmatmul.mubr.msk.f32.gmra.mrb[52].mxu1 %vm4060_vm3, %v4040_v20  ;;  %v4042_v55 = vmul.f32 %v4010_v17, %v3786_v34  ;;  %v4012_v53 = vadd.f32 1.0, %v6900_v62  ;;  %v388_v36 = vrot.slane %v6918_v22, 1  ;;  %v387_v63 = vsel %vm379_vm1, %v385_v43, %v386_v9  ;;  %v6924_v20 = vld [vmem:[%s7166_s13 + $0x70] sm:$0x3]  ;;  %v6939_v27 = vld [vmem:[%s7166_s13 + $0xe8] sm:$0x3] }
 0x2a3   : > { %6156 = vmatprep.mubr.msk.f32.mxu1 %vm4060_vm3, %v4041_v23  ;;  %v4043_v19 = vmul.f32 %v4011_v37, %v3787_v39  ;;  %v4013_v18 = vadd.f32 1.0, %v6902_v59  ;;  %v6904_v45 = vpop.eup %6903  ;;  %v390_v11 = vrot.slane %v6919_v49, 1  ;;  %v391_v51 = vrot.slane %v6920_v8, 1  ;;  %v6925_v23 = vld [vmem:[%s7166_s13 + $0x78] sm:$0xff]  ;;  %v6926_v37 = vld [vmem:[%s7166_s13 + $0x80] sm:$0xff]  ;;  %v6940_v46 = vld [vmem:[%s7166_s13 + $0xf0] sm:$0xff] }
 0x2a4   : > { %v6906_v25 = vpop.eup %6905  ;;  %v4015_v56 = vadd.f32 1.0, %v6904_v45  ;;  %v4044_v3 = vmul.f32 %v4012_v53, %v3788_v44  ;;  %v389_v31 = vsel %vm379_vm1, %v386_v9, %v388_v36  ;;  %v393_v28 = vrot.slane %v6921_v29, 1  ;;  %v6941_v35 = vld [vmem:[%s7166_s13 + $0xf8] sm:$0xff]  ;;  %v6942_v22 = vld [vmem:[%s7166_s13 + $0x100] sm:$0x3]  ;;  %v6943_v49 = vld [vmem:[%s7166_s13 + $0x108] sm:$0xff] }
 0x2a5   : > { %v4045_v40 = vmul.f32 %v4013_v18, %v3789_v1  ;;  %v6908_v48 = vpop.eup %6907  ;;  %v4014_v47 = vadd.f32 1.0, %v6906_v25  ;;  %v392_v4 = vsel %vm379_vm1, %v390_v11, %v391_v51  ;;  %v395_v42 = vrot.slane %v6922_v12, 1  ;;  %v6929_v25 = vld [vmem:[%s7166_s13 + $0x98] sm:$0xff]  ;;  %v6944_v8 = vld [vmem:[%s7166_s13 + $0x110] sm:$0xff]  ;;  %v6946_v12 = vld [vmem:[%s7166_s13 + $0x120] sm:$0xff] }
 0x2a6   : > { %6157 = vmatmul.mubr.msk.f32.gmra.mrb[54].mxu1 %vm4060_vm3, %v4042_v55  ;;  %v6910_v60 = vpop.eup %6909  ;;  %v4047_v14 = vmul.f32 %v4015_v56, %v3791_v21  ;;  %v4017_v61 = vadd.f32 1.0, %v6908_v48  ;;  %v396_v52 = vrot.slane %v6923_v13, 1  ;;  %v394_v15 = vsel %vm379_vm1, %v391_v51, %v393_v28  ;;  %v6928_v55 = vld [vmem:[%s7166_s13 + $0x90] sm:$0xff]  ;;  %v6945_v29 = vld [vmem:[%s7166_s13 + $0x118] sm:$0x3]  ;;  %v6947_v13 = vld [vmem:[%s7166_s13 + $0x128] sm:$0xff] }
 0x2a7   : > { %6159 = vmatprep.mubr.msk.f32.mxu1 %vm4060_vm3, %v4043_v19  ;;  %v4046_v41 = vmul.f32 %v4014_v47, %v3790_v58  ;;  %v4016_v57 = vadd.f32 1.0, %v6910_v60  ;;  %v6912_v6 = vpop.eup %6911  ;;  %v398_v17 = vrot.slane %v6924_v20, 1  ;;  %v400_v39 = vrot.slane %v6925_v23, 1  ;;  %v6927_v19 = vld [vmem:[%s7166_s13 + $0x88] sm:$0x3]  ;;  %v6932_v60 = vld [vmem:[%s7166_s13 + $0xb0] sm:$0xff] }
 0x2a8   : > { %v4049_v33 = vmul.f32 %v4017_v61, %v3793_v50  ;;  %v4018_v16 = vadd.f32 1.0, %v6912_v6  ;;  %v397_v62 = vsel %vm379_vm1, %v395_v42, %v396_v52  ;;  %v401_v59 = vrot.slane %v6926_v37, 1  ;;  %v6935_v50 = vld [vmem:[%s7166_s13 + $0xc8] sm:$0xff]  ;;  %v6948_v20 = vld [vmem:[%s7166_s13 + $0x130] sm:$0x3]  ;;  %v6949_v23 = vld [vmem:[%s7166_s13 + $0x138] sm:$0xff] }
 0x2a9   : > { %v4048_v26 = vmul.f32 %v4016_v57, %v3792_v5  ;;  %v399_v34 = vsel %vm379_vm1, %v396_v52, %v398_v17  ;;  %v403_v18 = vrot.slane %v6927_v19, 1  ;;  %v405_v53 = vrot.slane %v6928_v55, 1  ;;  %v6934_v57 = vld [vmem:[%s7166_s13 + $0xc0] sm:$0xff]  ;;  %v6951_v19 = vld [vmem:[%s7166_s13 + $0x148] sm:$0x3]  ;;  %v6952_v55 = vld [vmem:[%s7166_s13 + $0x150] sm:$0xff] }
 0x2aa   : > { %6160 = vmatmul.mubr.msk.f32.gmra.mrb[56].mxu1 %vm4060_vm3, %v4044_v3  ;;  %v4050_v32 = vmul.f32 %v4018_v16, %v3794_v38  ;;  %v402_v45 = vsel %vm379_vm1, %v400_v39, %v401_v59  ;;  %v406_v1 = vrot.slane %v6929_v25, 1  ;;  %v6931_v3 = vld [vmem:[%s7166_s13 + $0xa8] sm:$0xff]  ;;  %v411_v21 = vrot.slane %v6932_v60, 1  ;;  %v6950_v37 = vld [vmem:[%s7166_s13 + $0x140] sm:$0xff]  ;;  %v6953_v25 = vld [vmem:[%s7166_s13 + $0x158] sm:$0xff] }
 0x2ab   : > { %6162 = vmatprep.mubr.msk.f32.mxu1 %vm4060_vm3, %v4045_v40  ;;  %v404_v44 = vsel %vm379_vm1, %v401_v59, %v403_v18  ;;  %v6930_v40 = vld [vmem:[%s7166_s13 + $0xa0] sm:$0x3]  ;;  %v410_v47 = vrot.slane %v6931_v3, 1  ;;  %v415_v6 = vrot.slane %v6934_v57, 1  ;;  %v416_v5 = vrot.slane %v6935_v50, 1  ;;  %v6955_v3 = vld [vmem:[%s7166_s13 + $0x168] sm:$0xff] }
 0x2ac   : > { %v408_v56 = vrot.slane %v6930_v40, 1  ;;  %v407_v48 = vsel %vm379_vm1, %v405_v53, %v406_v1  ;;  %v420_v7 = vrot.slane %v6937_v24, 1  ;;  %v421_v38 = vrot.slane %v6938_v0, 1  ;;  %v6954_v40 = vld [vmem:[%s7166_s13 + $0x160] sm:$0x3]  ;;  %v6956_v60 = vld [vmem:[%s7166_s13 + $0x170] sm:$0xff] }
 0x2ad   : > { %v417_v10 = vsel %vm379_vm1, %v415_v6, %v416_v5  ;;  %v425_v43 = vrot.slane %v6940_v46, 1  ;;  %v426_v9 = vrot.slane %v6941_v35, 1  ;;  %v428_v36 = vrot.slane %v6942_v22, 1  ;;  %v6958_v57 = vld [vmem:[%s7166_s13 + $0x180] sm:$0xff]  ;;  %v6959_v50 = vld [vmem:[%s7166_s13 + $0x188] sm:$0xff] }
 0x2ae   : > { %6163 = vmatmul.mubr.msk.f32.gmra.mrb[58].mxu1 %vm4060_vm3, %v4046_v41  ;;  %v409_v58 = vsel %vm379_vm1, %v406_v1, %v408_v56  ;;  %v412_v41 = vsel %vm379_vm1, %v410_v47, %v411_v21  ;;  %v430_v11 = vrot.slane %v6943_v49, 1  ;;  %v431_v51 = vrot.slane %v6944_v8, 1  ;;  %v5182_v0 = vld [vmem:[%s9402_s6] ss:$0 sm:$0xff] }
 0x2af   : > { %6165 = vmatprep.mubr.msk.f32.mxu1 %vm4060_vm3, %v4047_v14  ;;  %v6933_v14 = vld [vmem:[%s7166_s13 + $0xb8] sm:$0x3]  ;;  %v433_v28 = vrot.slane %v6945_v29, 1  ;;  %v435_v42 = vrot.slane %v6946_v12, 1  ;;  %v436_v52 = vrot.slane %v6947_v13, 1  ;;  %v438_v17 = vrot.slane %v6948_v20, 1 }
 0x2b0   : > { %v413_v61 = vrot.slane %v6933_v14, 1  ;;  %v440_v39 = vrot.slane %v6949_v23, 1  ;;  %v441_v59 = vrot.slane %v6950_v37, 1  ;;  %v443_v18 = vrot.slane %v6951_v19, 1  ;;  %v6957_v14 = vld [vmem:[%s7166_s13 + $0x178] sm:$0x3] }
 0x2b1   : > { %v445_v53 = vrot.slane %v6952_v55, 1  ;;  %v446_v1 = vrot.slane %v6953_v25, 1  ;;  %v448_v56 = vrot.slane %v6954_v40, 1  ;;  %v450_v47 = vrot.slane %v6955_v3, 1 }
 0x2b2   : > { %6166 = vmatmul.mubr.msk.f32.gmra.mrb[60].mxu1 %vm4060_vm3, %v4048_v26  ;;  %v6936_v26 = vld [vmem:[%s7166_s13 + $0xd0] sm:$0x3]  ;;  %v455_v6 = vrot.slane %v6958_v57, 1 }
 0x2b3   : > { %6168 = vmatprep.mubr.msk.f32.mxu1 %vm4060_vm3, %v4049_v33  ;;  %v414_v33 = vsel %vm379_vm1, %v411_v21, %v413_v61  ;;  %v418_v16 = vrot.slane %v6936_v26, 1  ;;  %v451_v21 = vrot.slane %v6956_v60, 1  ;;  %v453_v61 = vrot.slane %v6957_v14, 1  ;;  %v6960_v26 = vld [vmem:[%s7166_s13 + $0x190] sm:$0x3]  ;;  %s4826_s13 = sshll.u32 %s269_s29, 8 }
 0x2b4   : > { %s9248_s16 = scalar_lea.vmem [#allocation2], %s4826_s13 }
 0x2b5   : > { %v419_v54 = vsel %vm379_vm1, %v416_v5, %v418_v16  ;;  %v456_v5 = vrot.slane %v6959_v50, 1  ;;  %v458_v16 = vrot.slane %v6960_v26, 1  ;;  %s4760_s18 = sshll.u32 %s9248_s16, 4  ;;  %s9346_s18 = int_to_ptr.vmem [resolvable:$true] %s4760_s18 }
 0x2b6   : > { %6169 = vmatmul.mubr.msk.f32.gmra.mrb[62].mxu1 %vm4060_vm3, %v4050_v32  ;;  %v423_v32 = vrot.slane %v6939_v27, 1  ;;  %s6961_s22 = scalar_lea.vmem %s9346_s18, 4096  ;;  %p6968_p0 = scmp.lt.s32.totalorder %s9346_s18, %s6966_s8 }
 0x2b7   : > { %6179 = vmatprep.mubr.msk.f32.mxu1 %vm958_vm0, %v382_v2  ;;  %v422_v2 = vsel %vm379_vm1, %v420_v7, %v421_v38  ;;  %v459_v24 = vsel %vm379_vm1, %v456_v5, %v458_v16  ;;  %v5149_v7 = vld [vmem:[%s9400_s4] ss:$0 sm:$0xff]  ;;  %p6962_p11 = scmp.ne.s32.totalorder %s9346_s18, %s6961_s22  ;;  %p6969_p1 = scmp.lt.s32.totalorder %s6967_s9, %s6961_s22 }
 0x2b8   : > { %v9246_v27 = vadd.f32 %v5182_v0, %v5149_v7 }
 0x2b9   : > { %p6963_p12 = pnand %p6962_p11, %p7106_p5  ;;  %p6970_p2 = por %p6969_p1, %p6968_p0 }
 0x2ba   : > { %6180 = vmatmul.mubr.msk.f32.vlgmr.msra.gmra.mrb[32].mxu1 %vm958_vm0, %v384_v30  ;;  %v424_v30 = vsel %vm379_vm1, %v421_v38, %v423_v32 }
 0x2bb   : > { %6182 = vmatprep.mubr.msk.f32.mxu1 %vm958_vm0, %v387_v63  ;;  %v427_v63 = vsel %vm379_vm1, %v425_v43, %v426_v9  ;;  %p6964_p13 = pneg %p6963_p12 }
 0x2bd   : > { %p6971_p3 = pnand %p6970_p2, %p6964_p13 }
 0x2be   : > { %6183 = vmatmul.mubr.msk.f32.gmra.mrb[34].mxu1 %vm958_vm0, %v389_v31  ;;  %v429_v31 = vsel %vm379_vm1, %v426_v9, %v428_v36 }
 0x2bf   : > { %6185 = vmatprep.mubr.msk.f32.mxu1 %vm958_vm0, %v392_v4  ;;  %v432_v4 = vsel %vm379_vm1, %v430_v11, %v431_v51 }
 0x2c2   : > { %6186 = vmatmul.mubr.msk.f32.gmra.mrb[36].mxu1 %vm958_vm0, %v394_v15  ;;  %v434_v15 = vsel %vm379_vm1, %v431_v51, %v433_v28 }
 0x2c3   : > { %6188 = vmatprep.mubr.msk.f32.mxu1 %vm958_vm0, %v397_v62  ;;  %v437_v62 = vsel %vm379_vm1, %v435_v42, %v436_v52 }
 0x2c6   : > { %6189 = vmatmul.mubr.msk.f32.gmra.mrb[38].mxu1 %vm958_vm0, %v399_v34  ;;  %v439_v34 = vsel %vm379_vm1, %v436_v52, %v438_v17 }
 0x2c7   : > { %6191 = vmatprep.mubr.msk.f32.mxu1 %vm958_vm0, %v402_v45  ;;  %v442_v45 = vsel %vm379_vm1, %v440_v39, %v441_v59 }
 0x2ca   : > { %6192 = vmatmul.mubr.msk.f32.gmra.mrb[40].mxu1 %vm958_vm0, %v404_v44  ;;  %v444_v44 = vsel %vm379_vm1, %v441_v59, %v443_v18 }
 0x2cb   : > { %6194 = vmatprep.mubr.msk.f32.mxu1 %vm958_vm0, %v407_v48  ;;  %v447_v48 = vsel %vm379_vm1, %v445_v53, %v446_v1 }
 0x2ce   : > { %6195 = vmatmul.mubr.msk.f32.gmra.mrb[42].mxu1 %vm958_vm0, %v409_v58  ;;  %v449_v58 = vsel %vm379_vm1, %v446_v1, %v448_v56 }
 0x2cf   : > { %6197 = vmatprep.mubr.msk.f32.mxu1 %vm958_vm0, %v412_v41  ;;  %v452_v41 = vsel %vm379_vm1, %v450_v47, %v451_v21 }
 0x2d2   : > { %6198 = vmatmul.mubr.msk.f32.gmra.mrb[44].mxu1 %vm958_vm0, %v414_v33  ;;  %v454_v33 = vsel %vm379_vm1, %v451_v21, %v453_v61 }
 0x2d3   : > { %6200 = vmatprep.mubr.msk.f32.mxu1 %vm958_vm0, %v417_v10  ;;  %v457_v10 = vsel %vm379_vm1, %v455_v6, %v456_v5 }
 0x2d6   : > { %6201 = vmatmul.mubr.msk.f32.gmra.mrb[46].mxu1 %vm958_vm0, %v419_v54 }
 0x2d7   : > { %6203 = vmatprep.mubr.msk.f32.mxu1 %vm958_vm0, %v422_v2 }
 0x2da   : > { %6204 = vmatmul.mubr.msk.f32.gmra.mrb[48].mxu1 %vm958_vm0, %v424_v30 }
 0x2db   : > { %6206 = vmatprep.mubr.msk.f32.mxu1 %vm958_vm0, %v427_v63 }
 0x2de   : > { %6207 = vmatmul.mubr.msk.f32.gmra.mrb[50].mxu1 %vm958_vm0, %v429_v31 }
 0x2df   : > { %6209 = vmatprep.mubr.msk.f32.mxu1 %vm958_vm0, %v432_v4 }
 0x2e2   : > { %6210 = vmatmul.mubr.msk.f32.gmra.mrb[52].mxu1 %vm958_vm0, %v434_v15 }
 0x2e3   : > { %6212 = vmatprep.mubr.msk.f32.mxu1 %vm958_vm0, %v437_v62 }
 0x2e6   : > { %6213 = vmatmul.mubr.msk.f32.gmra.mrb[54].mxu1 %vm958_vm0, %v439_v34 }
 0x2e7   : > { %6215 = vmatprep.mubr.msk.f32.mxu1 %vm958_vm0, %v442_v45 }
 0x2ea   : > { %6216 = vmatmul.mubr.msk.f32.gmra.mrb[56].mxu1 %vm958_vm0, %v444_v44 }
 0x2eb   : > { %6218 = vmatprep.mubr.msk.f32.mxu1 %vm958_vm0, %v447_v48 }
 0x2ee   : > { %6219 = vmatmul.mubr.msk.f32.gmra.mrb[58].mxu1 %vm958_vm0, %v449_v58 }
 0x2ef   : > { %6221 = vmatprep.mubr.msk.f32.mxu1 %vm958_vm0, %v452_v41 }
 0x2f2   : > { %6222 = vmatmul.mubr.msk.f32.gmra.mrb[60].mxu1 %vm958_vm0, %v454_v33 }
 0x2f3   : > { %6224 = vmatprep.mubr.msk.f32.mxu1 %vm958_vm0, %v457_v10 }
 0x2f6   : > { %6225 = vmatmul.mubr.msk.f32.gmra.mrb[62].mxu1 %vm958_vm0, %v459_v24 }
 0x38d   : > { %v6181_v38 = vpop.f32.mrb[32].mxu1 }
 0x38e   : > { %v6379_v54 = vadd.f32 %v6181_v38, %v5149_v7  ;;  %v4523_v32 = vpop.f32.mrb[33].mxu1 }
 0x38f   : > { %v6381_v2 = vadd.f32 %v5149_v7, %v4523_v32 }
 0x390   : > { %v6380_v46 = vadd.f32 %v6379_v54, %v5182_v0 }
 0x391   : > { %v6382_v43 = vadd.f32 %v6381_v2, %v5182_v0  ;;  %v6184_v35 = vpop.f32.mrb[34].mxu1 }
 0x392   : > { %4715 = vst.msk [vmem:[%s9248_s16 + $0x8] sm:$0xff] %vm958_vm0, %v6380_v46  ;;  %v6384_v9 = vadd.f32 %v9246_v27, %v6184_v35  ;;  %v4533_v30 = vpop.f32.mrb[35].mxu1 }
 0x393   : > { %4714 = vst.msk [vmem:[%s9248_s16] sm:$0xff] %vm958_vm0, %v6382_v43  ;;  %v6386_v22 = vadd.f32 %v9246_v27, %v4533_v30 }
 0x394   : > { %4717 = vst.msk [vmem:[%s9248_s16 + $0x18] sm:$0xff] %vm958_vm0, %v6384_v9 }
 0x395   : > { %4716 = vst.msk [vmem:[%s9248_s16 + $0x10] sm:$0xff] %vm958_vm0, %v6386_v22  ;;  %v6187_v36 = vpop.f32.mrb[36].mxu1 }
 0x396   : > { %v6388_v63 = vadd.f32 %v9246_v27, %v6187_v36  ;;  %v4543_v49 = vpop.f32.mrb[37].mxu1 }
 0x397   : > { %v6390_v11 = vadd.f32 %v9246_v27, %v4543_v49 }
 0x398   : > { %4719 = vst.msk [vmem:[%s9248_s16 + $0x28] sm:$0xff] %vm958_vm0, %v6388_v63 }
 0x399   : > { %4718 = vst.msk [vmem:[%s9248_s16 + $0x20] sm:$0xff] %vm958_vm0, %v6390_v11  ;;  %v6190_v8 = vpop.f32.mrb[38].mxu1 }
 0x39a   : > { %v6392_v51 = vadd.f32 %v9246_v27, %v6190_v8  ;;  %v4553_v31 = vpop.f32.mrb[39].mxu1 }
 0x39b   : > { %v6394_v29 = vadd.f32 %v9246_v27, %v4553_v31 }
 0x39c   : > { %4721 = vst.msk [vmem:[%s9248_s16 + $0x38] sm:$0xff] %vm958_vm0, %v6392_v51 }
 0x39d   : > { %4720 = vst.msk [vmem:[%s9248_s16 + $0x30] sm:$0xff] %vm958_vm0, %v6394_v29  ;;  %v6193_v28 = vpop.f32.mrb[40].mxu1 }
 0x39e   : > { %v6396_v4 = vadd.f32 %v9246_v27, %v6193_v28  ;;  %v4563_v12 = vpop.f32.mrb[41].mxu1 }
 0x39f   : > { %v6398_v42 = vadd.f32 %v9246_v27, %v4563_v12 }
 0x3a0   : > { %4723 = vst.msk [vmem:[%s9248_s16 + $0x48] sm:$0xff] %vm958_vm0, %v6396_v4 }
 0x3a1   : > { %4722 = vst.msk [vmem:[%s9248_s16 + $0x40] sm:$0xff] %vm958_vm0, %v6398_v42  ;;  %v6196_v13 = vpop.f32.mrb[42].mxu1 }
 0x3a2   : > { %v6400_v52 = vadd.f32 %v9246_v27, %v6196_v13  ;;  %v4573_v15 = vpop.f32.mrb[43].mxu1 }
 0x3a3   : > { %v6402_v20 = vadd.f32 %v9246_v27, %v4573_v15 }
 0x3a4   : > { %4725 = vst.msk [vmem:[%s9248_s16 + $0x58] sm:$0xff] %vm958_vm0, %v6400_v52 }
 0x3a5   : > { %4724 = vst.msk [vmem:[%s9248_s16 + $0x50] sm:$0xff] %vm958_vm0, %v6402_v20  ;;  %v6199_v17 = vpop.f32.mrb[44].mxu1 }
 0x3a6   : > { %v6404_v62 = vadd.f32 %v9246_v27, %v6199_v17  ;;  %v4583_v23 = vpop.f32.mrb[45].mxu1 }
 0x3a7   : > { %v6406_v39 = vadd.f32 %v9246_v27, %v4583_v23 }
 0x3a8   : > { %4727 = vst.msk [vmem:[%s9248_s16 + $0x68] sm:$0xff] %vm958_vm0, %v6404_v62 }
 0x3a9   : > { %4726 = vst.msk [vmem:[%s9248_s16 + $0x60] sm:$0xff] %vm958_vm0, %v6406_v39  ;;  %v6202_v37 = vpop.f32.mrb[46].mxu1 }
 0x3aa   : > { %v6408_v59 = vadd.f32 %v9246_v27, %v6202_v37  ;;  %v4593_v34 = vpop.f32.mrb[47].mxu1 }
 0x3ab   : > { %v6410_v19 = vadd.f32 %v9246_v27, %v4593_v34 }
 0x3ac   : > { %4729 = vst.msk [vmem:[%s9248_s16 + $0x78] sm:$0xff] %vm958_vm0, %v6408_v59 }
 0x3ad   : > { %4728 = vst.msk [vmem:[%s9248_s16 + $0x70] sm:$0xff] %vm958_vm0, %v6410_v19  ;;  %v6205_v18 = vpop.f32.mrb[48].mxu1 }
 0x3ae   : > { %v6412_v45 = vadd.f32 %v9246_v27, %v6205_v18  ;;  %v4603_v55 = vpop.f32.mrb[49].mxu1 }
 0x3af   : > { %v6414_v53 = vadd.f32 %v9246_v27, %v4603_v55 }
 0x3b0   : > { %4731 = vst.msk [vmem:[%s9248_s16 + $0x88] sm:$0xff] %vm958_vm0, %v6412_v45 }
 0x3b1   : > { %4730 = vst.msk [vmem:[%s9248_s16 + $0x80] sm:$0xff] %vm958_vm0, %v6414_v53  ;;  %v6208_v25 = vpop.f32.mrb[50].mxu1 }
 0x3b2   : > { %v6416_v1 = vadd.f32 %v9246_v27, %v6208_v25  ;;  %v4613_v44 = vpop.f32.mrb[51].mxu1 }
 0x3b3   : > { %v6418_v40 = vadd.f32 %v9246_v27, %v4613_v44 }
 0x3b4   : > { %4733 = vst.msk [vmem:[%s9248_s16 + $0x98] sm:$0xff] %vm958_vm0, %v6416_v1 }
 0x3b5   : > { %4732 = vst.msk [vmem:[%s9248_s16 + $0x90] sm:$0xff] %vm958_vm0, %v6418_v40  ;;  %v6211_v56 = vpop.f32.mrb[52].mxu1 }
 0x3b6   : > { %v6420_v48 = vadd.f32 %v9246_v27, %v6211_v56  ;;  %v4623_v3 = vpop.f32.mrb[53].mxu1 }
 0x3b7   : > { %v6422_v47 = vadd.f32 %v9246_v27, %v4623_v3 }
 0x3b8   : > { %4735 = vst.msk [vmem:[%s9248_s16 + $0xa8] sm:$0xff] %vm958_vm0, %v6420_v48 }
 0x3b9   : > { %4734 = vst.msk [vmem:[%s9248_s16 + $0xa0] sm:$0xff] %vm958_vm0, %v6422_v47  ;;  %v6214_v60 = vpop.f32.mrb[54].mxu1 }
 0x3ba   : > { %v6424_v21 = vadd.f32 %v9246_v27, %v6214_v60  ;;  %v4633_v58 = vpop.f32.mrb[55].mxu1 }
 0x3bb   : > { %v6426_v14 = vadd.f32 %v9246_v27, %v4633_v58 }
 0x3bc   : > { %4737 = vst.msk [vmem:[%s9248_s16 + $0xb8] sm:$0xff] %vm958_vm0, %v6424_v21 }
 0x3bd   : > { %4736 = vst.msk [vmem:[%s9248_s16 + $0xb0] sm:$0xff] %vm958_vm0, %v6426_v14  ;;  %v6217_v61 = vpop.f32.mrb[56].mxu1 }
 0x3be   : > { %v6428_v41 = vadd.f32 %v9246_v27, %v6217_v61  ;;  %v4643_v57 = vpop.f32.mrb[57].mxu1 }
 0x3bf   : > { %v6430_v6 = vadd.f32 %v9246_v27, %v4643_v57 }
 0x3c0   : > { %4739 = vst.msk [vmem:[%s9248_s16 + $0xc8] sm:$0xff] %vm958_vm0, %v6428_v41 }
 0x3c1   : > { %4738 = vst.msk [vmem:[%s9248_s16 + $0xc0] sm:$0xff] %vm958_vm0, %v6430_v6  ;;  %v6220_v50 = vpop.f32.mrb[58].mxu1 }
 0x3c2   : > { %v6432_v5 = vadd.f32 %v9246_v27, %v6220_v50  ;;  %v4653_v33 = vpop.f32.mrb[59].mxu1 }
 0x3c3   : > { %v6434_v26 = vadd.f32 %v9246_v27, %v4653_v33 }
 0x3c4   : > { %4741 = vst.msk [vmem:[%s9248_s16 + $0xd8] sm:$0xff] %vm958_vm0, %v6432_v5 }
 0x3c5   : > { %4740 = vst.msk [vmem:[%s9248_s16 + $0xd0] sm:$0xff] %vm958_vm0, %v6434_v26  ;;  %v6223_v16 = vpop.f32.mrb[60].mxu1 }
 0x3c6   : > { %v6436_v10 = vadd.f32 %v9246_v27, %v6223_v16  ;;  %v4663_v24 = vpop.f32.mrb[61].mxu1 }
 0x3c7   : > { %v6438_v7 = vadd.f32 %v9246_v27, %v4663_v24 }
 0x3c8   : > { %4743 = vst.msk [vmem:[%s9248_s16 + $0xe8] sm:$0xff] %vm958_vm0, %v6436_v10 }
 0x3c9   : > { %4742 = vst.msk [vmem:[%s9248_s16 + $0xe0] sm:$0xff] %vm958_vm0, %v6438_v7  ;;  %v6226_v0 = vpop.f32.mrb[62].mxu1 }
 0x3ca   : > { %v6440_v38 = vadd.f32 %v9246_v27, %v6226_v0  ;;  %v4673_v54 = vpop.f32.mrb[63].mxu1 }
 0x3cb   : > { %v6442_v32 = vadd.f32 %v9246_v27, %v4673_v54 }
 0x3cc   : > { %4745 = vst.msk [vmem:[%s9248_s16 + $0xf8] sm:$0xff] %vm958_vm0, %v6440_v38 }
 0x3cd   : > { %4744 = vst.msk [vmem:[%s9248_s16 + $0xf0] sm:$0xff] %vm958_vm0, %v6442_v32 }
 0x3ce   : > { %6974 = shalt.err (!%p6971_p3)
}
 0x3cf   : > { %s6975_s29 = scalar_lea.hbm %s9344_s21, 4096  ;;  %s6979_s13 = scalar_lea.hbm %s9403_s7, 8192 }
 0x3d0   : > { %p6976_p4 = scmp.ne.s32.totalorder %s9344_s21, %s6975_s29  ;;  %p6980_p9 = scmp.lt.u32.totalorder %s9344_s21, %s9403_s7 }
 0x3d1   : > { %p6981_p10 = scmp.lt.u32.totalorder %s6979_s13, %s6975_s29  ;;  %p6983_p12 = scmp.lt.u32.totalorder %s6975_s29, %s9344_s21 }
 0x3d2   : > { %p6977_p7 = pnand %p6976_p4, %p7106_p5 }
 0x3d3   : > { %p6982_p11 = por %p6981_p10, %p6980_p9 }
 0x3d4   : > { %p6978_p8 = pneg %p6977_p7 }
 0x3d5   : > { %p6984_p13 = por %p6983_p12, %p6982_p11 }
 0x3d7   : > { %p6985_p0 = pnand %p6984_p13, %p6978_p8 }
 0x3d9   : > { %6988 = shalt.err (!%p6985_p0)
}
 0x3da   : > { %s7026_s19 = smov 128   ;;  %s7027_s20 = smov 8  }
 0x3db   : > { %6700 = dma.vmem_to_hbm [thread:$0]  (%p7106_p5), %s9346_s18, 4096, %s9344_s21, %s9355_s28, %s7026_s19, %s7026_s19, %s7027_s20  }
 0x3dc PF: > { %p6706_p1 = scmp.ge.s32.totalorder %s7023_s27, 2  ;;  %s4775_s22 = sand.u32 1, %s7011_s24  }
 0x3dd   : > { %s4776_s23 = scalar_lea.sflag [#allocation3], %s4775_s22 }
 0x3de   : > { %p6703_p2 = pnand %p6706_p1, %p7110_p6 }
 0x3e0   : > { %7006 = dma.done.wait (!%p6703_p2), %s4776_s23, 4096  }
 0x3e1   : > { %7008 = vsyncadd (!%p6703_p2), %s4776_s23, 4294963200  ;;  %p17_p3 = scmp.ge.s32.totalorder %s7093_s30, 4   ;;  %s9610_s24 = smov %s7015_s25 }
 0x3e2   : > { %s9611_s25 = smov %s7019_s26  ;;  %s9612_s26 = smov %s7104_s10 }
 0x3e3   : > { %s9613_s27 = smov %s7093_s30  ;;  %19 = sbr.rel (!%p17_p3) target bundleno = 3 (0x3), region = 91 }
 0x3ea   :  { %4781 = vsyncpa [#allocation3], 1 }
 0x3eb   :  { %4783 = vsyncpa [#allocation3 + $0x1], 1 }

</bundles_post_ra>
